<compile_context>
chip_gen: v7x
topology: tpu7x:2x2x1
jax: 0.10.0
libtpu: 0.0.40
codegen_flags: <defaults>
</compile_context>

<pallas_src>
import jax
import jax.numpy as jnp
from jax.experimental import pallas as pl
from jax.experimental.pallas import tpu as pltpu

C, H, W = 3, 256, 256      # fixed by nn.Parameter(torch.ones(3, 256, 256))
CH = C * H                 # 768 -- folded (channel, row) axis; lane axis is W=256


def _mylayer_kernel(x_ref, m_ref, face_ref, o_ref):
    x = x_ref[...]                            # (B, CH, W) f32, streamed
    face = face_ref[...]                      # (B, CH, W) f32, streamed
    m = m_ref[...]                            # (1, CH, W) f32, VMEM-resident, broadcasts over B
    # Exact f32 sigmoid. exp(-z) overflowing to +inf gives exactly 1/(1+inf)=0,
    # matching the PyTorch reference; compute is fully hidden under the DMA.
    sig = 1.0 / (1.0 + jnp.exp(-m * x))
    o_ref[...] = x + face * (sig - x)         # == x*(1-face) + sig*face


def _pick_block_batch(n, target=4):
    """Block-batch: as large as `target` while keeping >= 2 grid steps (megacore)."""
    if n <= 1:
        return 1
    return int(min(target, pl.cdiv(n, 2)))


def mylayer_forward(x, mask, face, m, *, block_batch=None):
    """x, mask, face: (N, C, H, W) float32; m: (C, H, W) float32.

    `mask` is accepted for API parity with the PyTorch module but is unused,
    exactly as in the reference forward.
    """
    del mask  # unused in the reference forward pass
    N = x.shape[0]
    assert x.shape == (N, C, H, W) and face.shape == (N, C, H, W)
    assert m.shape == (C, H, W)

    B = block_batch if block_batch is not None else _pick_block_batch(N)
    grid = (pl.cdiv(N, B),)   # B decoupled from N's divisors; last block may be partial

    x_r = x.reshape(N, CH, W)
    face_r = face.reshape(N, CH, W)
    m_r = m.reshape(1, CH, W)

    out = pl.pallas_call(
        _mylayer_kernel,
        out_shape=jax.ShapeDtypeStruct((N, CH, W), x.dtype),
        grid_spec=pltpu.PrefetchScalarGridSpec(
            num_scalar_prefetch=0,
            grid=grid,
            in_specs=[
                pl.BlockSpec((B, CH, W), lambda i: (i, 0, 0)),  # x slab (streamed)
                pl.BlockSpec((1, CH, W), lambda i: (0, 0, 0)),  # m: constant block -> VMEM-resident
                pl.BlockSpec((B, CH, W), lambda i: (i, 0, 0)),  # face slab (streamed)
            ],
            out_specs=pl.BlockSpec((B, CH, W), lambda i: (i, 0, 0)),
        ),
        compiler_params=pltpu.CompilerParams(
            dimension_semantics=("parallel",),
            vmem_limit_bytes=48 * 1024 * 1024,  # explicit: don't size blocks for the 16 MiB default
        ),
        input_output_aliases={0: 0},  # output reuses x's HBM buffer (x fully consumed)
    )(x_r, m_r, face_r)

    return out.reshape(N, C, H, W)


if __name__ == "__main__":
    key = jax.random.PRNGKey(0)
    k_m, k_x, k_mask, k_face = jax.random.split(key, 4)

    N = 2  # spatial/channel dims are fixed by the parameter shape (3, 256, 256)
    # Parameter init: nn.init.uniform(self.m.data, 0.3, 0.01) -> uniform in [0.01, 0.3]
    m = jax.random.uniform(k_m, (C, H, W), jnp.float32, minval=0.01, maxval=0.3)

    x = jax.random.normal(k_x, (N, C, H, W), jnp.float32)
    mask = jax.random.uniform(k_mask, (N, C, H, W), jnp.float32)          # unused
    face = (jax.random.uniform(k_face, (N, C, H, W)) > 0.5).astype(jnp.float32)

    out = jax.block_until_ready(mylayer_forward(x, mask, face, m))

    # Reference check in plain JAX. The kernel now uses exact f32 math, so the
    # tolerance is tight.
    sig_ref = 1.0 / (1.0 + jnp.exp(-m[None] * x))
    ref = x * (1.0 - face) + sig_ref * face
    assert jnp.allclose(out, ref, atol=1e-6, rtol=1e-6), "mismatch vs reference"

    print("KERNEL_OK")
</pallas_src>

<mosaic_0001>
module attributes {stable_mosaic.version = 11 : i64} {
  func.func @_mylayer_kernel(%arg0: i32, %arg1: memref<1x768x256xf32, #tpu.memory_space<vmem>>, %arg2: memref<1x768x256xf32, #tpu.memory_space<vmem>>, %arg3: memref<1x768x256xf32, #tpu.memory_space<vmem>>, %arg4: memref<1x768x256xf32, #tpu.memory_space<vmem>>) attributes {dimension_semantics = [#tpu.dimension_semantics<parallel>], iteration_bounds = array<i64: 2>, scalar_prefetch = 0 : i64, scratch_operands = 0 : i64, tpu.core_type = #tpu.core_type<tc>, window_params = [{transform_indices = @transform_0, window_bounds = array<i64: 1, 768, 256>}, {pipeline_mode = #tpu.pipeline_mode<synchronous>, transform_indices = @transform_1, window_bounds = array<i64: 1, 768, 256>}, {transform_indices = @transform_2, window_bounds = array<i64: 1, 768, 256>}, {transform_indices = @transform_3, window_bounds = array<i64: 1, 768, 256>}]} {
    %c0 = arith.constant 0 : index
    %c0_0 = arith.constant 0 : index
    %c0_1 = arith.constant 0 : index
    %0 = vector.load %arg1[%c0, %c0_0, %c0_1] : memref<1x768x256xf32, #tpu.memory_space<vmem>>, vector<1x768x256xf32>
    %c0_2 = arith.constant 0 : index
    %c0_3 = arith.constant 0 : index
    %c0_4 = arith.constant 0 : index
    %1 = vector.load %arg3[%c0_2, %c0_3, %c0_4] : memref<1x768x256xf32, #tpu.memory_space<vmem>>, vector<1x768x256xf32>
    %c0_5 = arith.constant 0 : index
    %c0_6 = arith.constant 0 : index
    %c0_7 = arith.constant 0 : index
    %2 = vector.load %arg2[%c0_5, %c0_6, %c0_7] : memref<1x768x256xf32, #tpu.memory_space<vmem>>, vector<1x768x256xf32>
    %cst = arith.constant 0.000000e+00 : f32
    %3 = vector.broadcast %cst : f32 to vector<1x768x256xf32>
    %4 = arith.subf %3, %2 : vector<1x768x256xf32>
    %5 = arith.mulf %4, %0 : vector<1x768x256xf32>
    %6 = math.exp %5 : vector<1x768x256xf32>
    %cst_8 = arith.constant 1.000000e+00 : f32
    %7 = vector.broadcast %cst_8 : f32 to vector<1x768x256xf32>
    %8 = arith.addf %7, %6 : vector<1x768x256xf32>
    %cst_9 = arith.constant 1.000000e+00 : f32
    %9 = vector.broadcast %cst_9 : f32 to vector<1x768x256xf32>
    %10 = arith.divf %9, %8 : vector<1x768x256xf32>
    %11 = arith.subf %10, %0 : vector<1x768x256xf32>
    %12 = arith.mulf %1, %11 : vector<1x768x256xf32>
    %13 = arith.addf %0, %12 : vector<1x768x256xf32>
    %c0_10 = arith.constant 0 : index
    %c0_11 = arith.constant 0 : index
    %c0_12 = arith.constant 0 : index
    %14 = vector.load %arg4[%c0_10, %c0_11, %c0_12] : memref<1x768x256xf32, #tpu.memory_space<vmem>>, vector<1x768x256xf32>
    tpu.vector_store %arg4[%c0_10, %c0_11, %c0_12], %13 {strides = array<i32>} : memref<1x768x256xf32, #tpu.memory_space<vmem>>, vector<1x768x256xf32>,
    return
  }
  func.func @transform_0(%arg0: i32) -> (i32, i32, i32) {
    %c0_i32 = arith.constant 0 : i32
    %c0_i32_0 = arith.constant 0 : i32
    %c0_i32_1 = arith.constant 0 : i32
    return %arg0, %c0_i32, %c0_i32_0 : i32, i32, i32
  }
  func.func @transform_1(%arg0: i32) -> (i32, i32, i32) {
    %c0_i32 = arith.constant 0 : i32
    %c0_i32_0 = arith.constant 0 : i32
    %c0_i32_1 = arith.constant 0 : i32
    %c0_i32_2 = arith.constant 0 : i32
    return %c0_i32, %c0_i32_0, %c0_i32_1 : i32, i32, i32
  }
  func.func @transform_2(%arg0: i32) -> (i32, i32, i32) {
    %c0_i32 = arith.constant 0 : i32
    %c0_i32_0 = arith.constant 0 : i32
    %c0_i32_1 = arith.constant 0 : i32
    return %arg0, %c0_i32, %c0_i32_0 : i32, i32, i32
  }
  func.func @transform_3(%arg0: i32) -> (i32, i32, i32) {
    %c0_i32 = arith.constant 0 : i32
    %c0_i32_0 = arith.constant 0 : i32
    %c0_i32_1 = arith.constant 0 : i32
    return %arg0, %c0_i32, %c0_i32_0 : i32, i32, i32
  }
}

</mosaic_0001>

<bundles_post_ra>
// kernel: tpu_custom_call.1
= control target key start
LH: loop header
LB: loop body
LE: loop exit
PB: predicated region body
PF: predicated region fallthrough
CT: control target
= control target key end

     0   :  { %8 = vsyncpa [#allocation3], 0  ;;  %s6337_s0 = inlined_call_operand.hbm [shape: f32[2,768,256], index: 0, kind: input, shape index: {}, may-alias: {0,3}]   ;;  %s6338_s1 = inlined_call_operand.vmem [shape: f32[1,768,256], index: 1, kind: input, shape index: {}]   ;;  %s6339_s2 = inlined_call_operand.vmem [shape: f32[2,768,256], index: 2, kind: input, shape index: {}]   ;;  %s6340_s3 = inlined_call_operand.hbm [shape: f32[2,768,256], index: 3, kind: output, shape index: {}, may-alias: {0,3}]  }
   0x1   :  { %10 = vsyncpa [#allocation3 + $0x1], 0 }
   0x2   :  { %11 = vsyncpa [#allocation4], 0 }
   0x3   :  { %13 = vsyncpa [#allocation4 + $0x1], 0  ;;  %s3952_s12 = smov 0   ;;  %s3954_s13 = smov 0  }
   0x4   :  { %s3956_s14 = smov 0   ;;  %s3958_s15 = smov 0  }
   0x5 LB: > { %s3973_s16 = sadd.s32 4294967295, %s3924_s15   ;;  %s2996_s17 = sadd.s32 4294967294, %s3924_s15   ;;  %s3924_s15 = sphi %s3958_s15, %s6352_s15   ;;  %s3920_s14 = sphi %s3956_s14, %s6351_s14   ;;  %s3916_s13 = sphi %s3954_s13, %s6350_s13   ;;  %s3912_s12 = sphi %s3952_s12, %s6349_s12  }
   0x6   : > { %s3977_s18 = sadd.s32 1, %s3924_s15   ;;  %s26_s19 = sadd.s32 1, %s3920_s14 }
   0x7   : > { %s23_s20 = ssub.s32 %s3924_s15, %s3977_s18  ;;  %p33_p0 = scmp.ne.s32.totalorder %s3920_s14, %s3916_s13 }
   0x8   : > { %p24_p1 = scmp.eq.s32.totalorder %s23_s20, 0  ;;  %p34_p2 = scmp.eq.s32.totalorder %s3924_s15, 0 }
   0x9   : > { %p39_p3 = scmp.ne.s32.totalorder %s3916_s13, %s3912_s12  ;;  %p40_p4 = scmp.eq.s32.totalorder %s3973_s16, 0 }
   0xa   : > { %s3989_s21 = scalar_select %p24_p1, %s3920_s14, %s26_s19  }
   0xb   : > { %p35_p5 = por %p34_p2, %p33_p0  ;;  %p3991_p6 = por %p40_p4, %p39_p3 }
   0xc   : > { %p110_p7 = scmp.eq.s32.totalorder %s3973_s16, 1  ;;  %p116_p8 = scmp.eq.s32.totalorder %s2996_s17, 1 }
   0xd   : > { %p3022_p10 = scmp.lt.s32.totalorder %s3924_s15, 2  ;;  %s139_s25 = sand.u32 1, %s3920_s14  }
   0xe   : > { %p3998_p11 = por %p110_p7, %p33_p0  ;;  %p4002_p12 = por %p116_p8, %p39_p3 }
   0xf   : > { %s3006_s26 = smul.u32 24576, %s3924_s15  ;;  %p4013_p13 = pnand %p3022_p10, %p35_p5 }
  0x10   : > { %s6343_s23 = scalar_select %p3998_p11, 1, 0 }
  0x11   : > { %s6344_s24 = scalar_select %p4002_p12, 1, 0 }
  0x12   : > { %s3005_s27 = smul.u32 1536, %s139_s25  ;;  %s4011_s30 = scalar_lea.hbm %s6337_s0, %s3006_s26 }
  0x13   : > { %s4019_s7 = scalar_lea.sflag [#allocation3], %s139_s25  ;;  %s3828_s8 = scalar_lea.hbm %s4011_s30, 24576 }
  0x14   : > { %s143_s5 = scalar_lea.vmem [#allocation2], %s3005_s27  ;;  %p3829_p0 = scmp.ne.s32.totalorder %s4011_s30, %s3828_s8 }
  0x15   : > { %s150_s6 = sshll.u32 %s143_s5, 4  ;;  %p3830_p1 = pneg %p4013_p13  ;;  %s4017_s6 = int_to_ptr.vmem [resolvable:$true] %s150_s6 }
  0x16   : > { %s3833_s11 = scalar_lea.hbm %s6337_s0, 49152  ;;  %p3834_p4 = scmp.lt.u32.totalorder %s4011_s30, %s6337_s0 }
  0x17   : > { %p3831_p2 = pnand %p3830_p1, %p3829_p0  ;;  %p3835_p5 = scmp.lt.u32.totalorder %s3833_s11, %s3828_s8 }
  0x18   : > { %p3837_p8 = scmp.lt.u32.totalorder %s3828_s8, %s4011_s30 }
  0x19   : > { %p3832_p3 = pneg %p3831_p2  ;;  %p3836_p7 = por %p3835_p5, %p3834_p4 }
  0x1b   : > { %p3838_p10 = por %p3837_p8, %p3836_p7 }
  0x1d   : > { %p3839_p9 = pnand %p3838_p10, %p3832_p3 }
  0x1f   : > { %3842 = shalt.err (!%p3839_p9)
}
  0x20   : > { %s3843_s20 = scalar_lea.vmem %s4017_s6, 24576  ;;  %s3926_s25 = smov [#allocation2]  }
  0x21   : > { %p3844_p0 = scmp.ne.s32.totalorder %s4017_s6, %s3843_s20  ;;  %s3848_s26 = sshll.u32 %s3926_s25, 4  ;;  %s3849_s26 = int_to_ptr.vmem [resolvable:$false] %s3848_s26 }
  0x22   : > { %s3850_s27 = scalar_lea.vmem %s3849_s26, 49152  ;;  %p3851_p11 = scmp.lt.s32.totalorder %s4017_s6, %s3849_s26 }
  0x23   : > { %p3846_p2 = pnand %p3844_p0, %p3830_p1  ;;  %p3852_p4 = scmp.lt.s32.totalorder %s3850_s27, %s3843_s20 }
  0x25   : > { %p3847_p12 = pneg %p3846_p2  ;;  %p3853_p5 = por %p3852_p4, %p3851_p11 }
  0x27   : > { %p3854_p7 = pnand %p3853_p5, %p3847_p12 }
  0x29   : > { %3857 = shalt.err (!%p3854_p7)
}
  0x2a   : > { %s3927_s28 = smov 256   ;;  %s3928_s29 = smov 16  }
  0x2b   : > { %3017 = dma.hbm_to_vmem [thread:$0]  (!%p4013_p13), %s4011_s30, 24576, %s4017_s6, %s4019_s7, %s3927_s28, %s3927_s28, %s3928_s29  }
  0x2c   : > { %p3000_p9 = scmp.ge.s32.totalorder %s3924_s15, 1  ;;  %p166_p1 = scmp.lt.s32.totalorder %s3924_s15, 3 }
  0x2e   : > { %p167_p3 = pnand %p3000_p9, %p166_p1 }
  0x2f   : > { %s4050_s5 = sand.u32 (!%p167_p3), 1, %s3916_s13  }
  0x30   : > { %170 = sbr.rel (%p167_p3) target bundleno = 530 (0x212), region = 32  ;;  %s173_s9 = scalar_lea.sflag (!%p167_p3), [#allocation3], %s4050_s5 }
  0x31   : > { %s3007_s8 = smul.u32 (!%p167_p3), 1536, %s4050_s5 }
  0x33   : > { %s4056_s10 = scalar_lea.vmem (!%p167_p3), [#allocation2], %s3007_s8 }
  0x37   : > { %3903 = dma.done.wait (%p3991_p6), %s173_s9, 24576  }
  0x38   : > { %3905 = vsyncadd (%p3991_p6), %s173_s9, 4294942720  ;;  %v4063_v0 = vld [vmem:[%s4056_s10] sm:$0xff]  ;;  %v4069_v3 = vld [vmem:[%s4056_s10 + $0x8] sm:$0xff]  ;;  %p204_p6 = scmp.lt.s32.totalorder %s3973_s16, 1  ;;  %s4303_s28 = scalar_lea.vmem [#allocation5], %s3007_s8 }
  0x39   : > { %v593_v1 = vld [vmem:[%s6338_s1] sm:$0xff]  ;;  %v594_v4 = vld [vmem:[%s6338_s1 + $0x8] sm:$0xff]  ;;  %v4075_v6 = vld [vmem:[%s4056_s10 + $0x10] sm:$0xff]  ;;  %s2911_s19 = sshll.u32 %s4303_s28, 4  ;;  %p6346_p12 = scmp.ne.s32.totalorder %s6343_s23, 0  ;;  %s6290_s19 = int_to_ptr.vmem [resolvable:$true] %s2911_s19 }
  0x3a   : > { %v785_v2 = vsub.f32 0.0, %v593_v1  ;;  %v786_v5 = vsub.f32 0.0, %v594_v4  ;;  %v595_v7 = vld [vmem:[%s6338_s1 + $0x10] sm:$0xff]  ;;  %v4082_v10 = vld [vmem:[%s4056_s10 + $0x18] sm:$0xff]  ;;  %v4089_v14 = vld [vmem:[%s4056_s10 + $0x20] sm:$0xff]  ;;  %s4192_s20 = scalar_select %p204_p6, %s3973_s16, 1 }
  0x3b   : > { %v787_v9 = vsub.f32 0.0, %v595_v7  ;;  %v596_v11 = vld [vmem:[%s6338_s1 + $0x18] sm:$0xff]  ;;  %v597_v15 = vld [vmem:[%s6338_s1 + $0x20] sm:$0xff]  ;;  %v4096_v19 = vld [vmem:[%s4056_s10 + $0x28] sm:$0xff]  ;;  %s3929_s8 = smov [#allocation5]  }
  0x3c   : > { %v977_v8 = vmul.f32 %v785_v2, %v4063_v0  ;;  %v978_v12 = vmul.f32 %v786_v5, %v4069_v3  ;;  %v788_v13 = vsub.f32 0.0, %v596_v11  ;;  %v789_v18 = vsub.f32 0.0, %v597_v15  ;;  %v598_v20 = vld [vmem:[%s6338_s1 + $0x28] sm:$0xff]  ;;  %v4103_v24 = vld [vmem:[%s4056_s10 + $0x30] sm:$0xff]  ;;  %v4110_v29 = vld [vmem:[%s4056_s10 + $0x38] sm:$0xff]  ;;  %s3008_s29 = smul.u32 1536, %s4192_s20 }
  0x3d   : > { %v979_v17 = vmul.f32 %v787_v9, %v4075_v6  ;;  %v790_v23 = vsub.f32 0.0, %v598_v20  ;;  %v599_v25 = vld [vmem:[%s6338_s1 + $0x30] sm:$0xff]  ;;  %v600_v30 = vld [vmem:[%s6338_s1 + $0x38] sm:$0xff]  ;;  %v4117_v34 = vld [vmem:[%s4056_s10 + $0x40] sm:$0xff] }
  0x3e   : > { %v1169_v16 = vmul.f32 1.442695, %v977_v8  ;;  %v1171_v21 = vmul.f32 1.442695, %v978_v12  ;;  %v980_v22 = vmul.f32 %v788_v13, %v4082_v10  ;;  %v981_v27 = vmul.f32 %v789_v18, %v4089_v14  ;;  %v601_v35 = vld [vmem:[%s6338_s1 + $0x40] sm:$0xff]  ;;  %v4124_v39 = vld [vmem:[%s4056_s10 + $0x48] sm:$0xff]  ;;  %s4251_s25 = scalar_lea.vmem %s6339_s2, %s3008_s29 }
  0x3f   : > { %v1173_v26 = vmul.f32 1.442695, %v979_v17  ;;  %v791_v28 = vsub.f32 0.0, %v599_v25  ;;  %v982_v32 = vmul.f32 %v790_v23, %v4096_v19  ;;  %v792_v33 = vsub.f32 0.0, %v600_v30  ;;  %v602_v40 = vld [vmem:[%s6338_s1 + $0x48] sm:$0xff]  ;;  %v4131_v44 = vld [vmem:[%s4056_s10 + $0x50] sm:$0xff] }
  0x40   : > { %3060 = vpow2.f32 %v1169_v16  ;;  %v1175_v31 = vmul.f32 1.442695, %v980_v22  ;;  %v1177_v36 = vmul.f32 1.442695, %v981_v27  ;;  %v793_v38 = vsub.f32 0.0, %v601_v35  ;;  %v603_v45 = vld [vmem:[%s6338_s1 + $0x50] sm:$0xff] }
  0x41   : > { %3062 = vpow2.f32 %v1171_v21  ;;  %v983_v37 = vmul.f32 %v791_v28, %v4103_v24  ;;  %v1179_v41 = vmul.f32 1.442695, %v982_v32  ;;  %v984_v42 = vmul.f32 %v792_v33, %v4110_v29  ;;  %v4138_v49 = vld [vmem:[%s4056_s10 + $0x58] sm:$0xff]  ;;  %v4145_v54 = vld [vmem:[%s4056_s10 + $0x60] sm:$0xff]  ;;  %v4152_v59 = vld [vmem:[%s4056_s10 + $0x68] sm:$0xff]  ;;  %s3862_s29 = sshll.u32 %s3929_s8, 4  ;;  %s3863_s29 = int_to_ptr.vmem [resolvable:$false] %s3862_s29 }
  0x42   : > { %3064 = vpow2.f32 %v1173_v26  ;;  %v794_v43 = vsub.f32 0.0, %v602_v40  ;;  %v985_v47 = vmul.f32 %v793_v38, %v4117_v34  ;;  %v795_v48 = vsub.f32 0.0, %v603_v45  ;;  %v604_v50 = vld [vmem:[%s6338_s1 + $0x58] sm:$0xff]  ;;  %v605_v55 = vld [vmem:[%s6338_s1 + $0x60] sm:$0xff]  ;;  %v606_v60 = vld [vmem:[%s6338_s1 + $0x68] sm:$0xff]  ;;  %s3864_s9 = scalar_lea.vmem %s3863_s29, 49152  ;;  %p3865_p10 = scmp.lt.s32.totalorder %s6290_s19, %s3863_s29 }
  0x43   : > { %3066 = vpow2.f32 %v1175_v31  ;;  %v1181_v46 = vmul.f32 1.442695, %v983_v37  ;;  %v1183_v51 = vmul.f32 1.442695, %v984_v42  ;;  %v796_v53 = vsub.f32 0.0, %v604_v50  ;;  %v4159_v1 = vld [vmem:[%s4056_s10 + $0x70] sm:$0xff] }
  0x44   : > { %3068 = vpow2.f32 %v1177_v36  ;;  %v986_v52 = vmul.f32 %v794_v43, %v4124_v39  ;;  %v1185_v56 = vmul.f32 1.442695, %v985_v47  ;;  %v987_v57 = vmul.f32 %v795_v48, %v4131_v44  ;;  %v607_v2 = vld [vmem:[%s6338_s1 + $0x70] sm:$0xff]  ;;  %v4167_v8 = vld [vmem:[%s4056_s10 + $0x78] sm:$0xff]  ;;  %v4174_v15 = vld [vmem:[%s4056_s10 + $0x80] sm:$0xff] }
  0x45   : > { %3070 = vpow2.f32 %v1179_v41  ;;  %v797_v58 = vsub.f32 0.0, %v605_v55  ;;  %v988_v62 = vmul.f32 %v796_v53, %v4138_v49  ;;  %v798_v63 = vsub.f32 0.0, %v606_v60  ;;  %v608_v9 = vld [vmem:[%s6338_s1 + $0x78] sm:$0xff]  ;;  %v609_v16 = vld [vmem:[%s6338_s1 + $0x80] sm:$0xff]  ;;  %v610_v22 = vld [vmem:[%s6338_s1 + $0x88] sm:$0xff] }
  0x46   : > { %3072 = vpow2.f32 %v1181_v46  ;;  %v1187_v61 = vmul.f32 1.442695, %v986_v52  ;;  %v1189_v4 = vmul.f32 1.442695, %v987_v57  ;;  %v799_v7 = vsub.f32 0.0, %v607_v2  ;;  %v611_v28 = vld [vmem:[%s6338_s1 + $0x90] sm:$0xff] }
  0x47   : > { %3074 = vpow2.f32 %v1183_v51  ;;  %v989_v5 = vmul.f32 %v797_v58, %v4145_v54  ;;  %v1191_v11 = vmul.f32 1.442695, %v988_v62  ;;  %v990_v12 = vmul.f32 %v798_v63, %v4152_v59  ;;  %v4198_v35 = vld [vmem:[%s4056_s10 + $0x88] sm:$0xff]  ;;  %v612_v36 = vld [vmem:[%s6338_s1 + $0x98] sm:$0xff]  ;;  %v4206_v42 = vld [vmem:[%s4056_s10 + $0x90] sm:$0xff] }
  0x48   : > { %3076 = vpow2.f32 %v1185_v56  ;;  %v800_v13 = vsub.f32 0.0, %v608_v9  ;;  %v991_v20 = vmul.f32 %v799_v7, %v4159_v1  ;;  %v801_v21 = vsub.f32 0.0, %v609_v16  ;;  %v4211_v48 = vld [vmem:[%s4056_s10 + $0x98] sm:$0xff]  ;;  %v613_v50 = vld [vmem:[%s6338_s1 + $0xa0] sm:$0xff]  ;;  %v614_v62 = vld [vmem:[%s6338_s1 + $0xa8] sm:$0xff] }
  0x49   : > { %3078 = vpow2.f32 %v1187_v61  ;;  %v1193_v18 = vmul.f32 1.442695, %v989_v5  ;;  %v4183_v26 = vmul.f32 1.442695, %v990_v12  ;;  %v802_v41 = vsub.f32 0.0, %v610_v22  ;;  %v4218_v56 = vld [vmem:[%s4056_s10 + $0xa0] sm:$0xff] }
  0x4a   : > { %v3061_v17 = vpop.eup %3060  ;;  %3080 = vpow2.f32 %v1189_v4  ;;  %v992_v27 = vmul.f32 %v800_v13, %v4167_v8  ;;  %v4194_v32 = vmul.f32 1.442695, %v991_v20  ;;  %v993_v33 = vmul.f32 %v801_v21, %v4174_v15  ;;  %v615_v7 = vld [vmem:[%s6338_s1 + $0xb0] sm:$0xff]  ;;  %v4235_v16 = vld [vmem:[%s4056_s10 + $0xa8] sm:$0xff] }
  0x4b   : > { %v3063_v23 = vpop.eup %3062  ;;  %v1553_v25 = vadd.f32 1.0, %v3061_v17  ;;  %3082 = vpow2.f32 %v1191_v11  ;;  %v803_v47 = vsub.f32 0.0, %v611_v28  ;;  %v994_v53 = vmul.f32 %v802_v41, %v4198_v35  ;;  %v616_v17 = vld [vmem:[%s6338_s1 + $0xb8] sm:$0xff] }
  0x4c   : > { %v3065_v30 = vpop.eup %3064  ;;  %v1554_v31 = vadd.f32 1.0, %v3063_v23  ;;  %3084 = vpow2.f32 %v1193_v18  ;;  %v4203_v40 = vmul.f32 1.442695, %v992_v27  ;;  %v4208_v46 = vmul.f32 1.442695, %v993_v33  ;;  %v4243_v23 = vld [vmem:[%s4056_s10 + $0xb0] sm:$0xff] }
  0x4d   : > { %v3067_v37 = vpop.eup %3066  ;;  %3086 = vrcp.f32 %v1553_v25  ;;  %v1555_v38 = vadd.f32 1.0, %v3065_v30  ;;  %v804_v55 = vsub.f32 0.0, %v612_v36  ;;  %v995_v60 = vmul.f32 %v803_v47, %v4206_v42  ;;  %v617_v25 = vld [vmem:[%s6338_s1 + $0xc0] sm:$0xff]  ;;  %v4256_v33 = vld [vmem:[%s4056_s10 + $0xb8] sm:$0xff] }
  0x4e   : > { %v3069_v43 = vpop.eup %3068  ;;  %3088 = vrcp.f32 %v1554_v31  ;;  %v1556_v45 = vadd.f32 1.0, %v3067_v37  ;;  %v805_v61 = vsub.f32 0.0, %v613_v50  ;;  %v4225_v4 = vmul.f32 1.442695, %v994_v53 }
  0x4f   : > { %v3071_v51 = vpop.eup %3070  ;;  %3090 = vrcp.f32 %v1555_v38  ;;  %v1557_v52 = vadd.f32 1.0, %v3069_v43  ;;  %v996_v5 = vmul.f32 %v804_v55, %v4211_v48  ;;  %v4231_v12 = vmul.f32 1.442695, %v995_v60  ;;  %v4260_v43 = vld [vmem:[%s4056_s10 + $0xc0] sm:$0xff] }
  0x50   : > { %v3073_v57 = vpop.eup %3072  ;;  %3092 = vrcp.f32 %v1556_v45  ;;  %v1558_v58 = vadd.f32 1.0, %v3071_v51  ;;  %v997_v13 = vmul.f32 %v805_v61, %v4218_v56  ;;  %v806_v22 = vsub.f32 0.0, %v614_v62  ;;  %v401_v55 = vld [vmem:[%s4251_s25] sm:$0xff] }
  0x51   : > { %v3075_v63 = vpop.eup %3074  ;;  %3094 = vrcp.f32 %v1557_v52  ;;  %v1559_v2 = vadd.f32 1.0, %v3073_v57  ;;  %v4240_v21 = vmul.f32 1.442695, %v996_v5  ;;  %v807_v31 = vsub.f32 0.0, %v615_v7  ;;  %v618_v52 = vld [vmem:[%s6338_s1 + $0xc8] sm:$0xff] }
  0x52   : > { %v3077_v9 = vpop.eup %3076  ;;  %3096 = vrcp.f32 %v1558_v58  ;;  %v1560_v11 = vadd.f32 1.0, %v3075_v63  ;;  %v4253_v30 = vmul.f32 1.442695, %v997_v13  ;;  %v998_v38 = vmul.f32 %v806_v22, %v4235_v16  ;;  %v402_v63 = vld [vmem:[%s4251_s25 + $0x8] sm:$0xff]  ;;  %v403_v13 = vld [vmem:[%s4251_s25 + $0x10] sm:$0xff] }
  0x53   : > { %v3079_v18 = vpop.eup %3078  ;;  %3098 = vrcp.f32 %v1559_v2  ;;  %v1561_v20 = vadd.f32 1.0, %v3077_v9  ;;  %v808_v41 = vsub.f32 0.0, %v616_v17  ;;  %v999_v50 = vmul.f32 %v807_v31, %v4243_v23  ;;  %v4276_v7 = vld [vmem:[%s4056_s10 + $0xc8] sm:$0xff] }
  0x54   : > { %v3081_v27 = vpop.eup %3080  ;;  %3100 = vrcp.f32 %v1560_v11  ;;  %v1562_v28 = vadd.f32 1.0, %v3079_v18  ;;  %v809_v51 = vsub.f32 0.0, %v617_v25  ;;  %v4267_v58 = vmul.f32 1.442695, %v998_v38  ;;  %v405_v38 = vld [vmem:[%s4251_s25 + $0x20] sm:$0xff] }
  0x55   : > { %v3083_v36 = vpop.eup %3082  ;;  %3102 = vrcp.f32 %v1561_v20  ;;  %v1563_v37 = vadd.f32 1.0, %v3081_v27  ;;  %v1000_v60 = vmul.f32 %v808_v41, %v4256_v33  ;;  %v4272_v2 = vmul.f32 1.442695, %v999_v50  ;;  %v404_v27 = vld [vmem:[%s4251_s25 + $0x18] sm:$0xff] }
  0x56   : > { %v3085_v45 = vpop.eup %3084  ;;  %3104 = vrcp.f32 %v1562_v28  ;;  %v1564_v47 = vadd.f32 1.0, %v3083_v36  ;;  %v1001_v5 = vmul.f32 %v809_v51, %v4260_v43  ;;  %v810_v18 = vsub.f32 0.0, %v618_v52  ;;  %v406_v51 = vld [vmem:[%s4251_s25 + $0x28] sm:$0xff] }
  0x57   : > { %v3087_v53 = vpop.eup %3086  ;;  %3106 = vrcp.f32 %v1563_v37  ;;  %v1565_v57 = vadd.f32 1.0, %v3085_v45  ;;  %v4280_v17 = vmul.f32 1.442695, %v1000_v60 }
  0x58   : > { %v3089_v61 = vpop.eup %3088  ;;  %v2129_v62 = vsub.f32 %v3087_v53, %v4063_v0  ;;  %3108 = vrcp.f32 %v1564_v47  ;;  %v4285_v28 = vmul.f32 1.442695, %v1001_v5  ;;  %v4291_v41 = vmul.f32 %v810_v18, %v4276_v7  ;;  %v410_v18 = vld [vmem:[%s4251_s25 + $0x48] sm:$0xff] }
  0x59   : > { %v3091_v9 = vpop.eup %3090  ;;  %v2130_v11 = vsub.f32 %v3089_v61, %v4069_v3  ;;  %3110 = vrcp.f32 %v1565_v57  ;;  %v408_v61 = vld [vmem:[%s4251_s25 + $0x38] sm:$0xff] }
  0x5a   : > { %v3093_v20 = vpop.eup %3092  ;;  %v2321_v22 = vmul.f32 %v2129_v62, %v401_v55  ;;  %v2131_v25 = vsub.f32 %v3091_v9, %v4075_v6  ;;  %3112 = vpow2.f32 %v4183_v26  ;;  %v409_v9 = vld [vmem:[%s4251_s25 + $0x40] sm:$0xff] }
  0x5b   : > { %v3095_v31 = vpop.eup %3094  ;;  %v2322_v36 = vmul.f32 %v2130_v11, %v402_v63  ;;  %v2132_v37 = vsub.f32 %v3093_v20, %v4082_v10  ;;  %3114 = vpow2.f32 %v4194_v32  ;;  %v407_v32 = vld [vmem:[%s4251_s25 + $0x30] sm:$0xff] }
  0x5c   : > { %v3097_v45 = vpop.eup %3096  ;;  %v2513_v47 = vadd.f32 %v2321_v22, %v4063_v0  ;;  %v2323_v50 = vmul.f32 %v2131_v25, %v403_v13  ;;  %v2133_v26 = vsub.f32 %v3095_v31, %v4089_v14  ;;  %3116 = vpow2.f32 %v4203_v40  ;;  %v411_v25 = vld [vmem:[%s4251_s25 + $0x50] sm:$0xff] }
  0x5d   : > { %v3099_v52 = vpop.eup %3098  ;;  %v2514_v53 = vadd.f32 %v2322_v36, %v4069_v3  ;;  %v2324_v55 = vmul.f32 %v2132_v37, %v404_v27  ;;  %v2134_v57 = vsub.f32 %v3097_v45, %v4096_v19  ;;  %3118 = vpow2.f32 %v4208_v46  ;;  %v412_v36 = vld [vmem:[%s4251_s25 + $0x58] sm:$0xff] }
  0x5e   : > { %v3101_v60 = vpop.eup %3100  ;;  %2705 = vst [vmem:[%s4303_s28] sm:$0xff] %v2513_v47  ;;  %v2515_v0 = vadd.f32 %v2323_v50, %v4075_v6  ;;  %v2325_v40 = vmul.f32 %v2133_v26, %v405_v38  ;;  %v2135_v3 = vsub.f32 %v3099_v52, %v4103_v24  ;;  %3120 = vpow2.f32 %v4225_v4 }
  0x5f   : > { %v3103_v62 = vpop.eup %3102  ;;  %2706 = vst [vmem:[%s4303_s28 + $0x8] sm:$0xff] %v2514_v53  ;;  %v2516_v46 = vadd.f32 %v2324_v55, %v4082_v10  ;;  %v2326_v63 = vmul.f32 %v2134_v57, %v406_v51  ;;  %v2136_v5 = vsub.f32 %v3101_v60, %v4110_v29  ;;  %3122 = vpow2.f32 %v4231_v12 }
  0x60   : > { %v3105_v6 = vpop.eup %3104  ;;  %2707 = vst [vmem:[%s4303_s28 + $0x10] sm:$0xff] %v2515_v0  ;;  %v2517_v11 = vadd.f32 %v2325_v40, %v4089_v14  ;;  %v2327_v13 = vmul.f32 %v2135_v3, %v407_v32  ;;  %v2137_v4 = vsub.f32 %v3103_v62, %v4117_v34  ;;  %3124 = vpow2.f32 %v4240_v21  ;;  %v4362_v3 = vld [vmem:[%s4056_s10 + $0xd8] sm:$0xff] }
  0x61   : > { %v3107_v10 = vpop.eup %3106  ;;  %2708 = vst [vmem:[%s4303_s28 + $0x18] sm:$0xff] %v2516_v46  ;;  %v2518_v20 = vadd.f32 %v2326_v63, %v4096_v19  ;;  %v2328_v22 = vmul.f32 %v2136_v5, %v408_v61  ;;  %v2138_v12 = vsub.f32 %v3105_v6, %v4124_v39  ;;  %3126 = vpow2.f32 %v4253_v30  ;;  %v413_v30 = vld [vmem:[%s4251_s25 + $0x60] sm:$0xff] }
  0x62   : > { %v3109_v14 = vpop.eup %3108  ;;  %2709 = vst [vmem:[%s4303_s28 + $0x20] sm:$0xff] %v2517_v11  ;;  %v2519_v27 = vadd.f32 %v2327_v13, %v4103_v24  ;;  %v2329_v31 = vmul.f32 %v2137_v4, %v409_v9  ;;  %v2139_v21 = vsub.f32 %v3107_v10, %v4131_v44  ;;  %3128 = vpow2.f32 %v4267_v58  ;;  %v4370_v5 = vld [vmem:[%s4056_s10 + $0xe0] sm:$0xff]  ;;  %v4375_v13 = vld [vmem:[%s4056_s10 + $0xe8] sm:$0xff] }
  0x63   : > { %v3111_v19 = vpop.eup %3110  ;;  %2710 = vst [vmem:[%s4303_s28 + $0x28] sm:$0xff] %v2518_v20  ;;  %v2520_v37 = vadd.f32 %v2328_v22, %v4110_v29  ;;  %v2330_v38 = vmul.f32 %v2138_v12, %v410_v18  ;;  %v2140_v45 = vsub.f32 %v3109_v14, %v4138_v49  ;;  %3130 = vpow2.f32 %v4272_v2  ;;  %v619_v29 = vld [vmem:[%s6338_s1 + $0xd0] sm:$0xff] }
  0x64   : > { %v3113_v47 = vpop.eup %3112  ;;  %2711 = vst [vmem:[%s4303_s28 + $0x30] sm:$0xff] %v2519_v27  ;;  %v2521_v24 = vadd.f32 %v2329_v31, %v4117_v34  ;;  %v2331_v50 = vmul.f32 %v2139_v21, %v411_v25  ;;  %v2141_v26 = vsub.f32 %v3111_v19, %v4145_v54  ;;  %3132 = vpow2.f32 %v4280_v17  ;;  %v620_v34 = vld [vmem:[%s6338_s1 + $0xd8] sm:$0xff]  ;;  %v623_v20 = vld [vmem:[%s6338_s1 + $0xf0] sm:$0xff] }
  0x65   : > { %v3115_v58 = vpop.eup %3114  ;;  %2712 = vst [vmem:[%s4303_s28 + $0x38] sm:$0xff] %v2520_v37  ;;  %v2522_v2 = vadd.f32 %v2330_v38, %v4124_v39  ;;  %v2332_v51 = vmul.f32 %v2140_v45, %v412_v36  ;;  %v1566_v52 = vadd.f32 1.0, %v3113_v47  ;;  %3134 = vpow2.f32 %v4285_v28  ;;  %v4354_v39 = vld [vmem:[%s4056_s10 + $0xd0] sm:$0xff]  ;;  %v621_v28 = vld [vmem:[%s6338_s1 + $0xe0] sm:$0xff]  ;;  %v624_v27 = vld [vmem:[%s6338_s1 + $0xf8] sm:$0xff] }
  0x66   : > { %v3117_v53 = vpop.eup %3116  ;;  %2713 = vst [vmem:[%s4303_s28 + $0x40] sm:$0xff] %v2521_v24  ;;  %v2523_v17 = vadd.f32 %v2331_v50, %v4131_v44  ;;  %v2333_v55 = vmul.f32 %v2141_v26, %v413_v30  ;;  %v1567_v57 = vadd.f32 1.0, %v3115_v58  ;;  %v4351_v32 = vmul.f32 1.442695, %v4291_v41  ;;  %v622_v41 = vld [vmem:[%s6338_s1 + $0xe8] sm:$0xff]  ;;  %v4388_v37 = vld [vmem:[%s4056_s10 + $0xf0] sm:$0xff] }
  0x67   : > { %v3119_v60 = vpop.eup %3118  ;;  %2714 = vst [vmem:[%s4303_s28 + $0x48] sm:$0xff] %v2522_v2  ;;  %v2524_v0 = vadd.f32 %v2332_v51, %v4138_v49  ;;  %3136 = vrcp.f32 %v1566_v52  ;;  %v1568_v40 = vadd.f32 1.0, %v3117_v53  ;;  %v811_v44 = vsub.f32 0.0, %v619_v29  ;;  %v625_v38 = vld [vmem:[%s6338_s1 + $0x100] sm:$0xff]  ;;  %v4394_v50 = vld [vmem:[%s4056_s10 + $0xf8] sm:$0xff]  ;;  %v626_v26 = vld [vmem:[%s6338_s1 + $0x108] sm:$0xff] }
  0x68   : > { %v3121_v61 = vpop.eup %3120  ;;  %2715 = vst [vmem:[%s4303_s28 + $0x50] sm:$0xff] %v2523_v17  ;;  %v2525_v62 = vadd.f32 %v2333_v55, %v4145_v54  ;;  %3138 = vrcp.f32 %v1567_v57  ;;  %v1569_v46 = vadd.f32 1.0, %v3119_v60  ;;  %v812_v63 = vsub.f32 0.0, %v620_v34  ;;  %v4400_v52 = vld [vmem:[%s4056_s10 + $0x100] sm:$0xff]  ;;  %v627_v34 = vld [vmem:[%s6338_s1 + $0x110] sm:$0xff] }
  0x69   : > { %v3123_v49 = vpop.eup %3122  ;;  %2716 = vst [vmem:[%s4303_s28 + $0x58] sm:$0xff] %v2524_v0  ;;  %3140 = vrcp.f32 %v1568_v40  ;;  %v1570_v9 = vadd.f32 1.0, %v3121_v61  ;;  %v1003_v6 = vmul.f32 %v811_v44, %v4354_v39  ;;  %v813_v11 = vsub.f32 0.0, %v621_v28  ;;  %v4407_v28 = vld [vmem:[%s4056_s10 + $0x108] sm:$0xff]  ;;  %v4411_v44 = vld [vmem:[%s4056_s10 + $0x110] sm:$0xff] }
  0x6a   : > { %v3125_v4 = vpop.eup %3124  ;;  %2717 = vst [vmem:[%s4303_s28 + $0x60] sm:$0xff] %v2525_v62  ;;  %3142 = vrcp.f32 %v1569_v46  ;;  %v1571_v18 = vadd.f32 1.0, %v3123_v49  ;;  %v1004_v54 = vmul.f32 %v812_v63, %v4362_v3  ;;  %v814_v10 = vsub.f32 0.0, %v622_v41  ;;  %v414_v61 = vld [vmem:[%s4251_s25 + $0x68] sm:$0xff] }
  0x6b   : > { %v3127_v22 = vpop.eup %3126  ;;  %3144 = vrcp.f32 %v1570_v9  ;;  %v1572_v12 = vadd.f32 1.0, %v3125_v4  ;;  %v1221_v25 = vmul.f32 1.442695, %v1003_v6  ;;  %v1005_v14 = vmul.f32 %v813_v11, %v4370_v5  ;;  %v415_v6 = vld [vmem:[%s4251_s25 + $0x70] sm:$0xff] }
  0x6c   : > { %v3129_v31 = vpop.eup %3128  ;;  %3146 = vrcp.f32 %v1571_v18  ;;  %v1573_v21 = vadd.f32 1.0, %v3127_v22  ;;  %v1223_v36 = vmul.f32 1.442695, %v1004_v54  ;;  %v1006_v19 = vmul.f32 %v814_v10, %v4375_v13  ;;  %v416_v10 = vld [vmem:[%s4251_s25 + $0x78] sm:$0xff] }
  0x6d   : > { %v3131_v45 = vpop.eup %3130  ;;  %3148 = vrcp.f32 %v1572_v12  ;;  %v1574_v30 = vadd.f32 1.0, %v3129_v31  ;;  %v1225_v47 = vmul.f32 1.442695, %v1005_v14  ;;  %v815_v24 = vsub.f32 0.0, %v623_v20  ;;  %v417_v31 = vld [vmem:[%s4251_s25 + $0x80] sm:$0xff] }
  0x6e   : > { %v3133_v29 = vpop.eup %3132  ;;  %3150 = vrcp.f32 %v1573_v21  ;;  %v1575_v58 = vadd.f32 1.0, %v3131_v45  ;;  %v1227_v2 = vmul.f32 1.442695, %v1006_v19  ;;  %v816_v51 = vsub.f32 0.0, %v624_v27 }
  0x6f   : > { %v3135_v53 = vpop.eup %3134  ;;  %3152 = vrcp.f32 %v1574_v30  ;;  %v1576_v17 = vadd.f32 1.0, %v3133_v29  ;;  %v1007_v55 = vmul.f32 %v815_v24, %v4388_v37  ;;  %v817_v57 = vsub.f32 0.0, %v625_v38  ;;  %v418_v30 = vld [vmem:[%s4251_s25 + $0x88] sm:$0xff] }
  0x70   : > { %3154 = vrcp.f32 %v1575_v58  ;;  %v1577_v60 = vadd.f32 1.0, %v3135_v53  ;;  %v1008_v0 = vmul.f32 %v816_v51, %v4394_v50  ;;  %v818_v40 = vsub.f32 0.0, %v626_v26  ;;  %v419_v51 = vld [vmem:[%s4251_s25 + $0x90] sm:$0xff] }
  0x71   : > { %v3137_v41 = vpop.eup %3136  ;;  %3156 = vrcp.f32 %v1576_v17  ;;  %v1229_v62 = vmul.f32 1.442695, %v1007_v55  ;;  %v1009_v46 = vmul.f32 %v817_v57, %v4400_v52  ;;  %v819_v63 = vsub.f32 0.0, %v627_v34  ;;  %v420_v55 = vld [vmem:[%s4251_s25 + $0x98] sm:$0xff] }
  0x72   : > { %v3139_v49 = vpop.eup %3138  ;;  %v2142_v9 = vsub.f32 %v3137_v41, %v4152_v59  ;;  %3158 = vrcp.f32 %v1577_v60  ;;  %v1231_v11 = vmul.f32 1.442695, %v1008_v0  ;;  %v1010_v4 = vmul.f32 %v818_v40, %v4407_v28  ;;  %v421_v0 = vld [vmem:[%s4251_s25 + $0xa0] sm:$0xff] }
  0x73   : > { %v3141_v18 = vpop.eup %3140  ;;  %v2143_v54 = vsub.f32 %v3139_v49, %v4159_v1  ;;  %3160 = vpow2.f32 %v4351_v32  ;;  %v1233_v20 = vmul.f32 1.442695, %v1009_v46  ;;  %v1011_v22 = vmul.f32 %v819_v63, %v4411_v44 }
  0x74   : > { %v3143_v12 = vpop.eup %3142  ;;  %v2334_v14 = vmul.f32 %v2142_v9, %v414_v61  ;;  %v2144_v27 = vsub.f32 %v3141_v18, %v4167_v8  ;;  %3162 = vpow2.f32 %v1221_v25  ;;  %v1235_v21 = vmul.f32 1.442695, %v1010_v4  ;;  %v629_v4 = vld [vmem:[%s6338_s1 + $0x120] sm:$0xff] }
  0x75   : > { %v3145_v19 = vpop.eup %3144  ;;  %v2335_v38 = vmul.f32 %v2143_v54, %v415_v6  ;;  %v2145_v45 = vsub.f32 %v3143_v12, %v4174_v15  ;;  %3164 = vpow2.f32 %v1223_v36  ;;  %v1237_v32 = vmul.f32 1.442695, %v1011_v22  ;;  %v425_v22 = vld [vmem:[%s4251_s25 + $0xc0] sm:$0xff] }
  0x76   : > { %v3147_v24 = vpop.eup %3146  ;;  %v2526_v26 = vadd.f32 %v2334_v14, %v4152_v59  ;;  %v2336_v29 = vmul.f32 %v2144_v27, %v416_v10  ;;  %v2146_v58 = vsub.f32 %v3145_v19, %v4198_v35  ;;  %3166 = vpow2.f32 %v1225_v47  ;;  %v4465_v19 = vld [vmem:[%s4056_s10 + $0x120] sm:$0xff] }
  0x77   : > { %v3149_v25 = vpop.eup %3148  ;;  %v2527_v34 = vadd.f32 %v2335_v38, %v4159_v1  ;;  %v2337_v53 = vmul.f32 %v2145_v45, %v417_v31  ;;  %v2147_v17 = vsub.f32 %v3147_v24, %v4206_v42  ;;  %3168 = vpow2.f32 %v1227_v2  ;;  %v422_v2 = vld [vmem:[%s4251_s25 + $0xa8] sm:$0xff] }
  0x78   : > { %v3151_v36 = vpop.eup %3150  ;;  %2718 = vst [vmem:[%s4303_s28 + $0x68] sm:$0xff] %v2526_v26  ;;  %v2528_v59 = vadd.f32 %v2336_v29, %v4167_v8  ;;  %v2338_v57 = vmul.f32 %v2146_v58, %v418_v30  ;;  %v2148_v60 = vsub.f32 %v3149_v25, %v4211_v48  ;;  %3170 = vpow2.f32 %v1229_v62  ;;  %v423_v62 = vld [vmem:[%s4251_s25 + $0xb0] sm:$0xff] }
  0x79   : > { %v3153_v47 = vpop.eup %3152  ;;  %2719 = vst [vmem:[%s4303_s28 + $0x70] sm:$0xff] %v2527_v34  ;;  %v2529_v1 = vadd.f32 %v2337_v53, %v4174_v15  ;;  %v2339_v40 = vmul.f32 %v2147_v17, %v419_v51  ;;  %v2149_v41 = vsub.f32 %v3151_v36, %v4218_v56  ;;  %3172 = vpow2.f32 %v1231_v11  ;;  %v628_v15 = vld [vmem:[%s6338_s1 + $0x118] sm:$0xff]  ;;  %v630_v51 = vld [vmem:[%s6338_s1 + $0x128] sm:$0xff] }
  0x7a   : > { %v3155_v61 = vpop.eup %3154  ;;  %2720 = vst [vmem:[%s4303_s28 + $0x78] sm:$0xff] %v2528_v59  ;;  %v2530_v8 = vadd.f32 %v2338_v57, %v4198_v35  ;;  %v2340_v46 = vmul.f32 %v2148_v60, %v420_v55  ;;  %v2150_v63 = vsub.f32 %v3153_v47, %v4235_v16  ;;  %3174 = vpow2.f32 %v1233_v20  ;;  %v424_v35 = vld [vmem:[%s4251_s25 + $0xb8] sm:$0xff]  ;;  %v4487_v57 = vld [vmem:[%s4056_s10 + $0x128] sm:$0xff]  ;;  %v633_v60 = vld [vmem:[%s6338_s1 + $0x140] sm:$0xff] }
  0x7b   : > { %v3157_v49 = vpop.eup %3156  ;;  %2721 = vst [vmem:[%s4303_s28 + $0x80] sm:$0xff] %v2529_v1  ;;  %v2531_v9 = vadd.f32 %v2339_v40, %v4206_v42  ;;  %v2341_v6 = vmul.f32 %v2149_v41, %v421_v0  ;;  %v2151_v11 = vsub.f32 %v3155_v61, %v4243_v23  ;;  %3176 = vpow2.f32 %v1235_v21  ;;  %v4459_v42 = vld [vmem:[%s4056_s10 + $0x118] sm:$0xff]  ;;  %v4494_v41 = vld [vmem:[%s4056_s10 + $0x130] sm:$0xff] }
  0x7c   : > { %v3159_v18 = vpop.eup %3158  ;;  %2722 = vst [vmem:[%s4303_s28 + $0x88] sm:$0xff] %v2530_v8  ;;  %v2532_v54 = vadd.f32 %v2340_v46, %v4211_v48  ;;  %v2342_v10 = vmul.f32 %v2150_v63, %v422_v2  ;;  %v2152_v20 = vsub.f32 %v3157_v49, %v4256_v33  ;;  %3178 = vpow2.f32 %v1237_v32  ;;  %v632_v17 = vld [vmem:[%s6338_s1 + $0x138] sm:$0xff]  ;;  %v4501_v63 = vld [vmem:[%s4056_s10 + $0x140] sm:$0xff] }
  0x7d   : > { %v3161_v12 = vpop.eup %3160  ;;  %2723 = vst [vmem:[%s4303_s28 + $0x90] sm:$0xff] %v2531_v9  ;;  %v2533_v14 = vadd.f32 %v2341_v6, %v4218_v56  ;;  %v2343_v27 = vmul.f32 %v2151_v11, %v423_v62  ;;  %v2153_v31 = vsub.f32 %v3159_v18, %v4260_v43  ;;  %v820_v21 = vsub.f32 0.0, %v628_v15  ;;  %v4497_v2 = vld [vmem:[%s4056_s10 + $0x138] sm:$0xff]  ;;  %v4507_v18 = vld [vmem:[%s4056_s10 + $0x148] sm:$0xff] }
  0x7e   : > { %v3163_v48 = vpop.eup %3162  ;;  %2724 = vst [vmem:[%s4303_s28 + $0x98] sm:$0xff] %v2532_v54  ;;  %v2534_v38 = vadd.f32 %v2342_v10, %v4235_v16  ;;  %v2344_v45 = vmul.f32 %v2152_v20, %v424_v35  ;;  %v1578_v30 = vadd.f32 1.0, %v3161_v12  ;;  %v821_v32 = vsub.f32 0.0, %v629_v4  ;;  %v634_v54 = vld [vmem:[%s6338_s1 + $0x148] sm:$0xff]  ;;  %v4513_v10 = vld [vmem:[%s4056_s10 + $0x150] sm:$0xff] }
  0x7f   : > { %v3165_v24 = vpop.eup %3164  ;;  %2725 = vst [vmem:[%s4303_s28 + $0xa0] sm:$0xff] %v2533_v14  ;;  %v2535_v26 = vadd.f32 %v2343_v27, %v4243_v23  ;;  %v2345_v56 = vmul.f32 %v2153_v31, %v425_v22  ;;  %v1579_v29 = vadd.f32 1.0, %v3163_v48  ;;  %v1012_v58 = vmul.f32 %v820_v21, %v4459_v42  ;;  %v631_v23 = vld [vmem:[%s6338_s1 + $0x130] sm:$0xff]  ;;  %v636_v31 = vld [vmem:[%s6338_s1 + $0x158] sm:$0xff]  ;;  %v637_v21 = vld [vmem:[%s6338_s1 + $0x160] sm:$0xff] }
  0x80   : > { %v3167_v25 = vpop.eup %3166  ;;  %2726 = vst [vmem:[%s4303_s28 + $0xa8] sm:$0xff] %v2534_v38  ;;  %v2536_v16 = vadd.f32 %v2344_v45, %v4256_v33  ;;  %3180 = vrcp.f32 %v1578_v30  ;;  %v1580_v34 = vadd.f32 1.0, %v3165_v24  ;;  %v1013_v53 = vmul.f32 %v821_v32, %v4465_v19  ;;  %v635_v20 = vld [vmem:[%s6338_s1 + $0x150] sm:$0xff]  ;;  %v4528_v48 = vld [vmem:[%s6338_s1 + $0x168] sm:$0xff] }
  0x81   : > { %v3169_v55 = vpop.eup %3168  ;;  %2727 = vst [vmem:[%s4303_s28 + $0xb0] sm:$0xff] %v2535_v26  ;;  %v2537_v36 = vadd.f32 %v2345_v56, %v4260_v43  ;;  %3182 = vrcp.f32 %v1579_v29  ;;  %v1581_v33 = vadd.f32 1.0, %v3167_v25  ;;  %v1239_v59 = vmul.f32 1.442695, %v1012_v58  ;;  %v4533_v32 = vld [vmem:[%s6338_s1 + $0x170] sm:$0xff]  ;;  %v4536_v29 = vld [vmem:[%s4056_s10 + $0x158] sm:$0xff] }
  0x82   : > { %v3171_v0 = vpop.eup %3170  ;;  %2728 = vst [vmem:[%s4303_s28 + $0xb8] sm:$0xff] %v2536_v16  ;;  %3184 = vrcp.f32 %v1580_v34  ;;  %v1582_v47 = vadd.f32 1.0, %v3169_v55  ;;  %v1241_v1 = vmul.f32 1.442695, %v1013_v53  ;;  %v822_v40 = vsub.f32 0.0, %v630_v51  ;;  %v4539_v58 = vld [vmem:[%s4056_s10 + $0x160] sm:$0xff] }
  0x83   : > { %v3173_v43 = vpop.eup %3172  ;;  %2729 = vst [vmem:[%s4303_s28 + $0xc0] sm:$0xff] %v2537_v36  ;;  %3186 = vrcp.f32 %v1581_v33  ;;  %v1583_v61 = vadd.f32 1.0, %v3171_v0  ;;  %v823_v8 = vsub.f32 0.0, %v631_v23  ;;  %v824_v46 = vsub.f32 0.0, %v632_v17  ;;  %v426_v53 = vld [vmem:[%s4251_s25 + $0xc8] sm:$0xff] }
  0x84   : > { %v3175_v62 = vpop.eup %3174  ;;  %3188 = vrcp.f32 %v1582_v47  ;;  %v1584_v15 = vadd.f32 1.0, %v3173_v43  ;;  %v1014_v49 = vmul.f32 %v822_v40, %v4487_v57  ;;  %v825_v9 = vsub.f32 0.0, %v633_v60  ;;  %v427_v60 = vld [vmem:[%s4251_s25 + $0xd0] sm:$0xff]  ;;  %v428_v43 = vld [vmem:[%s4251_s25 + $0xd8] sm:$0xff] }
  0x85   : > { %v3177_v6 = vpop.eup %3176  ;;  %3190 = vrcp.f32 %v1583_v61  ;;  %v1585_v11 = vadd.f32 1.0, %v3175_v62  ;;  %v1015_v35 = vmul.f32 %v823_v8, %v4494_v41  ;;  %v1016_v4 = vmul.f32 %v824_v46, %v4497_v2 }
  0x86   : > { %v3179_v22 = vpop.eup %3178  ;;  %3192 = vrcp.f32 %v1584_v15  ;;  %v1586_v12 = vadd.f32 1.0, %v3177_v6  ;;  %v1243_v14 = vmul.f32 1.442695, %v1014_v49  ;;  %v1017_v27 = vmul.f32 %v825_v9, %v4501_v63  ;;  %v429_v49 = vld [vmem:[%s4251_s25 + $0xe0] sm:$0xff] }
  0x87   : > { %3194 = vrcp.f32 %v1585_v11  ;;  %v1587_v38 = vadd.f32 1.0, %v3179_v22  ;;  %v1245_v45 = vmul.f32 1.442695, %v1015_v35  ;;  %v1247_v30 = vmul.f32 1.442695, %v1016_v4  ;;  %v430_v35 = vld [vmem:[%s4251_s25 + $0xe8] sm:$0xff] }
  0x88   : > { %3196 = vrcp.f32 %v1586_v12  ;;  %v1249_v24 = vmul.f32 1.442695, %v1017_v27  ;;  %v826_v26 = vsub.f32 0.0, %v634_v54  ;;  %v827_v56 = vsub.f32 0.0, %v635_v20 }
  0x89   : > { %3198 = vrcp.f32 %v1587_v38  ;;  %v828_v51 = vsub.f32 0.0, %v636_v31  ;;  %v829_v25 = vsub.f32 0.0, %v637_v21  ;;  %v830_v16 = vsub.f32 0.0, %v4528_v48 }
  0x8a   : > { %v3181_v34 = vpop.eup %3180  ;;  %3200 = vpow2.f32 %v1239_v59  ;;  %v1018_v23 = vmul.f32 %v826_v26, %v4507_v18  ;;  %v1019_v17 = vmul.f32 %v827_v56, %v4513_v10  ;;  %v831_v55 = vsub.f32 0.0, %v4533_v32  ;;  %v642_v32 = vld [vmem:[%s6338_s1 + $0x188] sm:$0xff] }
  0x8b   : > { %v3183_v36 = vpop.eup %3182  ;;  %v2154_v33 = vsub.f32 %v3181_v34, %v4276_v7  ;;  %3202 = vpow2.f32 %v1241_v1  ;;  %v1020_v0 = vmul.f32 %v828_v51, %v4536_v29  ;;  %v1021_v47 = vmul.f32 %v829_v25, %v4539_v58  ;;  %v4567_v51 = vld [vmem:[%s4056_s10 + $0x168] sm:$0xff] }
  0x8c   : > { %v3185_v40 = vpop.eup %3184  ;;  %v2155_v59 = vsub.f32 %v3183_v36, %v4354_v39  ;;  %3204 = vpow2.f32 %v1243_v14  ;;  %v1251_v61 = vmul.f32 1.442695, %v1018_v23  ;;  %v1253_v8 = vmul.f32 1.442695, %v1019_v17  ;;  %v431_v14 = vld [vmem:[%s4251_s25 + $0xf0] sm:$0xff]  ;;  %v434_v23 = vld [vmem:[%s4251_s25 + $0x108] sm:$0xff] }
  0x8d   : > { %v3187_v46 = vpop.eup %3186  ;;  %v2346_v62 = vmul.f32 %v2154_v33, %v426_v53  ;;  %v2156_v15 = vsub.f32 %v3185_v40, %v4362_v3  ;;  %3206 = vpow2.f32 %v1245_v45  ;;  %v1255_v1 = vmul.f32 1.442695, %v1020_v0  ;;  %v432_v45 = vld [vmem:[%s4251_s25 + $0xf8] sm:$0xff]  ;;  %v435_v0 = vld [vmem:[%s4251_s25 + $0x110] sm:$0xff] }
  0x8e   : > { %v3189_v9 = vpop.eup %3188  ;;  %v2347_v6 = vmul.f32 %v2155_v59, %v427_v60  ;;  %v2157_v11 = vsub.f32 %v3187_v46, %v4370_v5  ;;  %3208 = vpow2.f32 %v1247_v30  ;;  %v1257_v4 = vmul.f32 1.442695, %v1021_v47 }
  0x8f   : > { %v3191_v54 = vpop.eup %3190  ;;  %v2538_v20 = vadd.f32 %v2346_v62, %v4276_v7  ;;  %v2348_v22 = vmul.f32 %v2156_v15, %v428_v43  ;;  %v2158_v12 = vsub.f32 %v3189_v9, %v4375_v13  ;;  %3210 = vpow2.f32 %v1249_v24  ;;  %v433_v24 = vld [vmem:[%s4251_s25 + $0x100] sm:$0xff] }
  0x90   : > { %v3193_v27 = vpop.eup %3192  ;;  %v2539_v31 = vadd.f32 %v2347_v6, %v4354_v39  ;;  %v2349_v21 = vmul.f32 %v2157_v11, %v429_v49  ;;  %v2159_v38 = vsub.f32 %v3191_v54, %v4388_v37  ;;  %3212 = vpow2.f32 %v1251_v61  ;;  %v4609_v11 = vld [vmem:[%s4056_s10 + $0x178] sm:$0xff] }
  0x91   : > { %v3195_v30 = vpop.eup %3194  ;;  %2730 = vst [vmem:[%s4303_s28 + $0xc8] sm:$0xff] %v2538_v20  ;;  %v2540_v7 = vadd.f32 %v2348_v22, %v4362_v3  ;;  %v2350_v26 = vmul.f32 %v2158_v12, %v430_v35  ;;  %v2160_v56 = vsub.f32 %v3193_v27, %v4394_v50  ;;  %3214 = vpow2.f32 %v1253_v8  ;;  %v4574_v3 = vld [vmem:[%s4056_s10 + $0x170] sm:$0xff]  ;;  %v4620_v12 = vld [vmem:[%s4056_s10 + $0x188] sm:$0xff] }
  0x92   : > { %v3197_v39 = vpop.eup %3196  ;;  %2731 = vst [vmem:[%s4303_s28 + $0xd0] sm:$0xff] %v2539_v31  ;;  %v2541_v25 = vadd.f32 %v2349_v21, %v4370_v5  ;;  %v2351_v34 = vmul.f32 %v2159_v38, %v431_v14  ;;  %v2161_v53 = vsub.f32 %v3195_v30, %v4400_v52  ;;  %3216 = vpow2.f32 %v1255_v1  ;;  %v643_v35 = vld [vmem:[%s6338_s1 + $0x190] sm:$0xff] }
  0x93   : > { %v3199_v17 = vpop.eup %3198  ;;  %2732 = vst [vmem:[%s4303_s28 + $0xd8] sm:$0xff] %v2540_v7  ;;  %v2542_v36 = vadd.f32 %v2350_v26, %v4375_v13  ;;  %v2352_v33 = vmul.f32 %v2160_v56, %v432_v45  ;;  %v2162_v60 = vsub.f32 %v3197_v39, %v4407_v28  ;;  %3218 = vpow2.f32 %v1257_v4  ;;  %v4624_v38 = vld [vmem:[%s4056_s10 + $0x190] sm:$0xff] }
  0x94   : > { %v3201_v47 = vpop.eup %3200  ;;  %2733 = vst [vmem:[%s4303_s28 + $0xe0] sm:$0xff] %v2541_v25  ;;  %v2543_v5 = vadd.f32 %v2351_v34, %v4388_v37  ;;  %v2353_v40 = vmul.f32 %v2161_v53, %v433_v24  ;;  %v2163_v59 = vsub.f32 %v3199_v17, %v4411_v44  ;;  %v1022_v43 = vmul.f32 %v830_v16, %v4567_v51  ;;  %v640_v37 = vld [vmem:[%s6338_s1 + $0x178] sm:$0xff]  ;;  %v645_v53 = vld [vmem:[%s6338_s1 + $0x1a0] sm:$0xff] }
  0x95   : > { %v3203_v61 = vpop.eup %3202  ;;  %2734 = vst [vmem:[%s4303_s28 + $0xe8] sm:$0xff] %v2542_v36  ;;  %v2544_v13 = vadd.f32 %v2352_v33, %v4394_v50  ;;  %v2354_v8 = vmul.f32 %v2162_v60, %v434_v23  ;;  %v1588_v46 = vadd.f32 1.0, %v3201_v47  ;;  %v1023_v62 = vmul.f32 %v831_v55, %v4574_v3  ;;  %v641_v50 = vld [vmem:[%s6338_s1 + $0x180] sm:$0xff]  ;;  %v4631_v25 = vld [vmem:[%s4056_s10 + $0x198] sm:$0xff]  ;;  %v647_v47 = vld [vmem:[%s6338_s1 + $0x1b0] sm:$0xff] }
  0x96   : > { %v3205_v15 = vpop.eup %3204  ;;  %2735 = vst [vmem:[%s4303_s28 + $0xf0] sm:$0xff] %v2543_v5  ;;  %v2545_v48 = vadd.f32 %v2353_v40, %v4400_v52  ;;  %v2355_v16 = vmul.f32 %v2163_v59, %v435_v0  ;;  %v1589_v49 = vadd.f32 1.0, %v3203_v61  ;;  %v4596_v1 = vmul.f32 1.442695, %v1022_v43  ;;  %v644_v34 = vld [vmem:[%s6338_s1 + $0x198] sm:$0xff]  ;;  %v4641_v60 = vld [vmem:[%s4056_s10 + $0x1a0] sm:$0xff] }
  0x97   : > { %v3207_v55 = vpop.eup %3206  ;;  %2736 = vst [vmem:[%s4303_s28 + $0xf8] sm:$0xff] %v2544_v13  ;;  %v2546_v9 = vadd.f32 %v2354_v8, %v4407_v28  ;;  %3220 = vrcp.f32 %v1588_v46  ;;  %v1590_v52 = vadd.f32 1.0, %v3205_v15  ;;  %v4606_v6 = vmul.f32 1.442695, %v1023_v62  ;;  %v4617_v28 = vld [vmem:[%s4056_s10 + $0x180] sm:$0xff]  ;;  %v646_v0 = vld [vmem:[%s6338_s1 + $0x1a8] sm:$0xff] }
  0x98   : > { %v3209_v4 = vpop.eup %3208  ;;  %2737 = vst [vmem:[%s4303_s28 + $0x100] sm:$0xff] %v2545_v48  ;;  %v2547_v54 = vadd.f32 %v2355_v16, %v4411_v44  ;;  %3222 = vrcp.f32 %v1589_v49  ;;  %v1591_v20 = vadd.f32 1.0, %v3207_v55  ;;  %v832_v22 = vsub.f32 0.0, %v640_v37  ;;  %v648_v5 = vld [vmem:[%s6338_s1 + $0x1b8] sm:$0xff]  ;;  %v4655_v13 = vld [vmem:[%s6338_s1 + $0x1c0] sm:$0xff]  ;;  %v4658_v37 = vld [vmem:[%s4056_s10 + $0x1a8] sm:$0xff] }
  0x99   : > { %v3211_v14 = vpop.eup %3210  ;;  %2738 = vst [vmem:[%s4303_s28 + $0x108] sm:$0xff] %v2546_v9  ;;  %3224 = vrcp.f32 %v1590_v52  ;;  %v1592_v27 = vadd.f32 1.0, %v3209_v4  ;;  %v833_v31 = vsub.f32 0.0, %v641_v50  ;;  %v834_v21 = vsub.f32 0.0, %v642_v32  ;;  %v4661_v15 = vld [vmem:[%s4056_s10 + $0x1b0] sm:$0xff]  ;;  %v4664_v50 = vld [vmem:[%s4056_s10 + $0x1b8] sm:$0xff] }
  0x9a   : > { %v3213_v45 = vpop.eup %3212  ;;  %2739 = vst [vmem:[%s4303_s28 + $0x110] sm:$0xff] %v2547_v54  ;;  %3226 = vrcp.f32 %v1591_v20  ;;  %v1593_v44 = vadd.f32 1.0, %v3211_v14  ;;  %v1024_v30 = vmul.f32 %v832_v22, %v4609_v11  ;;  %v835_v7 = vsub.f32 0.0, %v643_v35  ;;  %v436_v35 = vld [vmem:[%s4251_s25 + $0x118] sm:$0xff] }
  0x9b   : > { %v3215_v26 = vpop.eup %3214  ;;  %3228 = vrcp.f32 %v1592_v27  ;;  %v1594_v56 = vadd.f32 1.0, %v3213_v45  ;;  %v1025_v24 = vmul.f32 %v833_v31, %v4617_v28  ;;  %v1026_v39 = vmul.f32 %v834_v21, %v4620_v12  ;;  %v437_v27 = vld [vmem:[%s4251_s25 + $0x120] sm:$0xff] }
  0x9c   : > { %v3217_v23 = vpop.eup %3216  ;;  %3230 = vrcp.f32 %v1593_v44  ;;  %v1595_v17 = vadd.f32 1.0, %v3215_v26  ;;  %v1263_v36 = vmul.f32 1.442695, %v1024_v30  ;;  %v1027_v33 = vmul.f32 %v835_v7, %v4624_v38  ;;  %v438_v44 = vld [vmem:[%s4251_s25 + $0x128] sm:$0xff] }
  0x9d   : > { %v3219_v40 = vpop.eup %3218  ;;  %3232 = vrcp.f32 %v1594_v56  ;;  %v1596_v59 = vadd.f32 1.0, %v3217_v23  ;;  %v1265_v43 = vmul.f32 1.442695, %v1025_v24  ;;  %v1267_v61 = vmul.f32 1.442695, %v1026_v39  ;;  %v439_v39 = vld [vmem:[%s4251_s25 + $0x130] sm:$0xff] }
  0x9e   : > { %3234 = vrcp.f32 %v1595_v17  ;;  %v1597_v8 = vadd.f32 1.0, %v3219_v40  ;;  %v1269_v46 = vmul.f32 1.442695, %v1027_v33  ;;  %v836_v62 = vsub.f32 0.0, %v644_v34  ;;  %v440_v17 = vld [vmem:[%s4251_s25 + $0x138] sm:$0xff]  ;;  %v441_v40 = vld [vmem:[%s4251_s25 + $0x140] sm:$0xff] }
  0x9f   : > { %3236 = vrcp.f32 %v1596_v59  ;;  %v837_v48 = vsub.f32 0.0, %v645_v53  ;;  %v838_v16 = vsub.f32 0.0, %v646_v0  ;;  %v839_v49 = vsub.f32 0.0, %v647_v47 }
  0xa0   : > { %3238 = vrcp.f32 %v1597_v8  ;;  %v1028_v32 = vmul.f32 %v836_v62, %v4631_v25  ;;  %v840_v55 = vsub.f32 0.0, %v648_v5  ;;  %v841_v9 = vsub.f32 0.0, %v4655_v13  ;;  %v652_v13 = vld [vmem:[%s6338_s1 + $0x1d8] sm:$0xff] }
  0xa1   : > { %v3221_v52 = vpop.eup %3220  ;;  %3240 = vpow2.f32 %v4596_v1  ;;  %v1029_v4 = vmul.f32 %v837_v48, %v4641_v60  ;;  %v1030_v54 = vmul.f32 %v838_v16, %v4658_v37  ;;  %v1031_v20 = vmul.f32 %v839_v49, %v4661_v15  ;;  %v442_v48 = vld [vmem:[%s4251_s25 + $0x148] sm:$0xff] }
  0xa2   : > { %v3223_v22 = vpop.eup %3222  ;;  %v2164_v14 = vsub.f32 %v3221_v52, %v4459_v42  ;;  %3242 = vpow2.f32 %v4606_v6  ;;  %v1271_v31 = vmul.f32 1.442695, %v1028_v32  ;;  %v1032_v21 = vmul.f32 %v840_v55, %v4664_v50 }
  0xa3   : > { %v3225_v45 = vpop.eup %3224  ;;  %v2165_v1 = vsub.f32 %v3223_v22, %v4465_v19  ;;  %3244 = vpow2.f32 %v1263_v36  ;;  %v1273_v30 = vmul.f32 1.442695, %v1029_v4  ;;  %v1275_v7 = vmul.f32 1.442695, %v1030_v54  ;;  %v4698_v4 = vld [vmem:[%s4056_s10 + $0x1c0] sm:$0xff] }
  0xa4   : > { %v3227_v26 = vpop.eup %3226  ;;  %v2356_v56 = vmul.f32 %v2164_v14, %v436_v35  ;;  %v2166_v24 = vsub.f32 %v3225_v45, %v4487_v57  ;;  %3246 = vpow2.f32 %v1265_v43  ;;  %v1277_v34 = vmul.f32 1.442695, %v1031_v20  ;;  %v444_v35 = vld [vmem:[%s4251_s25 + $0x158] sm:$0xff]  ;;  %v445_v14 = vld [vmem:[%s4251_s25 + $0x160] sm:$0xff] }
  0xa5   : > { %v3229_v6 = vpop.eup %3228  ;;  %v2357_v53 = vmul.f32 %v2165_v1, %v437_v27  ;;  %v2167_v23 = vsub.f32 %v3227_v26, %v4494_v41  ;;  %3248 = vpow2.f32 %v1267_v61  ;;  %v1279_v33 = vmul.f32 1.442695, %v1032_v21  ;;  %v4716_v26 = vld [vmem:[%s4056_s10 + $0x1c8] sm:$0xff] }
  0xa6   : > { %v3231_v36 = vpop.eup %3230  ;;  %v2548_v0 = vadd.f32 %v2356_v56, %v4459_v42  ;;  %v2358_v47 = vmul.f32 %v2166_v24, %v438_v44  ;;  %v2168_v5 = vsub.f32 %v3229_v6, %v4497_v2  ;;  %3250 = vpow2.f32 %v1269_v46  ;;  %v443_v46 = vld [vmem:[%s4251_s25 + $0x150] sm:$0xff] }
  0xa7   : > { %v3233_v59 = vpop.eup %3232  ;;  %v2549_v43 = vadd.f32 %v2357_v53, %v4465_v19  ;;  %v2359_v8 = vmul.f32 %v2167_v23, %v439_v39  ;;  %v2169_v62 = vsub.f32 %v3231_v36, %v4501_v63  ;;  %3252 = vpow2.f32 %v1271_v31  ;;  %v653_v23 = vld [vmem:[%s6338_s1 + $0x1e0] sm:$0xff] }
  0xa8   : > { %v3235_v61 = vpop.eup %3234  ;;  %2740 = vst [vmem:[%s4303_s28 + $0x118] sm:$0xff] %v2548_v0  ;;  %v2550_v42 = vadd.f32 %v2358_v47, %v4487_v57  ;;  %v2360_v16 = vmul.f32 %v2168_v5, %v440_v17  ;;  %v2170_v49 = vsub.f32 %v3233_v59, %v4507_v18  ;;  %3254 = vpow2.f32 %v1273_v30  ;;  %v4737_v47 = vld [vmem:[%s4056_s10 + $0x1d0] sm:$0xff] }
  0xa9   : > { %v3237_v32 = vpop.eup %3236  ;;  %2741 = vst [vmem:[%s4303_s28 + $0x120] sm:$0xff] %v2549_v43  ;;  %v2551_v19 = vadd.f32 %v2359_v8, %v4494_v41  ;;  %v2361_v55 = vmul.f32 %v2169_v62, %v441_v40  ;;  %v2171_v52 = vsub.f32 %v3235_v61, %v4513_v10  ;;  %3256 = vpow2.f32 %v1275_v7  ;;  %v650_v41 = vld [vmem:[%s6338_s1 + $0x1c8] sm:$0xff]  ;;  %v4744_v8 = vld [vmem:[%s4056_s10 + $0x1e0] sm:$0xff] }
  0xaa   : > { %v3239_v57 = vpop.eup %3238  ;;  %2742 = vst [vmem:[%s4303_s28 + $0x128] sm:$0xff] %v2550_v42  ;;  %v2552_v54 = vadd.f32 %v2360_v16, %v4497_v2  ;;  %v2362_v20 = vmul.f32 %v2170_v49, %v442_v48  ;;  %v2172_v22 = vsub.f32 %v3237_v32, %v4536_v29  ;;  %3258 = vpow2.f32 %v1277_v34 }
  0xab   : > { %v3241_v27 = vpop.eup %3240  ;;  %2743 = vst [vmem:[%s4303_s28 + $0x130] sm:$0xff] %v2551_v19  ;;  %v2553_v31 = vadd.f32 %v2361_v55, %v4501_v63  ;;  %v2363_v21 = vmul.f32 %v2171_v52, %v443_v46  ;;  %v2173_v45 = vsub.f32 %v3239_v57, %v4539_v58  ;;  %3260 = vpow2.f32 %v1279_v33  ;;  %v4753_v19 = vld [vmem:[%s4056_s10 + $0x1e8] sm:$0xff] }
  0xac   : > { %v3243_v2 = vpop.eup %3242  ;;  %2744 = vst [vmem:[%s4303_s28 + $0x138] sm:$0xff] %v2552_v54  ;;  %v2554_v1 = vadd.f32 %v2362_v20, %v4507_v18  ;;  %v2364_v44 = vmul.f32 %v2172_v22, %v444_v35  ;;  %v1598_v30 = vadd.f32 1.0, %v3241_v27  ;;  %v1033_v7 = vmul.f32 %v841_v9, %v4698_v4  ;;  %v651_v18 = vld [vmem:[%s6338_s1 + $0x1d0] sm:$0xff]  ;;  %v656_v20 = vld [vmem:[%s6338_s1 + $0x1f8] sm:$0xff]  ;;  %v657_v22 = vld [vmem:[%s6338_s1 + $0x200] sm:$0xff] }
  0xad   : > { %v3245_v56 = vpop.eup %3244  ;;  %2745 = vst [vmem:[%s4303_s28 + $0x140] sm:$0xff] %v2553_v31  ;;  %v2555_v63 = vadd.f32 %v2363_v21, %v4513_v10  ;;  %v2365_v24 = vmul.f32 %v2173_v45, %v445_v14  ;;  %v1599_v39 = vadd.f32 1.0, %v3243_v2  ;;  %v842_v34 = vsub.f32 0.0, %v650_v41  ;;  %v655_v54 = vld [vmem:[%s6338_s1 + $0x1f0] sm:$0xff]  ;;  %v658_v21 = vld [vmem:[%s6338_s1 + $0x208] sm:$0xff] }
  0xae   : > { %v3247_v9 = vpop.eup %3246  ;;  %2746 = vst [vmem:[%s4303_s28 + $0x148] sm:$0xff] %v2554_v1  ;;  %v2556_v6 = vadd.f32 %v2364_v44, %v4536_v29  ;;  %3262 = vrcp.f32 %v1598_v30  ;;  %v1600_v10 = vadd.f32 1.0, %v3245_v56  ;;  %v4728_v53 = vmul.f32 1.442695, %v1033_v7  ;;  %v4740_v29 = vld [vmem:[%s4056_s10 + $0x1d8] sm:$0xff]  ;;  %v4770_v30 = vld [vmem:[%s4056_s10 + $0x1f0] sm:$0xff] }
  0xaf   : > { %v3249_v17 = vpop.eup %3248  ;;  %2747 = vst [vmem:[%s4303_s28 + $0x150] sm:$0xff] %v2555_v63  ;;  %v2557_v33 = vadd.f32 %v2365_v24, %v4539_v58  ;;  %3264 = vrcp.f32 %v1599_v39  ;;  %v1601_v36 = vadd.f32 1.0, %v3247_v9  ;;  %v1034_v0 = vmul.f32 %v842_v34, %v4716_v26  ;;  %v654_v58 = vld [vmem:[%s6338_s1 + $0x1e8] sm:$0xff]  ;;  %v4773_v7 = vld [vmem:[%s4056_s10 + $0x1f8] sm:$0xff]  ;;  %v4778_v56 = vld [vmem:[%s6338_s1 + $0x210] sm:$0xff] }
  0xb0   : > { %v3251_v5 = vpop.eup %3250  ;;  %2748 = vst [vmem:[%s4303_s28 + $0x158] sm:$0xff] %v2556_v6  ;;  %3266 = vrcp.f32 %v1600_v10  ;;  %v1602_v40 = vadd.f32 1.0, %v3249_v17  ;;  %v843_v59 = vsub.f32 0.0, %v651_v18  ;;  %v844_v43 = vsub.f32 0.0, %v652_v13  ;;  %v4781_v34 = vld [vmem:[%s4056_s10 + $0x200] sm:$0xff]  ;;  %v4784_v18 = vld [vmem:[%s4056_s10 + $0x208] sm:$0xff] }
  0xb1   : > { %v3253_v62 = vpop.eup %3252  ;;  %2749 = vst [vmem:[%s4303_s28 + $0x160] sm:$0xff] %v2557_v33  ;;  %3268 = vrcp.f32 %v1601_v36  ;;  %v1603_v48 = vadd.f32 1.0, %v3251_v5  ;;  %v1283_v61 = vmul.f32 1.442695, %v1034_v0  ;;  %v845_v42 = vsub.f32 0.0, %v653_v23  ;;  %v446_v23 = vld [vmem:[%s4251_s25 + $0x168] sm:$0xff] }
  0xb2   : > { %v3255_v16 = vpop.eup %3254  ;;  %3270 = vrcp.f32 %v1602_v40  ;;  %v1604_v49 = vadd.f32 1.0, %v3253_v62  ;;  %v1035_v46 = vmul.f32 %v843_v59, %v4737_v47  ;;  %v1036_v32 = vmul.f32 %v844_v43, %v4740_v29  ;;  %v447_v40 = vld [vmem:[%s4251_s25 + $0x170] sm:$0xff] }
  0xb3   : > { %v3257_v55 = vpop.eup %3256  ;;  %3272 = vrcp.f32 %v1603_v48  ;;  %v1605_v52 = vadd.f32 1.0, %v3255_v16  ;;  %v1037_v35 = vmul.f32 %v845_v42, %v4744_v8  ;;  %v846_v57 = vsub.f32 0.0, %v654_v58  ;;  %v448_v48 = vld [vmem:[%s4251_s25 + $0x178] sm:$0xff] }
  0xb4   : > { %v3259_v14 = vpop.eup %3258  ;;  %3274 = vrcp.f32 %v1604_v49  ;;  %v1606_v41 = vadd.f32 1.0, %v3257_v55  ;;  %v1285_v27 = vmul.f32 1.442695, %v1035_v46  ;;  %v1287_v31 = vmul.f32 1.442695, %v1036_v32  ;;  %v449_v55 = vld [vmem:[%s4251_s25 + $0x180] sm:$0xff] }
  0xb5   : > { %v3261_v45 = vpop.eup %3260  ;;  %3276 = vrcp.f32 %v1605_v52  ;;  %v1607_v2 = vadd.f32 1.0, %v3259_v14  ;;  %v1289_v1 = vmul.f32 1.442695, %v1037_v35  ;;  %v1038_v44 = vmul.f32 %v846_v57, %v4753_v19 }
  0xb6   : > { %3278 = vrcp.f32 %v1606_v41  ;;  %v1608_v63 = vadd.f32 1.0, %v3261_v45  ;;  %v847_v24 = vsub.f32 0.0, %v655_v54  ;;  %v848_v39 = vsub.f32 0.0, %v656_v20  ;;  %v450_v54 = vld [vmem:[%s4251_s25 + $0x188] sm:$0xff] }
  0xb7   : > { %3280 = vrcp.f32 %v1607_v2  ;;  %v1291_v13 = vmul.f32 1.442695, %v1038_v44  ;;  %v849_v9 = vsub.f32 0.0, %v657_v22  ;;  %v850_v6 = vsub.f32 0.0, %v658_v21  ;;  %v451_v21 = vld [vmem:[%s4251_s25 + $0x190] sm:$0xff] }
  0xb8   : > { %v3263_v10 = vpop.eup %3262  ;;  %3282 = vrcp.f32 %v1608_v63  ;;  %v1039_v17 = vmul.f32 %v847_v24, %v4770_v30  ;;  %v1040_v33 = vmul.f32 %v848_v39, %v4773_v7  ;;  %v851_v36 = vsub.f32 0.0, %v4778_v56  ;;  %v452_v63 = vld [vmem:[%s4251_s25 + $0x198] sm:$0xff] }
  0xb9   : > { %v3265_v0 = vpop.eup %3264  ;;  %v2174_v5 = vsub.f32 %v3263_v10, %v4567_v51  ;;  %3284 = vpow2.f32 %v4728_v53  ;;  %v1041_v59 = vmul.f32 %v849_v9, %v4781_v34  ;;  %v1042_v43 = vmul.f32 %v850_v6, %v4784_v18 }
  0xba   : > { %v3267_v58 = vpop.eup %3266  ;;  %v2175_v62 = vsub.f32 %v3265_v0, %v4574_v3  ;;  %3286 = vpow2.f32 %v1283_v61  ;;  %v1293_v42 = vmul.f32 1.442695, %v1039_v17  ;;  %v1295_v16 = vmul.f32 1.442695, %v1040_v33 }
  0xbb   : > { %v3269_v49 = vpop.eup %3268  ;;  %v2366_v46 = vmul.f32 %v2174_v5, %v446_v23  ;;  %v2176_v32 = vsub.f32 %v3267_v58, %v4609_v11  ;;  %3288 = vpow2.f32 %v1285_v27  ;;  %v1297_v53 = vmul.f32 1.442695, %v1041_v59  ;;  %v4816_v23 = vld [vmem:[%s4056_s10 + $0x210] sm:$0xff] }
  0xbc   : > { %v3271_v52 = vpop.eup %3270  ;;  %v2367_v35 = vmul.f32 %v2175_v62, %v447_v40  ;;  %v2177_v57 = vsub.f32 %v3269_v49, %v4617_v28  ;;  %3290 = vpow2.f32 %v1287_v31  ;;  %v1299_v20 = vmul.f32 1.442695, %v1042_v43  ;;  %v455_v5 = vld [vmem:[%s4251_s25 + $0x1b0] sm:$0xff]  ;;  %v456_v62 = vld [vmem:[%s4251_s25 + $0x1b8] sm:$0xff] }
  0xbd   : > { %v3273_v61 = vpop.eup %3272  ;;  %v2558_v22 = vadd.f32 %v2366_v46, %v4567_v51  ;;  %v2368_v14 = vmul.f32 %v2176_v32, %v448_v48  ;;  %v2178_v41 = vsub.f32 %v3271_v52, %v4620_v12  ;;  %3292 = vpow2.f32 %v1289_v1  ;;  %v453_v1 = vld [vmem:[%s4251_s25 + $0x1a0] sm:$0xff]  ;;  %v4836_v46 = vld [vmem:[%s4056_s10 + $0x218] sm:$0xff] }
  0xbe   : > { %v3275_v27 = vpop.eup %3274  ;;  %v2559_v45 = vadd.f32 %v2367_v35, %v4574_v3  ;;  %v2369_v2 = vmul.f32 %v2177_v57, %v449_v55  ;;  %v2179_v44 = vsub.f32 %v3273_v61, %v4624_v38  ;;  %3294 = vpow2.f32 %v1291_v13  ;;  %v454_v13 = vld [vmem:[%s4251_s25 + $0x1a8] sm:$0xff] }
  0xbf   : > { %v3277_v31 = vpop.eup %3276  ;;  %2750 = vst [vmem:[%s4303_s28 + $0x168] sm:$0xff] %v2558_v22  ;;  %v2560_v51 = vadd.f32 %v2368_v14, %v4609_v11  ;;  %v2370_v24 = vmul.f32 %v2178_v41, %v450_v54  ;;  %v2180_v39 = vsub.f32 %v3275_v27, %v4631_v25  ;;  %3296 = vpow2.f32 %v1293_v42  ;;  %v4854_v41 = vld [vmem:[%s4056_s10 + $0x220] sm:$0xff] }
  0xc0   : > { %v3279_v9 = vpop.eup %3278  ;;  %2751 = vst [vmem:[%s4303_s28 + $0x170] sm:$0xff] %v2559_v45  ;;  %v2561_v3 = vadd.f32 %v2369_v2, %v4617_v28  ;;  %v2371_v6 = vmul.f32 %v2179_v44, %v451_v21  ;;  %v2181_v10 = vsub.f32 %v3277_v31, %v4641_v60  ;;  %3298 = vpow2.f32 %v1295_v16  ;;  %v660_v28 = vld [vmem:[%s6338_s1 + $0x218] sm:$0xff] }
  0xc1   : > { %v3281_v11 = vpop.eup %3280  ;;  %2752 = vst [vmem:[%s4303_s28 + $0x178] sm:$0xff] %v2560_v51  ;;  %v2562_v17 = vadd.f32 %v2370_v24, %v4620_v12  ;;  %v2372_v33 = vmul.f32 %v2180_v39, %v452_v63  ;;  %v2182_v0 = vsub.f32 %v3279_v9, %v4658_v37  ;;  %3300 = vpow2.f32 %v1297_v53  ;;  %v664_v44 = vld [vmem:[%s6338_s1 + $0x238] sm:$0xff]  ;;  %v4869_v39 = vld [vmem:[%s4056_s10 + $0x230] sm:$0xff] }
  0xc2   : > { %v3283_v40 = vpop.eup %3282  ;;  %2753 = vst [vmem:[%s4303_s28 + $0x180] sm:$0xff] %v2561_v3  ;;  %v2563_v59 = vadd.f32 %v2371_v6, %v4624_v38  ;;  %v2373_v43 = vmul.f32 %v2181_v10, %v453_v1  ;;  %v2183_v58 = vsub.f32 %v3281_v11, %v4661_v15  ;;  %3302 = vpow2.f32 %v1299_v20  ;;  %v4874_v6 = vld [vmem:[%s4056_s10 + $0x238] sm:$0xff] }
  0xc3   : > { %v3285_v12 = vpop.eup %3284  ;;  %2754 = vst [vmem:[%s4303_s28 + $0x188] sm:$0xff] %v2562_v17  ;;  %v2564_v48 = vadd.f32 %v2372_v33, %v4631_v25  ;;  %v2374_v42 = vmul.f32 %v2182_v0, %v454_v13  ;;  %v2184_v16 = vsub.f32 %v3283_v40, %v4664_v50  ;;  %v1043_v49 = vmul.f32 %v851_v36, %v4816_v23  ;;  %v661_v25 = vld [vmem:[%s6338_s1 + $0x220] sm:$0xff] }
  0xc4   : > { %v3287_v38 = vpop.eup %3286  ;;  %2755 = vst [vmem:[%s4303_s28 + $0x190] sm:$0xff] %v2563_v59  ;;  %v2565_v32 = vadd.f32 %v2373_v43, %v4641_v60  ;;  %v2375_v55 = vmul.f32 %v2183_v58, %v455_v5  ;;  %v1609_v53 = vadd.f32 1.0, %v3285_v12  ;;  %v852_v52 = vsub.f32 0.0, %v660_v28  ;;  %v662_v60 = vld [vmem:[%s6338_s1 + $0x228] sm:$0xff]  ;;  %v665_v33 = vld [vmem:[%s6338_s1 + $0x240] sm:$0xff]  ;;  %v667_v58 = vld [vmem:[%s6338_s1 + $0x250] sm:$0xff] }
  0xc5   : > { %v3289_v35 = vpop.eup %3288  ;;  %2756 = vst [vmem:[%s4303_s28 + $0x198] sm:$0xff] %v2564_v48  ;;  %v2566_v56 = vadd.f32 %v2374_v42, %v4658_v37  ;;  %v2376_v36 = vmul.f32 %v2184_v16, %v456_v62  ;;  %v1610_v57 = vadd.f32 1.0, %v3287_v38  ;;  %v4845_v54 = vmul.f32 1.442695, %v1043_v49  ;;  %v663_v37 = vld [vmem:[%s6338_s1 + $0x230] sm:$0xff]  ;;  %v4882_v59 = vld [vmem:[%s4056_s10 + $0x240] sm:$0xff] }
  0xc6   : > { %v3291_v20 = vpop.eup %3290  ;;  %2757 = vst [vmem:[%s4303_s28 + $0x1a0] sm:$0xff] %v2565_v32  ;;  %v2567_v61 = vadd.f32 %v2375_v55, %v4661_v15  ;;  %3304 = vrcp.f32 %v1609_v53  ;;  %v1611_v22 = vadd.f32 1.0, %v3289_v35  ;;  %v1044_v14 = vmul.f32 %v852_v52, %v4836_v46  ;;  %v4862_v15 = vld [vmem:[%s4056_s10 + $0x228] sm:$0xff]  ;;  %v668_v49 = vld [vmem:[%s6338_s1 + $0x258] sm:$0xff]  ;;  %v669_v38 = vld [vmem:[%s6338_s1 + $0x260] sm:$0xff] }
  0xc7   : > { %v3293_v21 = vpop.eup %3292  ;;  %2758 = vst [vmem:[%s4303_s28 + $0x1a8] sm:$0xff] %v2566_v56  ;;  %v2568_v27 = vadd.f32 %v2376_v36, %v4664_v50  ;;  %3306 = vrcp.f32 %v1610_v57  ;;  %v1612_v45 = vadd.f32 1.0, %v3291_v20  ;;  %v853_v2 = vsub.f32 0.0, %v661_v25  ;;  %v666_v43 = vld [vmem:[%s6338_s1 + $0x248] sm:$0xff]  ;;  %v4901_v52 = vld [vmem:[%s4056_s10 + $0x250] sm:$0xff]  ;;  %v4909_v57 = vld [vmem:[%s4056_s10 + $0x258] sm:$0xff] }
  0xc8   : > { %v3295_v63 = vpop.eup %3294  ;;  %2759 = vst [vmem:[%s4303_s28 + $0x1b0] sm:$0xff] %v2567_v61  ;;  %3308 = vrcp.f32 %v1611_v22  ;;  %v1613_v31 = vadd.f32 1.0, %v3293_v21  ;;  %v1303_v51 = vmul.f32 1.442695, %v1044_v14  ;;  %v854_v24 = vsub.f32 0.0, %v662_v60  ;;  %v4892_v16 = vld [vmem:[%s4056_s10 + $0x248] sm:$0xff] }
  0xc9   : > { %v3297_v1 = vpop.eup %3296  ;;  %2760 = vst [vmem:[%s4303_s28 + $0x1b8] sm:$0xff] %v2568_v27  ;;  %3310 = vrcp.f32 %v1612_v45  ;;  %v1614_v50 = vadd.f32 1.0, %v3295_v63  ;;  %v1045_v9 = vmul.f32 %v853_v2, %v4854_v41  ;;  %v855_v3 = vsub.f32 0.0, %v663_v37  ;;  %v4906_v25 = vld [vmem:[%s6338_s1 + $0x268] sm:$0xff]  ;;  %v457_v14 = vld [vmem:[%s4251_s25 + $0x1c0] sm:$0xff] }
  0xca   : > { %v3299_v10 = vpop.eup %3298  ;;  %3312 = vrcp.f32 %v1613_v31  ;;  %v1615_v13 = vadd.f32 1.0, %v3297_v1  ;;  %v1046_v11 = vmul.f32 %v854_v24, %v4862_v15  ;;  %v856_v17 = vsub.f32 0.0, %v664_v44  ;;  %v458_v44 = vld [vmem:[%s4251_s25 + $0x1c8] sm:$0xff]  ;;  %v4921_v24 = vld [vmem:[%s4056_s10 + $0x260] sm:$0xff] }
  0xcb   : > { %v3301_v0 = vpop.eup %3300  ;;  %3314 = vrcp.f32 %v1614_v50  ;;  %v1616_v5 = vadd.f32 1.0, %v3299_v10  ;;  %v1305_v28 = vmul.f32 1.442695, %v1045_v9  ;;  %v1047_v40 = vmul.f32 %v855_v3, %v4869_v39  ;;  %v459_v50 = vld [vmem:[%s4251_s25 + $0x1d0] sm:$0xff] }
  0xcc   : > { %v3303_v62 = vpop.eup %3302  ;;  %3316 = vrcp.f32 %v1615_v13  ;;  %v1617_v12 = vadd.f32 1.0, %v3301_v0  ;;  %v1307_v48 = vmul.f32 1.442695, %v1046_v11  ;;  %v1048_v42 = vmul.f32 %v856_v17, %v4874_v6  ;;  %v460_v17 = vld [vmem:[%s4251_s25 + $0x1d8] sm:$0xff] }
  0xcd   : > { %3318 = vrcp.f32 %v1616_v5  ;;  %v1618_v32 = vadd.f32 1.0, %v3303_v62  ;;  %v1309_v55 = vmul.f32 1.442695, %v1047_v40  ;;  %v857_v53 = vsub.f32 0.0, %v665_v33  ;;  %v461_v40 = vld [vmem:[%s4251_s25 + $0x1e0] sm:$0xff] }
  0xce   : > { %3320 = vrcp.f32 %v1617_v12  ;;  %v1311_v35 = vmul.f32 1.442695, %v1048_v42  ;;  %v858_v56 = vsub.f32 0.0, %v666_v43  ;;  %v859_v36 = vsub.f32 0.0, %v667_v58  ;;  %v462_v42 = vld [vmem:[%s4251_s25 + $0x1e8] sm:$0xff] }
  0xcf   : > { %3322 = vrcp.f32 %v1618_v32  ;;  %v1049_v60 = vmul.f32 %v857_v53, %v4882_v59  ;;  %v860_v20 = vsub.f32 0.0, %v668_v49  ;;  %v861_v61 = vsub.f32 0.0, %v669_v38 }
  0xd0   : > { %v3305_v22 = vpop.eup %3304  ;;  %3324 = vpow2.f32 %v4845_v54  ;;  %v1050_v37 = vmul.f32 %v858_v56, %v4892_v16  ;;  %v1051_v21 = vmul.f32 %v859_v36, %v4901_v52  ;;  %v862_v27 = vsub.f32 0.0, %v4906_v25  ;;  %v673_v25 = vld [vmem:[%s6338_s1 + $0x280] sm:$0xff] }
  0xd1   : > { %v3307_v45 = vpop.eup %3306  ;;  %v2185_v2 = vsub.f32 %v3305_v22, %v4698_v4  ;;  %3326 = vpow2.f32 %v1303_v51  ;;  %v1313_v63 = vmul.f32 1.442695, %v1049_v60  ;;  %v1052_v31 = vmul.f32 %v860_v20, %v4909_v57  ;;  %v465_v22 = vld [vmem:[%s4251_s25 + $0x200] sm:$0xff] }
  0xd2   : > { %v3309_v1 = vpop.eup %3308  ;;  %v2186_v54 = vsub.f32 %v3307_v45, %v4716_v26  ;;  %3328 = vpow2.f32 %v1305_v28  ;;  %v1315_v9 = vmul.f32 1.442695, %v1050_v37  ;;  %v1317_v3 = vmul.f32 1.442695, %v1051_v21 }
  0xd3   : > { %v3311_v10 = vpop.eup %3310  ;;  %v2377_v13 = vmul.f32 %v2185_v2, %v457_v14  ;;  %v2187_v11 = vsub.f32 %v3309_v1, %v4737_v47  ;;  %3330 = vpow2.f32 %v1307_v48  ;;  %v1319_v51 = vmul.f32 1.442695, %v1052_v31  ;;  %v4945_v14 = vld [vmem:[%s4056_s10 + $0x268] sm:$0xff] }
  0xd4   : > { %v3313_v33 = vpop.eup %3312  ;;  %v2378_v0 = vmul.f32 %v2186_v54, %v458_v44  ;;  %v2188_v5 = vsub.f32 %v3311_v10, %v4740_v29  ;;  %3332 = vpow2.f32 %v1309_v55  ;;  %v1053_v28 = vmul.f32 %v861_v61, %v4921_v24  ;;  %v463_v55 = vld [vmem:[%s4251_s25 + $0x1f0] sm:$0xff]  ;;  %v466_v2 = vld [vmem:[%s4251_s25 + $0x208] sm:$0xff] }
  0xd5   : > { %v3315_v43 = vpop.eup %3314  ;;  %v2569_v58 = vadd.f32 %v2377_v13, %v4698_v4  ;;  %v2379_v62 = vmul.f32 %v2187_v11, %v459_v50  ;;  %v2189_v12 = vsub.f32 %v3313_v33, %v4744_v8  ;;  %3334 = vpow2.f32 %v1311_v35  ;;  %v464_v35 = vld [vmem:[%s4251_s25 + $0x1f8] sm:$0xff] }
  0xd6   : > { %v3317_v48 = vpop.eup %3316  ;;  %v2570_v49 = vadd.f32 %v2378_v0, %v4716_v26  ;;  %v2380_v38 = vmul.f32 %v2188_v5, %v460_v17  ;;  %v2190_v32 = vsub.f32 %v3315_v43, %v4753_v19  ;;  %3336 = vpow2.f32 %v1313_v63  ;;  %v4975_v0 = vld [vmem:[%s4056_s10 + $0x270] sm:$0xff]  ;;  %v674_v5 = vld [vmem:[%s6338_s1 + $0x288] sm:$0xff] }
  0xd7   : > { %v3319_v53 = vpop.eup %3318  ;;  %2761 = vst [vmem:[%s4303_s28 + $0x1c0] sm:$0xff] %v2569_v58  ;;  %v2571_v4 = vadd.f32 %v2379_v62, %v4737_v47  ;;  %v2381_v56 = vmul.f32 %v2189_v12, %v461_v40  ;;  %v2191_v36 = vsub.f32 %v3317_v48, %v4770_v30  ;;  %3338 = vpow2.f32 %v1315_v9  ;;  %v4986_v62 = vld [vmem:[%s4056_s10 + $0x280] sm:$0xff] }
  0xd8   : > { %v3321_v60 = vpop.eup %3320  ;;  %2762 = vst [vmem:[%s4303_s28 + $0x1c8] sm:$0xff] %v2570_v49  ;;  %v2572_v26 = vadd.f32 %v2380_v38, %v4740_v29  ;;  %v2382_v20 = vmul.f32 %v2190_v32, %v462_v42  ;;  %v2192_v61 = vsub.f32 %v3319_v53, %v4773_v7  ;;  %3340 = vpow2.f32 %v1317_v3  ;;  %v4990_v38 = vld [vmem:[%s4056_s10 + $0x288] sm:$0xff] }
  0xd9   : > { %v3323_v47 = vpop.eup %3322  ;;  %2763 = vst [vmem:[%s4303_s28 + $0x1d0] sm:$0xff] %v2571_v4  ;;  %v2573_v37 = vadd.f32 %v2381_v56, %v4744_v8  ;;  %v2383_v21 = vmul.f32 %v2191_v36, %v463_v55  ;;  %v2193_v45 = vsub.f32 %v3321_v60, %v4781_v34  ;;  %3342 = vpow2.f32 %v1319_v51  ;;  %v4997_v60 = vld [vmem:[%s4056_s10 + $0x290] sm:$0xff] }
  0xda   : > { %v3325_v44 = vpop.eup %3324  ;;  %2764 = vst [vmem:[%s4303_s28 + $0x1d8] sm:$0xff] %v2572_v26  ;;  %v2574_v29 = vadd.f32 %v2382_v20, %v4753_v19  ;;  %v2384_v63 = vmul.f32 %v2192_v61, %v464_v35  ;;  %v2194_v31 = vsub.f32 %v3323_v47, %v4784_v18  ;;  %v1321_v1 = vmul.f32 1.442695, %v1053_v28  ;;  %v671_v19 = vld [vmem:[%s6338_s1 + $0x270] sm:$0xff]  ;;  %v676_v20 = vld [vmem:[%s6338_s1 + $0x298] sm:$0xff] }
  0xdb   : > { %v3327_v54 = vpop.eup %3326  ;;  %2765 = vst [vmem:[%s4303_s28 + $0x1e0] sm:$0xff] %v2573_v37  ;;  %v2575_v50 = vadd.f32 %v2383_v21, %v4770_v30  ;;  %v2385_v8 = vmul.f32 %v2193_v45, %v465_v22  ;;  %v1619_v9 = vadd.f32 1.0, %v3325_v44  ;;  %v1054_v3 = vmul.f32 %v862_v27, %v4945_v14  ;;  %v672_v30 = vld [vmem:[%s6338_s1 + $0x278] sm:$0xff]  ;;  %v675_v26 = vld [vmem:[%s6338_s1 + $0x290] sm:$0xff]  ;;  %v677_v21 = vld [vmem:[%s6338_s1 + $0x2a0] sm:$0xff] }
  0xdc   : > { %v3329_v10 = vpop.eup %3328  ;;  %2766 = vst [vmem:[%s4303_s28 + $0x1e8] sm:$0xff] %v2574_v29  ;;  %v2576_v13 = vadd.f32 %v2384_v63, %v4773_v7  ;;  %v2386_v11 = vmul.f32 %v2194_v31, %v466_v2  ;;  %v1620_v17 = vadd.f32 1.0, %v3327_v54  ;;  %3344 = vpow2.f32 %v1321_v1  ;;  %v678_v45 = vld [vmem:[%s6338_s1 + $0x2a8] sm:$0xff]  ;;  %v679_v2 = vld [vmem:[%s6338_s1 + $0x2b0] sm:$0xff]  ;;  %v5018_v1 = vld [vmem:[%s6338_s1 + $0x2b8] sm:$0xff] }
  0xdd   : > { %v3331_v27 = vpop.eup %3330  ;;  %2767 = vst [vmem:[%s4303_s28 + $0x1f0] sm:$0xff] %v2575_v50  ;;  %v2577_v51 = vadd.f32 %v2385_v8, %v4781_v34  ;;  %3346 = vrcp.f32 %v1619_v9  ;;  %v1621_v7 = vadd.f32 1.0, %v3329_v10  ;;  %v4972_v33 = vmul.f32 1.442695, %v1054_v3  ;;  %v4983_v34 = vld [vmem:[%s4056_s10 + $0x278] sm:$0xff]  ;;  %v5024_v3 = vld [vmem:[%s4056_s10 + $0x2a0] sm:$0xff] }
  0xde   : > { %v3333_v40 = vpop.eup %3332  ;;  %2768 = vst [vmem:[%s4303_s28 + $0x1f8] sm:$0xff] %v2576_v13  ;;  %v2578_v28 = vadd.f32 %v2386_v11, %v4784_v18  ;;  %3348 = vrcp.f32 %v1620_v17  ;;  %v1622_v43 = vadd.f32 1.0, %v3331_v27  ;;  %v863_v58 = vsub.f32 0.0, %v671_v19  ;;  %v5021_v9 = vld [vmem:[%s4056_s10 + $0x298] sm:$0xff]  ;;  %v5027_v13 = vld [vmem:[%s4056_s10 + $0x2a8] sm:$0xff] }
  0xdf   : > { %v3335_v12 = vpop.eup %3334  ;;  %2769 = vst [vmem:[%s4303_s28 + $0x200] sm:$0xff] %v2577_v51  ;;  %3350 = vrcp.f32 %v1621_v7  ;;  %v1623_v42 = vadd.f32 1.0, %v3333_v40  ;;  %v864_v48 = vsub.f32 0.0, %v672_v30  ;;  %v865_v49 = vsub.f32 0.0, %v673_v25  ;;  %v467_v7 = vld [vmem:[%s4251_s25 + $0x210] sm:$0xff] }
  0xe0   : > { %v3337_v32 = vpop.eup %3336  ;;  %2770 = vst [vmem:[%s4303_s28 + $0x208] sm:$0xff] %v2578_v28  ;;  %3352 = vrcp.f32 %v1622_v43  ;;  %v1624_v18 = vadd.f32 1.0, %v3335_v12  ;;  %v1055_v55 = vmul.f32 %v863_v58, %v4975_v0  ;;  %v866_v53 = vsub.f32 0.0, %v674_v5  ;;  %v468_v12 = vld [vmem:[%s4251_s25 + $0x218] sm:$0xff] }
  0xe1   : > { %v3339_v4 = vpop.eup %3338  ;;  %3354 = vrcp.f32 %v1623_v42  ;;  %v1625_v56 = vadd.f32 1.0, %v3337_v32  ;;  %v1056_v36 = vmul.f32 %v864_v48, %v4983_v34  ;;  %v1057_v35 = vmul.f32 %v865_v49, %v4986_v62  ;;  %v5039_v49 = vld [vmem:[%s4056_s10 + $0x2b0] sm:$0xff] }
  0xe2   : > { %v3341_v61 = vpop.eup %3340  ;;  %3356 = vrcp.f32 %v1624_v18  ;;  %v1626_v22 = vadd.f32 1.0, %v3339_v4  ;;  %v1325_v47 = vmul.f32 1.442695, %v1055_v55  ;;  %v1058_v37 = vmul.f32 %v866_v53, %v4990_v38 }
  0xe3   : > { %v3343_v44 = vpop.eup %3342  ;;  %3358 = vrcp.f32 %v1625_v56  ;;  %v1627_v29 = vadd.f32 1.0, %v3341_v61  ;;  %v1327_v63 = vmul.f32 1.442695, %v1056_v36  ;;  %v1329_v31 = vmul.f32 1.442695, %v1057_v35  ;;  %v470_v35 = vld [vmem:[%s4251_s25 + $0x228] sm:$0xff] }
  0xe4   : > { %3360 = vrcp.f32 %v1626_v22  ;;  %v1628_v54 = vadd.f32 1.0, %v3343_v44  ;;  %v1331_v50 = vmul.f32 1.442695, %v1058_v37  ;;  %v867_v8 = vsub.f32 0.0, %v675_v26 }
  0xe5   : > { %3362 = vrcp.f32 %v1627_v29  ;;  %v868_v19 = vsub.f32 0.0, %v676_v20  ;;  %v869_v10 = vsub.f32 0.0, %v677_v21  ;;  %v870_v11 = vsub.f32 0.0, %v678_v45  ;;  %v472_v29 = vld [vmem:[%s4251_s25 + $0x238] sm:$0xff] }
  0xe6   : > { %v3345_v17 = vpop.eup %3344  ;;  %3364 = vrcp.f32 %v1628_v54  ;;  %v1059_v30 = vmul.f32 %v867_v8, %v4997_v60  ;;  %v871_v25 = vsub.f32 0.0, %v679_v2  ;;  %v872_v27 = vsub.f32 0.0, %v5018_v1 }
  0xe7   : > { %v3347_v51 = vpop.eup %3346  ;;  %v1629_v5 = vadd.f32 1.0, %v3345_v17  ;;  %3366 = vpow2.f32 %v4972_v33  ;;  %v1060_v40 = vmul.f32 %v868_v19, %v5021_v9  ;;  %v1061_v28 = vmul.f32 %v869_v10, %v5024_v3  ;;  %v469_v33 = vld [vmem:[%s4251_s25 + $0x220] sm:$0xff] }
  0xe8   : > { %v3349_v43 = vpop.eup %3348  ;;  %v2195_v58 = vsub.f32 %v3347_v51, %v4816_v23  ;;  %3368 = vpow2.f32 %v1325_v47  ;;  %v1333_v42 = vmul.f32 1.442695, %v1059_v30  ;;  %v1062_v48 = vmul.f32 %v870_v11, %v5027_v13  ;;  %v471_v47 = vld [vmem:[%s4251_s25 + $0x230] sm:$0xff] }
  0xe9   : > { %v3351_v32 = vpop.eup %3350  ;;  %v2196_v18 = vsub.f32 %v3349_v43, %v4836_v46  ;;  %3370 = vrcp.f32 %v1629_v5  ;;  %v1335_v55 = vmul.f32 1.442695, %v1060_v40  ;;  %v1337_v53 = vmul.f32 1.442695, %v1061_v28  ;;  %v5063_v5 = vld [vmem:[%s4056_s10 + $0x2b8] sm:$0xff] }
  0xea   : > { %v3353_v4 = vpop.eup %3352  ;;  %v2387_v56 = vmul.f32 %v2195_v58, %v467_v7  ;;  %v2197_v36 = vsub.f32 %v3351_v32, %v4854_v41  ;;  %3372 = vpow2.f32 %v1327_v63  ;;  %v1339_v26 = vmul.f32 1.442695, %v1062_v48  ;;  %v475_v7 = vld [vmem:[%s4251_s25 + $0x250] sm:$0xff]  ;;  %v476_v58 = vld [vmem:[%s4251_s25 + $0x258] sm:$0xff] }
  0xeb   : > { %v3355_v20 = vpop.eup %3354  ;;  %v2388_v61 = vmul.f32 %v2196_v18, %v468_v12  ;;  %v2198_v22 = vsub.f32 %v3353_v4, %v4862_v15  ;;  %3374 = vpow2.f32 %v1329_v31  ;;  %v1063_v37 = vmul.f32 %v871_v25, %v5039_v49  ;;  %v473_v31 = vld [vmem:[%s4251_s25 + $0x240] sm:$0xff] }
  0xec   : > { %v3357_v21 = vpop.eup %3356  ;;  %v2579_v45 = vadd.f32 %v2387_v56, %v4816_v23  ;;  %v2389_v2 = vmul.f32 %v2197_v36, %v469_v33  ;;  %v2199_v44 = vsub.f32 %v3355_v20, %v4869_v39  ;;  %3376 = vpow2.f32 %v1331_v50  ;;  %v474_v50 = vld [vmem:[%s4251_s25 + $0x248] sm:$0xff] }
  0xed   : > { %v3359_v63 = vpop.eup %3358  ;;  %v2580_v54 = vadd.f32 %v2388_v61, %v4836_v46  ;;  %v2390_v8 = vmul.f32 %v2198_v22, %v470_v35  ;;  %v2200_v19 = vsub.f32 %v3357_v21, %v4874_v6  ;;  %3378 = vpow2.f32 %v1333_v42  ;;  %v477_v35 = vld [vmem:[%s4251_s25 + $0x260] sm:$0xff]  ;;  %v683_v22 = vld [vmem:[%s6338_s1 + $0x2d0] sm:$0xff] }
  0xee   : > { %v3361_v10 = vpop.eup %3360  ;;  %2771 = vst [vmem:[%s4303_s28 + $0x210] sm:$0xff] %v2579_v45  ;;  %v2581_v23 = vadd.f32 %v2389_v2, %v4854_v41  ;;  %v2391_v11 = vmul.f32 %v2199_v44, %v471_v47  ;;  %v2201_v17 = vsub.f32 %v3359_v63, %v4882_v59  ;;  %3380 = vpow2.f32 %v1335_v55 }
  0xef   : > { %v3363_v30 = vpop.eup %3362  ;;  %2772 = vst [vmem:[%s4303_s28 + $0x218] sm:$0xff] %v2580_v54  ;;  %v2582_v46 = vadd.f32 %v2390_v8, %v4862_v15  ;;  %v2392_v25 = vmul.f32 %v2200_v19, %v472_v29  ;;  %v2202_v51 = vsub.f32 %v3361_v10, %v4892_v16  ;;  %3382 = vpow2.f32 %v1337_v53  ;;  %v5102_v54 = vld [vmem:[%s4056_s10 + $0x2d0] sm:$0xff]  ;;  %v684_v10 = vld [vmem:[%s6338_s1 + $0x2d8] sm:$0xff] }
  0xf0   : > { %v3365_v41 = vpop.eup %3364  ;;  %2773 = vst [vmem:[%s4303_s28 + $0x220] sm:$0xff] %v2581_v23  ;;  %v2583_v40 = vadd.f32 %v2391_v11, %v4869_v39  ;;  %v2393_v28 = vmul.f32 %v2201_v17, %v473_v31  ;;  %v2203_v43 = vsub.f32 %v3363_v30, %v4901_v52  ;;  %3384 = vpow2.f32 %v1339_v26  ;;  %v5112_v30 = vld [vmem:[%s4056_s10 + $0x2d8] sm:$0xff] }
  0xf1   : > { %v3367_v12 = vpop.eup %3366  ;;  %2774 = vst [vmem:[%s4303_s28 + $0x228] sm:$0xff] %v2582_v46  ;;  %v2584_v15 = vadd.f32 %v2392_v25, %v4874_v6  ;;  %v2394_v42 = vmul.f32 %v2202_v51, %v474_v50  ;;  %v2204_v48 = vsub.f32 %v3365_v41, %v4909_v57  ;;  %v1341_v32 = vmul.f32 1.442695, %v1063_v37  ;;  %v681_v6 = vld [vmem:[%s6338_s1 + $0x2c0] sm:$0xff] }
  0xf2   : > { %v3369_v18 = vpop.eup %3368  ;;  %2775 = vst [vmem:[%s4303_s28 + $0x230] sm:$0xff] %v2583_v40  ;;  %v2585_v39 = vadd.f32 %v2393_v28, %v4882_v59  ;;  %v2395_v33 = vmul.f32 %v2203_v43, %v475_v7  ;;  %v1630_v55 = vadd.f32 1.0, %v3367_v12  ;;  %v1064_v53 = vmul.f32 %v872_v27, %v5063_v5  ;;  %v682_v59 = vld [vmem:[%s6338_s1 + $0x2c8] sm:$0xff]  ;;  %v685_v46 = vld [vmem:[%s6338_s1 + $0x2e0] sm:$0xff]  ;;  %v687_v28 = vld [vmem:[%s6338_s1 + $0x2f0] sm:$0xff] }
  0xf3   : > { %v3371_v4 = vpop.eup %3370  ;;  %2776 = vst [vmem:[%s4303_s28 + $0x238] sm:$0xff] %v2584_v15  ;;  %v2586_v56 = vadd.f32 %v2394_v42, %v4892_v16  ;;  %v2396_v36 = vmul.f32 %v2204_v48, %v476_v58  ;;  %v1631_v26 = vadd.f32 1.0, %v3369_v18  ;;  %3386 = vpow2.f32 %v1341_v32  ;;  %v5090_v16 = vld [vmem:[%s4056_s10 + $0x2c0] sm:$0xff]  ;;  %v688_v42 = vld [vmem:[%s6338_s1 + $0x2f8] sm:$0xff] }
  0xf4   : > { %v3373_v1 = vpop.eup %3372  ;;  %2777 = vst [vmem:[%s4303_s28 + $0x240] sm:$0xff] %v2585_v39  ;;  %v2587_v27 = vadd.f32 %v2395_v33, %v4901_v52  ;;  %v2205_v20 = vsub.f32 %v3371_v4, %v4921_v24  ;;  %3388 = vrcp.f32 %v1630_v55  ;;  %v1343_v61 = vmul.f32 1.442695, %v1064_v53  ;;  %v5098_v52 = vld [vmem:[%s4056_s10 + $0x2c8] sm:$0xff]  ;;  %v5119_v40 = vld [vmem:[%s4056_s10 + $0x2e0] sm:$0xff] }
  0xf5   : > { %v3375_v47 = vpop.eup %3374  ;;  %2778 = vst [vmem:[%s4303_s28 + $0x248] sm:$0xff] %v2586_v56  ;;  %v2588_v37 = vadd.f32 %v2396_v36, %v4909_v57  ;;  %3390 = vrcp.f32 %v1631_v26  ;;  %v1632_v21 = vadd.f32 1.0, %v3373_v1  ;;  %v873_v45 = vsub.f32 0.0, %v681_v6  ;;  %v689_v48 = vld [vmem:[%s6338_s1 + $0x300] sm:$0xff]  ;;  %v5135_v33 = vld [vmem:[%s4056_s10 + $0x2e8] sm:$0xff]  ;;  %v5139_v6 = vld [vmem:[%s4056_s10 + $0x2f0] sm:$0xff] }
  0xf6   : > { %v3377_v2 = vpop.eup %3376  ;;  %2779 = vst [vmem:[%s4303_s28 + $0x250] sm:$0xff] %v2587_v27  ;;  %v2397_v44 = vmul.f32 %v2205_v20, %v477_v35  ;;  %v1633_v29 = vadd.f32 1.0, %v3375_v47  ;;  %3392 = vpow2.f32 %v1343_v61  ;;  %v874_v63 = vsub.f32 0.0, %v682_v59  ;;  %v5143_v35 = vld [vmem:[%s4056_s10 + $0x2f8] sm:$0xff]  ;;  %v478_v27 = vld [vmem:[%s4251_s25 + $0x268] sm:$0xff] }
  0xf7   : > { %v3379_v8 = vpop.eup %3378  ;;  %2780 = vst [vmem:[%s4303_s28 + $0x258] sm:$0xff] %v2588_v37  ;;  %3394 = vrcp.f32 %v1632_v21  ;;  %v1634_v19 = vadd.f32 1.0, %v3377_v2  ;;  %v1065_v57 = vmul.f32 %v873_v45, %v5090_v16  ;;  %v875_v31 = vsub.f32 0.0, %v683_v22  ;;  %v479_v21 = vld [vmem:[%s4251_s25 + $0x270] sm:$0xff] }
  0xf8   : > { %v3381_v23 = vpop.eup %3380  ;;  %v2589_v11 = vadd.f32 %v2397_v44, %v4921_v24  ;;  %3396 = vrcp.f32 %v1633_v29  ;;  %v1635_v17 = vadd.f32 1.0, %v3379_v8  ;;  %v1066_v50 = vmul.f32 %v874_v63, %v5098_v52  ;;  %v686_v24 = vld [vmem:[%s6338_s1 + $0x2e8] sm:$0xff] }
  0xf9   : > { %v3383_v25 = vpop.eup %3382  ;;  %3398 = vrcp.f32 %v1634_v19  ;;  %v1636_v51 = vadd.f32 1.0, %v3381_v23  ;;  %v1345_v7 = vmul.f32 1.442695, %v1065_v57  ;;  %v1067_v41 = vmul.f32 %v875_v31, %v5102_v54  ;;  %v5153_v19 = vld [vmem:[%s4056_s10 + $0x300] sm:$0xff] }
  0xfa   : > { %v3385_v43 = vpop.eup %3384  ;;  %2781 = vst [vmem:[%s4303_s28 + $0x260] sm:$0xff] %v2589_v11  ;;  %3400 = vrcp.f32 %v1635_v17  ;;  %v1637_v58 = vadd.f32 1.0, %v3383_v25  ;;  %v1347_v12 = vmul.f32 1.442695, %v1066_v50  ;;  %v876_v15 = vsub.f32 0.0, %v684_v10  ;;  %v480_v10 = vld [vmem:[%s4251_s25 + $0x278] sm:$0xff] }
  0xfb   : > { %3402 = vrcp.f32 %v1636_v51  ;;  %v1638_v32 = vadd.f32 1.0, %v3385_v43  ;;  %v1349_v18 = vmul.f32 1.442695, %v1067_v41  ;;  %v877_v39 = vsub.f32 0.0, %v685_v46  ;;  %v481_v25 = vld [vmem:[%s4251_s25 + $0x280] sm:$0xff] }
  0xfc   : > { %3404 = vrcp.f32 %v1637_v58  ;;  %v1068_v55 = vmul.f32 %v876_v15, %v5112_v30  ;;  %v878_v53 = vsub.f32 0.0, %v686_v24  ;;  %v879_v4 = vsub.f32 0.0, %v687_v28  ;;  %v482_v28 = vld [vmem:[%s4251_s25 + $0x288] sm:$0xff] }
  0xfd   : > { %v3387_v56 = vpop.eup %3386  ;;  %3406 = vrcp.f32 %v1638_v32  ;;  %v1069_v36 = vmul.f32 %v877_v39, %v5119_v40  ;;  %v880_v26 = vsub.f32 0.0, %v688_v42  ;;  %v881_v59 = vsub.f32 0.0, %v689_v48  ;;  %v483_v48 = vld [vmem:[%s4251_s25 + $0x290] sm:$0xff]  ;;  %v484_v39 = vld [vmem:[%s4251_s25 + $0x298] sm:$0xff] }
  0xfe   : > { %v3389_v1 = vpop.eup %3388  ;;  %v1639_v20 = vadd.f32 1.0, %v3387_v56  ;;  %3408 = vpow2.f32 %v1345_v7  ;;  %v1351_v61 = vmul.f32 1.442695, %v1068_v55  ;;  %v1070_v22 = vmul.f32 %v878_v53, %v5135_v33 }
  0xff   : > { %v3391_v47 = vpop.eup %3390  ;;  %v2206_v37 = vsub.f32 %v3389_v1, %v4945_v14  ;;  %3410 = vpow2.f32 %v1347_v12  ;;  %v1353_v45 = vmul.f32 1.442695, %v1069_v36  ;;  %v1071_v2 = vmul.f32 %v879_v4, %v5139_v6  ;;  %v485_v36 = vld [vmem:[%s4251_s25 + $0x2a0] sm:$0xff] }
 0x100   : > { %v3393_v44 = vpop.eup %3392  ;;  %v2207_v29 = vsub.f32 %v3391_v47, %v4975_v0  ;;  %3412 = vrcp.f32 %v1639_v20  ;;  %v1355_v63 = vmul.f32 1.442695, %v1070_v22  ;;  %v1072_v8 = vmul.f32 %v880_v26, %v5143_v35  ;;  %v690_v26 = vld [vmem:[%s6338_s1 + $0x308] sm:$0xff] }
 0x101   : > { %v3395_v57 = vpop.eup %3394  ;;  %v2398_v31 = vmul.f32 %v2206_v37, %v478_v27  ;;  %v1640_v23 = vadd.f32 1.0, %v3393_v44  ;;  %3414 = vpow2.f32 %v1349_v18  ;;  %v1357_v11 = vmul.f32 1.442695, %v1071_v2 }
 0x102   : > { %v3397_v17 = vpop.eup %3396  ;;  %v2399_v50 = vmul.f32 %v2207_v29, %v479_v21  ;;  %v2208_v46 = vsub.f32 %v3395_v57, %v4983_v34  ;;  %3416 = vpow2.f32 %v1351_v61  ;;  %v1359_v51 = vmul.f32 1.442695, %v1072_v8  ;;  %v486_v61 = vld [vmem:[%s4251_s25 + $0x2a8] sm:$0xff]  ;;  %v5190_v8 = vld [vmem:[%s4056_s10 + $0x310] sm:$0xff] }
 0x103   : > { %v3399_v7 = vpop.eup %3398  ;;  %v2590_v41 = vadd.f32 %v2398_v31, %v4945_v14  ;;  %v2209_v24 = vsub.f32 %v3397_v17, %v4986_v62  ;;  %3418 = vrcp.f32 %v1640_v23  ;;  %v1073_v43 = vmul.f32 %v881_v59, %v5153_v19  ;;  %v692_v17 = vld [vmem:[%s6338_s1 + $0x318] sm:$0xff] }
 0x104   : > { %v3401_v58 = vpop.eup %3400  ;;  %v2591_v12 = vadd.f32 %v2399_v50, %v4975_v0  ;;  %v2400_v15 = vmul.f32 %v2208_v46, %v480_v10  ;;  %v2210_v42 = vsub.f32 %v3399_v7, %v4990_v38  ;;  %3420 = vpow2.f32 %v1353_v45  ;;  %v487_v10 = vld [vmem:[%s4251_s25 + $0x2b0] sm:$0xff] }
 0x105   : > { %v3403_v32 = vpop.eup %3402  ;;  %2782 = vst [vmem:[%s4303_s28 + $0x268] sm:$0xff] %v2590_v41  ;;  %v2401_v18 = vmul.f32 %v2209_v24, %v481_v25  ;;  %v2211_v14 = vsub.f32 %v3401_v58, %v4997_v60  ;;  %3422 = vpow2.f32 %v1355_v63  ;;  %v1361_v55 = vmul.f32 1.442695, %v1073_v43  ;;  %v693_v25 = vld [vmem:[%s6338_s1 + $0x320] sm:$0xff]  ;;  %v488_v58 = vld [vmem:[%s4251_s25 + $0x2b8] sm:$0xff] }
 0x106   : > { %v3405_v53 = vpop.eup %3404  ;;  %2783 = vst [vmem:[%s4303_s28 + $0x270] sm:$0xff] %v2591_v12  ;;  %v2592_v0 = vadd.f32 %v2400_v15, %v4983_v34  ;;  %v2402_v4 = vmul.f32 %v2210_v42, %v482_v28  ;;  %v2212_v56 = vsub.f32 %v3403_v32, %v5021_v9  ;;  %3424 = vpow2.f32 %v1357_v11  ;;  %v691_v34 = vld [vmem:[%s6338_s1 + $0x310] sm:$0xff] }
 0x107   : > { %v3407_v59 = vpop.eup %3406  ;;  %v2593_v1 = vadd.f32 %v2401_v18, %v4986_v62  ;;  %v2403_v27 = vmul.f32 %v2211_v14, %v483_v48  ;;  %v2213_v20 = vsub.f32 %v3405_v53, %v5024_v3  ;;  %3426 = vpow2.f32 %v1359_v51  ;;  %v5185_v62 = vld [vmem:[%s4056_s10 + $0x308] sm:$0xff]  ;;  %v5214_v48 = vld [vmem:[%s4056_s10 + $0x320] sm:$0xff] }
 0x108   : > { %v3409_v22 = vpop.eup %3408  ;;  %2784 = vst [vmem:[%s4303_s28 + $0x278] sm:$0xff] %v2592_v0  ;;  %v2594_v47 = vadd.f32 %v2402_v4, %v4990_v38  ;;  %v2404_v37 = vmul.f32 %v2212_v56, %v484_v39  ;;  %v2214_v21 = vsub.f32 %v3407_v59, %v5027_v13  ;;  %3428 = vpow2.f32 %v1361_v55  ;;  %v694_v39 = vld [vmem:[%s6338_s1 + $0x328] sm:$0xff] }
 0x109   : > { %v3411_v45 = vpop.eup %3410  ;;  %2785 = vst [vmem:[%s4303_s28 + $0x280] sm:$0xff] %v2593_v1  ;;  %v2595_v2 = vadd.f32 %v2403_v27, %v4997_v60  ;;  %v2405_v44 = vmul.f32 %v2213_v20, %v485_v36  ;;  %v1641_v29 = vadd.f32 1.0, %v3409_v22  ;;  %v882_v63 = vsub.f32 0.0, %v690_v26  ;;  %v5225_v1 = vld [vmem:[%s4056_s10 + $0x328] sm:$0xff]  ;;  %v695_v27 = vld [vmem:[%s6338_s1 + $0x330] sm:$0xff] }
 0x10a   : > { %v3413_v57 = vpop.eup %3412  ;;  %2786 = vst [vmem:[%s4303_s28 + $0x288] sm:$0xff] %v2594_v47  ;;  %v2596_v38 = vadd.f32 %v2404_v37, %v5021_v9  ;;  %v2406_v31 = vmul.f32 %v2214_v21, %v486_v61  ;;  %v1642_v23 = vadd.f32 1.0, %v3411_v45  ;;  %v883_v11 = vsub.f32 0.0, %v691_v34  ;;  %v697_v47 = vld [vmem:[%s6338_s1 + $0x340] sm:$0xff]  ;;  %v698_v37 = vld [vmem:[%s6338_s1 + $0x348] sm:$0xff] }
 0x10b   : > { %v3415_v60 = vpop.eup %3414  ;;  %2787 = vst [vmem:[%s4303_s28 + $0x290] sm:$0xff] %v2595_v2  ;;  %v2597_v50 = vadd.f32 %v2405_v44, %v5024_v3  ;;  %v2215_v46 = vsub.f32 %v3413_v57, %v5039_v49  ;;  %3430 = vrcp.f32 %v1641_v29  ;;  %v1074_v9 = vmul.f32 %v882_v63, %v5185_v62  ;;  %v5209_v3 = vld [vmem:[%s4056_s10 + $0x318] sm:$0xff]  ;;  %v5242_v29 = vld [vmem:[%s4056_s10 + $0x330] sm:$0xff] }
 0x10c   : > { %v3417_v51 = vpop.eup %3416  ;;  %2788 = vst [vmem:[%s4303_s28 + $0x298] sm:$0xff] %v2596_v38  ;;  %v2598_v7 = vadd.f32 %v2406_v31, %v5027_v13  ;;  %3432 = vrcp.f32 %v1642_v23  ;;  %v1643_v41 = vadd.f32 1.0, %v3415_v60  ;;  %v1075_v24 = vmul.f32 %v883_v11, %v5190_v8  ;;  %v699_v63 = vld [vmem:[%s6338_s1 + $0x350] sm:$0xff] }
 0x10d   : > { %v3419_v28 = vpop.eup %3418  ;;  %2789 = vst [vmem:[%s4303_s28 + $0x2a0] sm:$0xff] %v2597_v50  ;;  %v2407_v43 = vmul.f32 %v2215_v46, %v487_v10  ;;  %v1644_v12 = vadd.f32 1.0, %v3417_v51  ;;  %v1363_v15 = vmul.f32 1.442695, %v1074_v9  ;;  %v884_v42 = vsub.f32 0.0, %v692_v17  ;;  %v5249_v10 = vld [vmem:[%s4056_s10 + $0x338] sm:$0xff] }
 0x10e   : > { %v3421_v32 = vpop.eup %3420  ;;  %2790 = vst [vmem:[%s4303_s28 + $0x2a8] sm:$0xff] %v2598_v7  ;;  %v2216_v13 = vsub.f32 %v3419_v28, %v5063_v5  ;;  %3434 = vrcp.f32 %v1643_v41  ;;  %v1365_v18 = vmul.f32 1.442695, %v1075_v24  ;;  %v885_v14 = vsub.f32 0.0, %v693_v25  ;;  %v5256_v17 = vld [vmem:[%s4056_s10 + $0x348] sm:$0xff]  ;;  %v489_v46 = vld [vmem:[%s4251_s25 + $0x2c0] sm:$0xff] }
 0x10f   : > { %v3423_v55 = vpop.eup %3422  ;;  %v2599_v53 = vadd.f32 %v2407_v43, %v5039_v49  ;;  %3436 = vrcp.f32 %v1644_v12  ;;  %v1645_v0 = vadd.f32 1.0, %v3421_v32  ;;  %v1076_v4 = vmul.f32 %v884_v42, %v5209_v3  ;;  %v696_v49 = vld [vmem:[%s6338_s1 + $0x338] sm:$0xff]  ;;  %v490_v24 = vld [vmem:[%s4251_s25 + $0x2c8] sm:$0xff]  ;;  %v5267_v42 = vld [vmem:[%s4056_s10 + $0x350] sm:$0xff] }
 0x110   : > { %v3425_v56 = vpop.eup %3424  ;;  %v2408_v36 = vmul.f32 %v2216_v13, %v488_v58  ;;  %v1646_v26 = vadd.f32 1.0, %v3423_v55  ;;  %3438 = vpow2.f32 %v1363_v15  ;;  %v1077_v59 = vmul.f32 %v885_v14, %v5214_v48  ;;  %v491_v14 = vld [vmem:[%s4251_s25 + $0x2d0] sm:$0xff] }
 0x111   : > { %v3427_v20 = vpop.eup %3426  ;;  %2791 = vst [vmem:[%s4303_s28 + $0x2b0] sm:$0xff] %v2599_v53  ;;  %3440 = vrcp.f32 %v1645_v0  ;;  %v1647_v61 = vadd.f32 1.0, %v3425_v56  ;;  %v1367_v34 = vmul.f32 1.442695, %v1076_v4  ;;  %v886_v22 = vsub.f32 0.0, %v694_v39  ;;  %v492_v4 = vld [vmem:[%s4251_s25 + $0x2d8] sm:$0xff] }
 0x112   : > { %v3429_v21 = vpop.eup %3428  ;;  %v2600_v45 = vadd.f32 %v2408_v36, %v5063_v5  ;;  %3442 = vrcp.f32 %v1646_v26  ;;  %v1648_v2 = vadd.f32 1.0, %v3427_v20  ;;  %v1369_v44 = vmul.f32 1.442695, %v1077_v59  ;;  %v5252_v5 = vld [vmem:[%s4056_s10 + $0x340] sm:$0xff] }
 0x113   : > { %3444 = vrcp.f32 %v1647_v61  ;;  %v1649_v57 = vadd.f32 1.0, %v3429_v21  ;;  %v1078_v38 = vmul.f32 %v886_v22, %v5225_v1  ;;  %v887_v31 = vsub.f32 0.0, %v695_v27  ;;  %v493_v22 = vld [vmem:[%s4251_s25 + $0x2e0] sm:$0xff] }
 0x114   : > { %2792 = vst [vmem:[%s4303_s28 + $0x2b8] sm:$0xff] %v2600_v45  ;;  %3446 = vrcp.f32 %v1648_v2  ;;  %v888_v23 = vsub.f32 0.0, %v696_v49  ;;  %v889_v11 = vsub.f32 0.0, %v697_v47  ;;  %v890_v60 = vsub.f32 0.0, %v698_v37  ;;  %v700_v49 = vld [vmem:[%s6338_s1 + $0x358] sm:$0xff]  ;;  %v494_v45 = vld [vmem:[%s4251_s25 + $0x2e8] sm:$0xff] }
 0x115   : > { %v3431_v50 = vpop.eup %3430  ;;  %3448 = vrcp.f32 %v1649_v57  ;;  %v1371_v9 = vmul.f32 1.442695, %v1078_v38  ;;  %v1079_v25 = vmul.f32 %v887_v31, %v5242_v29  ;;  %v891_v51 = vsub.f32 0.0, %v699_v63  ;;  %v495_v38 = vld [vmem:[%s4251_s25 + $0x2f0] sm:$0xff] }
 0x116   : > { %v3433_v7 = vpop.eup %3432  ;;  %v2217_v41 = vsub.f32 %v3431_v50, %v5090_v16  ;;  %3450 = vpow2.f32 %v1365_v18  ;;  %v1080_v28 = vmul.f32 %v888_v23, %v5249_v10  ;;  %v1081_v43 = vmul.f32 %v889_v11, %v5252_v5  ;;  %v701_v23 = vld [vmem:[%s6338_s1 + $0x360] sm:$0xff] }
 0x117   : > { %v2218_v58 = vsub.f32 %v3433_v7, %v5098_v52  ;;  %3452 = vpow2.f32 %v1367_v34  ;;  %v1373_v12 = vmul.f32 1.442695, %v1079_v25  ;;  %v1082_v15 = vmul.f32 %v890_v60, %v5256_v17  ;;  %v497_v7 = vld [vmem:[%s4251_s25 + $0x300] sm:$0xff] }
 0x118   : > { %v3435_v32 = vpop.eup %3434  ;;  %v2409_v13 = vmul.f32 %v2217_v41, %v489_v46  ;;  %3454 = vpow2.f32 %v1369_v44  ;;  %v1375_v39 = vmul.f32 1.442695, %v1080_v28  ;;  %v1377_v55 = vmul.f32 1.442695, %v1081_v43  ;;  %v5284_v44 = vld [vmem:[%s4056_s10 + $0x358] sm:$0xff] }
 0x119   : > { %v3437_v18 = vpop.eup %3436  ;;  %v2410_v53 = vmul.f32 %v2218_v58, %v490_v24  ;;  %v2219_v0 = vsub.f32 %v3435_v32, %v5102_v54  ;;  %3456 = vpow2.f32 %v1371_v9  ;;  %v1379_v56 = vmul.f32 1.442695, %v1082_v15  ;;  %v496_v9 = vld [vmem:[%s4251_s25 + $0x2f8] sm:$0xff]  ;;  %v5301_v24 = vld [vmem:[%s4056_s10 + $0x360] sm:$0xff]  ;;  %v702_v15 = vld [vmem:[%s6338_s1 + $0x368] sm:$0xff] }
 0x11a   : > { %v3439_v36 = vpop.eup %3438  ;;  %v2601_v26 = vadd.f32 %v2409_v13, %v5090_v16  ;;  %v2220_v59 = vsub.f32 %v3437_v18, %v5112_v30  ;;  %3458 = vpow2.f32 %v1373_v12  ;;  %v1083_v27 = vmul.f32 %v891_v51, %v5267_v42 }
 0x11b   : > { %v3441_v20 = vpop.eup %3440  ;;  %v2602_v61 = vadd.f32 %v2410_v53, %v5098_v52  ;;  %v2411_v34 = vmul.f32 %v2219_v0, %v491_v14  ;;  %v1650_v47 = vadd.f32 1.0, %v3439_v36  ;;  %3460 = vpow2.f32 %v1375_v39  ;;  %v703_v36 = vld [vmem:[%s6338_s1 + $0x370] sm:$0xff] }
 0x11c   : > { %v3443_v16 = vpop.eup %3442  ;;  %2793 = vst [vmem:[%s4303_s28 + $0x2c0] sm:$0xff] %v2601_v26  ;;  %v2412_v37 = vmul.f32 %v2220_v59, %v492_v4  ;;  %v2221_v21 = vsub.f32 %v3441_v20, %v5119_v40  ;;  %3462 = vpow2.f32 %v1377_v55  ;;  %v1381_v2 = vmul.f32 1.442695, %v1083_v27 }
 0x11d   : > { %v3445_v63 = vpop.eup %3444  ;;  %2794 = vst [vmem:[%s4303_s28 + $0x2c8] sm:$0xff] %v2602_v61  ;;  %v2603_v52 = vadd.f32 %v2411_v34, %v5102_v54  ;;  %v2222_v57 = vsub.f32 %v3443_v16, %v5135_v33  ;;  %3464 = vrcp.f32 %v1650_v47  ;;  %v892_v31 = vsub.f32 0.0, %v700_v49  ;;  %v705_v49 = vld [vmem:[%s6338_s1 + $0x380] sm:$0xff] }
 0x11e   : > { %v3447_v11 = vpop.eup %3446  ;;  %v2604_v60 = vadd.f32 %v2412_v37, %v5112_v30  ;;  %v2413_v50 = vmul.f32 %v2221_v21, %v493_v22  ;;  %v2223_v46 = vsub.f32 %v3445_v63, %v5139_v6  ;;  %3466 = vpow2.f32 %v1379_v56  ;;  %v5314_v56 = vld [vmem:[%s4056_s10 + $0x368] sm:$0xff]  ;;  %v5330_v22 = vld [vmem:[%s4056_s10 + $0x370] sm:$0xff] }
 0x11f   : > { %v3449_v54 = vpop.eup %3448  ;;  %2795 = vst [vmem:[%s4303_s28 + $0x2d0] sm:$0xff] %v2603_v52  ;;  %v2414_v25 = vmul.f32 %v2222_v57, %v494_v45  ;;  %v2224_v51 = vsub.f32 %v3447_v11, %v5143_v35  ;;  %3468 = vpow2.f32 %v1381_v2  ;;  %v1084_v41 = vmul.f32 %v892_v31, %v5284_v44  ;;  %v5335_v45 = vld [vmem:[%s4056_s10 + $0x378] sm:$0xff]  ;;  %v5338_v2 = vld [vmem:[%s4056_s10 + $0x380] sm:$0xff] }
 0x120   : > { %v3451_v28 = vpop.eup %3450  ;;  %2796 = vst [vmem:[%s4303_s28 + $0x2d8] sm:$0xff] %v2604_v60  ;;  %v2605_v30 = vadd.f32 %v2413_v50, %v5119_v40  ;;  %v2415_v43 = vmul.f32 %v2223_v46, %v495_v38  ;;  %v2225_v58 = vsub.f32 %v3449_v54, %v5153_v19  ;;  %v893_v12 = vsub.f32 0.0, %v701_v23  ;;  %v706_v38 = vld [vmem:[%s6338_s1 + $0x388] sm:$0xff] }
 0x121   : > { %v3453_v32 = vpop.eup %3452  ;;  %v2606_v13 = vadd.f32 %v2414_v25, %v5135_v33  ;;  %v2416_v14 = vmul.f32 %v2224_v51, %v496_v9  ;;  %v1651_v39 = vadd.f32 1.0, %v3451_v28  ;;  %v1383_v55 = vmul.f32 1.442695, %v1084_v41  ;;  %v498_v23 = vld [vmem:[%s4251_s25 + $0x308] sm:$0xff] }
 0x122   : > { %v3455_v18 = vpop.eup %3454  ;;  %2797 = vst [vmem:[%s4303_s28 + $0x2e0] sm:$0xff] %v2605_v30  ;;  %v2607_v40 = vadd.f32 %v2415_v43, %v5139_v6  ;;  %v2417_v53 = vmul.f32 %v2225_v58, %v497_v7  ;;  %v1652_v0 = vadd.f32 1.0, %v3453_v32  ;;  %v1085_v4 = vmul.f32 %v893_v12, %v5301_v24  ;;  %v704_v6 = vld [vmem:[%s6338_s1 + $0x378] sm:$0xff]  ;;  %v5350_v51 = vld [vmem:[%s4056_s10 + $0x388] sm:$0xff]  ;;  %v707_v7 = vld [vmem:[%s6338_s1 + $0x390] sm:$0xff] }
 0x123   : > { %v3457_v33 = vpop.eup %3456  ;;  %2798 = vst [vmem:[%s4303_s28 + $0x2e8] sm:$0xff] %v2606_v13  ;;  %v2608_v26 = vadd.f32 %v2416_v14, %v5143_v35  ;;  %3470 = vrcp.f32 %v1651_v39  ;;  %v1653_v59 = vadd.f32 1.0, %v3455_v18  ;;  %v894_v27 = vsub.f32 0.0, %v702_v15  ;;  %v708_v58 = vld [vmem:[%s6338_s1 + $0x398] sm:$0xff]  ;;  %v709_v12 = vld [vmem:[%s6338_s1 + $0x3a0] sm:$0xff]  ;;  %v5362_v14 = vld [vmem:[%s4056_s10 + $0x390] sm:$0xff] }
 0x124   : > { %v3459_v20 = vpop.eup %3458  ;;  %2799 = vst [vmem:[%s4303_s28 + $0x2f0] sm:$0xff] %v2607_v40  ;;  %v2609_v61 = vadd.f32 %v2417_v53, %v5153_v19  ;;  %3472 = vrcp.f32 %v1652_v0  ;;  %v1654_v35 = vadd.f32 1.0, %v3457_v33  ;;  %v1385_v34 = vmul.f32 1.442695, %v1085_v4  ;;  %v710_v39 = vld [vmem:[%s6338_s1 + $0x3a8] sm:$0xff]  ;;  %v5369_v0 = vld [vmem:[%s4056_s10 + $0x398] sm:$0xff] }
 0x125   : > { %v3461_v47 = vpop.eup %3460  ;;  %2800 = vst [vmem:[%s4303_s28 + $0x2f8] sm:$0xff] %v2608_v26  ;;  %3474 = vrcp.f32 %v1653_v59  ;;  %v1655_v16 = vadd.f32 1.0, %v3459_v20  ;;  %v1086_v37 = vmul.f32 %v894_v27, %v5314_v56  ;;  %v895_v21 = vsub.f32 0.0, %v703_v36  ;;  %v5372_v4 = vld [vmem:[%s4056_s10 + $0x3a0] sm:$0xff]  ;;  %v5376_v26 = vld [vmem:[%s4056_s10 + $0x3a8] sm:$0xff]  ;;  %v499_v27 = vld [vmem:[%s4251_s25 + $0x310] sm:$0xff] }
 0x126   : > { %v3463_v63 = vpop.eup %3462  ;;  %2801 = vst [vmem:[%s4303_s28 + $0x300] sm:$0xff] %v2609_v61  ;;  %3476 = vrcp.f32 %v1654_v35  ;;  %v1656_v19 = vadd.f32 1.0, %v3461_v47  ;;  %v896_v52 = vsub.f32 0.0, %v704_v6  ;;  %v897_v57 = vsub.f32 0.0, %v705_v49  ;;  %v500_v47 = vld [vmem:[%s4251_s25 + $0x318] sm:$0xff] }
 0x127   : > { %v3465_v31 = vpop.eup %3464  ;;  %3478 = vrcp.f32 %v1655_v16  ;;  %v1657_v11 = vadd.f32 1.0, %v3463_v63  ;;  %v1387_v60 = vmul.f32 1.442695, %v1086_v37  ;;  %v1087_v50 = vmul.f32 %v895_v21, %v5330_v22 }
 0x128   : > { %v3467_v46 = vpop.eup %3466  ;;  %v2226_v9 = vsub.f32 %v3465_v31, %v5185_v62  ;;  %3480 = vrcp.f32 %v1656_v19  ;;  %v1088_v54 = vmul.f32 %v896_v52, %v5335_v45  ;;  %v1089_v25 = vmul.f32 %v897_v57, %v5338_v2  ;;  %v502_v31 = vld [vmem:[%s4251_s25 + $0x328] sm:$0xff] }
 0x129   : > { %v3469_v41 = vpop.eup %3468  ;;  %3482 = vrcp.f32 %v1657_v11  ;;  %v1658_v28 = vadd.f32 1.0, %v3467_v46  ;;  %v1389_v30 = vmul.f32 1.442695, %v1087_v50  ;;  %v898_v43 = vsub.f32 0.0, %v706_v38  ;;  %v503_v46 = vld [vmem:[%s4251_s25 + $0x330] sm:$0xff] }
 0x12a   : > { %v2418_v15 = vmul.f32 %v2226_v9, %v498_v23  ;;  %v1659_v32 = vadd.f32 1.0, %v3469_v41  ;;  %3484 = vpow2.f32 %v1383_v55  ;;  %v1391_v13 = vmul.f32 1.442695, %v1088_v54 }
 0x12b   : > { %3486 = vrcp.f32 %v1658_v28  ;;  %v1393_v18 = vmul.f32 1.442695, %v1089_v25  ;;  %v1090_v40 = vmul.f32 %v898_v43, %v5350_v51  ;;  %v899_v53 = vsub.f32 0.0, %v707_v7  ;;  %v504_v28 = vld [vmem:[%s4251_s25 + $0x338] sm:$0xff] }
 0x12c   : > { %v2610_v55 = vadd.f32 %v2418_v15, %v5185_v62  ;;  %3488 = vrcp.f32 %v1659_v32  ;;  %v900_v36 = vsub.f32 0.0, %v708_v58  ;;  %v901_v33 = vsub.f32 0.0, %v709_v12  ;;  %v505_v15 = vld [vmem:[%s4251_s25 + $0x340] sm:$0xff] }
 0x12d   : > { %v3471_v59 = vpop.eup %3470  ;;  %3490 = vpow2.f32 %v1385_v34  ;;  %v1395_v6 = vmul.f32 1.442695, %v1090_v40  ;;  %v1091_v49 = vmul.f32 %v899_v53, %v5362_v14  ;;  %v902_v20 = vsub.f32 0.0, %v710_v39  ;;  %v501_v34 = vld [vmem:[%s4251_s25 + $0x320] sm:$0xff] }
 0x12e   : > { %v3473_v61 = vpop.eup %3472  ;;  %2802 = vst [vmem:[%s4303_s28 + $0x308] sm:$0xff] %v2610_v55  ;;  %v2227_v35 = vsub.f32 %v3471_v59, %v5190_v8  ;;  %3492 = vpow2.f32 %v1387_v60  ;;  %v1092_v62 = vmul.f32 %v900_v36, %v5369_v0  ;;  %v1093_v16 = vmul.f32 %v901_v33, %v5372_v4  ;;  %v506_v55 = vld [vmem:[%s4251_s25 + $0x348] sm:$0xff] }
 0x12f   : > { %v3475_v37 = vpop.eup %3474  ;;  %v2228_v21 = vsub.f32 %v3473_v61, %v5209_v3  ;;  %3494 = vpow2.f32 %v1389_v30  ;;  %v1397_v63 = vmul.f32 1.442695, %v1091_v49  ;;  %v1094_v19 = vmul.f32 %v902_v20, %v5376_v26  ;;  %v5412_v20 = vld [vmem:[%s4056_s10 + $0x3b0] sm:$0xff] }
 0x130   : > { %v3477_v52 = vpop.eup %3476  ;;  %v2419_v57 = vmul.f32 %v2227_v35, %v499_v27  ;;  %v2229_v38 = vsub.f32 %v3475_v37, %v5214_v48  ;;  %3496 = vpow2.f32 %v1391_v13  ;;  %v1399_v23 = vmul.f32 1.442695, %v1092_v62  ;;  %v713_v62 = vld [vmem:[%s6338_s1 + $0x3c0] sm:$0xff] }
 0x131   : > { %v3479_v11 = vpop.eup %3478  ;;  %v2420_v60 = vmul.f32 %v2228_v21, %v500_v47  ;;  %v2230_v50 = vsub.f32 %v3477_v52, %v5225_v1  ;;  %3498 = vpow2.f32 %v1393_v18  ;;  %v1401_v9 = vmul.f32 1.442695, %v1093_v16 }
 0x132   : > { %v3481_v54 = vpop.eup %3480  ;;  %v2611_v25 = vadd.f32 %v2419_v57, %v5190_v8  ;;  %v2421_v7 = vmul.f32 %v2229_v38, %v501_v34  ;;  %v2231_v41 = vsub.f32 %v3479_v11, %v5242_v29  ;;  %3500 = vpow2.f32 %v1395_v6  ;;  %v507_v6 = vld [vmem:[%s4251_s25 + $0x350] sm:$0xff]  ;;  %v5428_v57 = vld [vmem:[%s4056_s10 + $0x3b8] sm:$0xff] }
 0x133   : > { %v3483_v30 = vpop.eup %3482  ;;  %v2612_v43 = vadd.f32 %v2420_v60, %v5209_v3  ;;  %v2422_v58 = vmul.f32 %v2230_v50, %v502_v31  ;;  %v2232_v12 = vsub.f32 %v3481_v54, %v5249_v10  ;;  %3502 = vpow2.f32 %v1397_v63  ;;  %v711_v3 = vld [vmem:[%s6338_s1 + $0x3b0] sm:$0xff]  ;;  %v5431_v31 = vld [vmem:[%s4056_s10 + $0x3c0] sm:$0xff]  ;;  %v714_v50 = vld [vmem:[%s6338_s1 + $0x3c8] sm:$0xff] }
 0x134   : > { %v3485_v32 = vpop.eup %3484  ;;  %2803 = vst [vmem:[%s4303_s28 + $0x310] sm:$0xff] %v2611_v25  ;;  %v2613_v8 = vadd.f32 %v2421_v7, %v5214_v48  ;;  %v2423_v13 = vmul.f32 %v2231_v41, %v503_v46  ;;  %v2233_v39 = vsub.f32 %v3483_v30, %v5252_v5  ;;  %3504 = vpow2.f32 %v1399_v23  ;;  %v715_v46 = vld [vmem:[%s6338_s1 + $0x3d0] sm:$0xff] }
 0x135   : > { %v3487_v18 = vpop.eup %3486  ;;  %2804 = vst [vmem:[%s4303_s28 + $0x318] sm:$0xff] %v2612_v43  ;;  %v2614_v40 = vadd.f32 %v2422_v58, %v5225_v1  ;;  %v2424_v53 = vmul.f32 %v2232_v12, %v504_v28  ;;  %v1660_v36 = vadd.f32 1.0, %v3485_v32  ;;  %3506 = vpow2.f32 %v1401_v9  ;;  %v712_v1 = vld [vmem:[%s6338_s1 + $0x3b8] sm:$0xff]  ;;  %v5446_v43 = vld [vmem:[%s4056_s10 + $0x3c8] sm:$0xff]  ;;  %v5449_v58 = vld [vmem:[%s4056_s10 + $0x3d0] sm:$0xff] }
 0x136   : > { %v3489_v48 = vpop.eup %3488  ;;  %2805 = vst [vmem:[%s4303_s28 + $0x320] sm:$0xff] %v2613_v8  ;;  %v2615_v33 = vadd.f32 %v2423_v13, %v5242_v29  ;;  %v2425_v59 = vmul.f32 %v2233_v39, %v505_v15  ;;  %v2234_v27 = vsub.f32 %v3487_v18, %v5256_v17  ;;  %v1403_v49 = vmul.f32 1.442695, %v1094_v19  ;;  %v716_v8 = vld [vmem:[%s6338_s1 + $0x3d8] sm:$0xff]  ;;  %v717_v13 = vld [vmem:[%s6338_s1 + $0x3e0] sm:$0xff] }
 0x137   : > { %v3491_v61 = vpop.eup %3490  ;;  %2806 = vst [vmem:[%s4303_s28 + $0x328] sm:$0xff] %v2614_v40  ;;  %v2616_v35 = vadd.f32 %v2424_v53, %v5249_v10  ;;  %v2235_v47 = vsub.f32 %v3489_v48, %v5267_v42  ;;  %3508 = vrcp.f32 %v1660_v36  ;;  %v903_v29 = vsub.f32 0.0, %v711_v3  ;;  %v718_v53 = vld [vmem:[%s6338_s1 + $0x3e8] sm:$0xff] }
 0x138   : > { %v3493_v16 = vpop.eup %3492  ;;  %2807 = vst [vmem:[%s4303_s28 + $0x330] sm:$0xff] %v2615_v33  ;;  %v2617_v37 = vadd.f32 %v2425_v59, %v5252_v5  ;;  %v2426_v21 = vmul.f32 %v2234_v27, %v506_v55  ;;  %v1661_v34 = vadd.f32 1.0, %v3491_v61  ;;  %3510 = vpow2.f32 %v1403_v49  ;;  %v5464_v59 = vld [vmem:[%s4056_s10 + $0x3d8] sm:$0xff]  ;;  %v5467_v27 = vld [vmem:[%s4056_s10 + $0x3e0] sm:$0xff]  ;;  %v5470_v61 = vld [vmem:[%s4056_s10 + $0x3e8] sm:$0xff] }
 0x139   : > { %v3495_v63 = vpop.eup %3494  ;;  %2808 = vst [vmem:[%s4303_s28 + $0x338] sm:$0xff] %v2616_v35  ;;  %v2427_v10 = vmul.f32 %v2235_v47, %v507_v6  ;;  %v1662_v19 = vadd.f32 1.0, %v3493_v16  ;;  %v1095_v52 = vmul.f32 %v903_v29, %v5412_v20  ;;  %v904_v38 = vsub.f32 0.0, %v712_v1  ;;  %v719_v35 = vld [vmem:[%s6338_s1 + $0x3f0] sm:$0xff]  ;;  %v508_v29 = vld [vmem:[%s4251_s25 + $0x358] sm:$0xff] }
 0x13a   : > { %v3497_v23 = vpop.eup %3496  ;;  %2809 = vst [vmem:[%s4303_s28 + $0x340] sm:$0xff] %v2617_v37  ;;  %v2618_v11 = vadd.f32 %v2426_v21, %v5256_v17  ;;  %3512 = vrcp.f32 %v1661_v34  ;;  %v1663_v5 = vadd.f32 1.0, %v3495_v63  ;;  %v905_v60 = vsub.f32 0.0, %v713_v62 }
 0x13b   : > { %v3499_v9 = vpop.eup %3498  ;;  %v2619_v54 = vadd.f32 %v2427_v10, %v5267_v42  ;;  %3514 = vrcp.f32 %v1662_v19  ;;  %v1664_v25 = vadd.f32 1.0, %v3497_v23  ;;  %v1405_v17 = vmul.f32 1.442695, %v1095_v52  ;;  %v5480_v19 = vld [vmem:[%s4056_s10 + $0x3f0] sm:$0xff] }
 0x13c   : > { %v3501_v7 = vpop.eup %3500  ;;  %2810 = vst [vmem:[%s4303_s28 + $0x348] sm:$0xff] %v2618_v11  ;;  %3516 = vrcp.f32 %v1663_v5  ;;  %v1665_v41 = vadd.f32 1.0, %v3499_v9  ;;  %v1096_v28 = vmul.f32 %v904_v38, %v5428_v57  ;;  %v1097_v30 = vmul.f32 %v905_v60, %v5431_v31  ;;  %v720_v11 = vld [vmem:[%s6338_s1 + $0x3f8] sm:$0xff] }
 0x13d   : > { %v3503_v12 = vpop.eup %3502  ;;  %2811 = vst [vmem:[%s4303_s28 + $0x350] sm:$0xff] %v2619_v54  ;;  %3518 = vrcp.f32 %v1664_v25  ;;  %v1666_v15 = vadd.f32 1.0, %v3501_v7  ;;  %v906_v42 = vsub.f32 0.0, %v714_v50  ;;  %v907_v32 = vsub.f32 0.0, %v715_v46  ;;  %v509_v50 = vld [vmem:[%s4251_s25 + $0x360] sm:$0xff] }
 0x13e   : > { %v3505_v39 = vpop.eup %3504  ;;  %3520 = vrcp.f32 %v1665_v41  ;;  %v1667_v3 = vadd.f32 1.0, %v3503_v12  ;;  %v1407_v18 = vmul.f32 1.442695, %v1096_v28  ;;  %v1409_v40 = vmul.f32 1.442695, %v1097_v30  ;;  %v5491_v28 = vld [vmem:[%s4056_s10 + $0x3f8] sm:$0xff] }
 0x13f   : > { %v3507_v55 = vpop.eup %3506  ;;  %3522 = vrcp.f32 %v1666_v15  ;;  %v1668_v36 = vadd.f32 1.0, %v3505_v39  ;;  %v1098_v48 = vmul.f32 %v906_v42, %v5446_v43  ;;  %v1099_v33 = vmul.f32 %v907_v32, %v5449_v58  ;;  %v511_v42 = vld [vmem:[%s4251_s25 + $0x370] sm:$0xff] }
 0x140   : > { %3524 = vrcp.f32 %v1667_v3  ;;  %v1669_v6 = vadd.f32 1.0, %v3507_v55  ;;  %v908_v49 = vsub.f32 0.0, %v716_v8  ;;  %v909_v1 = vsub.f32 0.0, %v717_v13  ;;  %v512_v3 = vld [vmem:[%s4251_s25 + $0x378] sm:$0xff] }
 0x141   : > { %v3509_v47 = vpop.eup %3508  ;;  %3526 = vrcp.f32 %v1668_v36  ;;  %v1411_v62 = vmul.f32 1.442695, %v1098_v48  ;;  %v1413_v16 = vmul.f32 1.442695, %v1099_v33  ;;  %v910_v37 = vsub.f32 0.0, %v718_v53 }
 0x142   : > { %v3511_v21 = vpop.eup %3510  ;;  %v2236_v34 = vsub.f32 %v3509_v47, %v5284_v44  ;;  %3528 = vrcp.f32 %v1669_v6  ;;  %v1100_v63 = vmul.f32 %v908_v49, %v5464_v59  ;;  %v1101_v10 = vmul.f32 %v909_v1, %v5467_v27  ;;  %v514_v1 = vld [vmem:[%s4251_s25 + $0x388] sm:$0xff] }
 0x143   : > { %v1670_v52 = vadd.f32 1.0, %v3511_v21  ;;  %3530 = vpow2.f32 %v1405_v17  ;;  %v1102_v38 = vmul.f32 %v910_v37, %v5470_v61  ;;  %v911_v23 = vsub.f32 0.0, %v719_v35  ;;  %v510_v17 = vld [vmem:[%s4251_s25 + $0x368] sm:$0xff] }
 0x144   : > { %v3513_v5 = vpop.eup %3512  ;;  %v2428_v60 = vmul.f32 %v2236_v34, %v508_v29  ;;  %3532 = vpow2.f32 %v1407_v18  ;;  %v1415_v46 = vmul.f32 1.442695, %v1100_v63  ;;  %v1417_v9 = vmul.f32 1.442695, %v1101_v10  ;;  %v516_v63 = vld [vmem:[%s4251_s25 + $0x398] sm:$0xff] }
 0x145   : > { %v3515_v54 = vpop.eup %3514  ;;  %v2237_v25 = vsub.f32 %v3513_v5, %v5301_v24  ;;  %3534 = vrcp.f32 %v1670_v52  ;;  %v1419_v7 = vmul.f32 1.442695, %v1102_v38  ;;  %v1103_v41 = vmul.f32 %v911_v23, %v5480_v19 }
 0x146   : > { %v3517_v30 = vpop.eup %3516  ;;  %v2620_v12 = vadd.f32 %v2428_v60, %v5284_v44  ;;  %v2238_v15 = vsub.f32 %v3515_v54, %v5314_v56  ;;  %3536 = vpow2.f32 %v1409_v40  ;;  %v912_v32 = vsub.f32 0.0, %v720_v11  ;;  %v513_v44 = vld [vmem:[%s4251_s25 + $0x380] sm:$0xff] }
 0x147   : > { %v3519_v8 = vpop.eup %3518  ;;  %v2429_v13 = vmul.f32 %v2237_v25, %v509_v50  ;;  %v2239_v39 = vsub.f32 %v3517_v30, %v5330_v22  ;;  %3538 = vpow2.f32 %v1411_v62  ;;  %v1421_v18 = vmul.f32 1.442695, %v1103_v41  ;;  %v517_v11 = vld [vmem:[%s4251_s25 + $0x3a0] sm:$0xff] }
 0x148   : > { %v3521_v53 = vpop.eup %3520  ;;  %2812 = vst [vmem:[%s4303_s28 + $0x358] sm:$0xff] %v2620_v12  ;;  %v2430_v55 = vmul.f32 %v2238_v15, %v510_v17  ;;  %v2240_v36 = vsub.f32 %v3519_v8, %v5335_v45  ;;  %3540 = vpow2.f32 %v1413_v16  ;;  %v1104_v40 = vmul.f32 %v912_v32, %v5491_v28  ;;  %v515_v16 = vld [vmem:[%s4251_s25 + $0x390] sm:$0xff]  ;;  %v518_v15 = vld [vmem:[%s4251_s25 + $0x3a8] sm:$0xff] }
 0x149   : > { %v3523_v48 = vpop.eup %3522  ;;  %v2621_v33 = vadd.f32 %v2429_v13, %v5301_v24  ;;  %v2431_v6 = vmul.f32 %v2239_v39, %v511_v42  ;;  %v2241_v49 = vsub.f32 %v3521_v53, %v5338_v2  ;;  %3542 = vpow2.f32 %v1415_v46 }
 0x14a   : > { %v3525_v35 = vpop.eup %3524  ;;  %v2622_v47 = vadd.f32 %v2430_v55, %v5314_v56  ;;  %v2432_v29 = vmul.f32 %v2240_v36, %v512_v3  ;;  %v2242_v62 = vsub.f32 %v3523_v48, %v5350_v51  ;;  %3544 = vpow2.f32 %v1417_v9  ;;  %v721_v56 = vld [vmem:[%s6338_s1 + $0x400] sm:$0xff]  ;;  %v724_v3 = vld [vmem:[%s6338_s1 + $0x418] sm:$0xff]  ;;  %v5549_v36 = vld [vmem:[%s4056_s10 + $0x410] sm:$0xff] }
 0x14b   : > { %v3527_v37 = vpop.eup %3526  ;;  %2813 = vst [vmem:[%s4303_s28 + $0x360] sm:$0xff] %v2621_v33  ;;  %v2623_v24 = vadd.f32 %v2431_v6, %v5330_v22  ;;  %v2433_v21 = vmul.f32 %v2241_v49, %v513_v44  ;;  %v2243_v34 = vsub.f32 %v3525_v35, %v5362_v14  ;;  %3546 = vpow2.f32 %v1419_v7  ;;  %v5523_v9 = vld [vmem:[%s4056_s10 + $0x400] sm:$0xff]  ;;  %v5553_v49 = vld [vmem:[%s4056_s10 + $0x418] sm:$0xff] }
 0x14c   : > { %v3529_v10 = vpop.eup %3528  ;;  %2814 = vst [vmem:[%s4303_s28 + $0x368] sm:$0xff] %v2622_v47  ;;  %v2624_v52 = vadd.f32 %v2432_v29, %v5335_v45  ;;  %v2434_v38 = vmul.f32 %v2242_v62, %v514_v1  ;;  %v2244_v23 = vsub.f32 %v3527_v37, %v5369_v0  ;;  %3548 = vpow2.f32 %v1421_v18  ;;  %v725_v29 = vld [vmem:[%s6338_s1 + $0x420] sm:$0xff] }
 0x14d   : > { %v3531_v22 = vpop.eup %3530  ;;  %2815 = vst [vmem:[%s4303_s28 + $0x370] sm:$0xff] %v2623_v24  ;;  %v2625_v5 = vadd.f32 %v2433_v21, %v5338_v2  ;;  %v2435_v60 = vmul.f32 %v2243_v34, %v515_v16  ;;  %v2245_v50 = vsub.f32 %v3529_v10, %v5372_v4  ;;  %v1423_v46 = vmul.f32 1.442695, %v1104_v40  ;;  %v722_v2 = vld [vmem:[%s6338_s1 + $0x408] sm:$0xff]  ;;  %v5563_v21 = vld [vmem:[%s4056_s10 + $0x420] sm:$0xff] }
 0x14e   : > { %v3533_v54 = vpop.eup %3532  ;;  %2816 = vst [vmem:[%s4303_s28 + $0x378] sm:$0xff] %v2624_v52  ;;  %v2626_v45 = vadd.f32 %v2434_v38, %v5350_v51  ;;  %v2436_v25 = vmul.f32 %v2244_v23, %v516_v63  ;;  %v1671_v17 = vadd.f32 1.0, %v3531_v22  ;;  %v913_v7 = vsub.f32 0.0, %v721_v56  ;;  %v723_v51 = vld [vmem:[%s6338_s1 + $0x410] sm:$0xff]  ;;  %v726_v34 = vld [vmem:[%s6338_s1 + $0x428] sm:$0xff]  ;;  %v728_v23 = vld [vmem:[%s6338_s1 + $0x438] sm:$0xff] }
 0x14f   : > { %v3535_v41 = vpop.eup %3534  ;;  %2817 = vst [vmem:[%s4303_s28 + $0x380] sm:$0xff] %v2625_v5  ;;  %v2627_v30 = vadd.f32 %v2435_v60, %v5362_v14  ;;  %v2437_v12 = vmul.f32 %v2245_v50, %v517_v11  ;;  %v1672_v42 = vadd.f32 1.0, %v3533_v54  ;;  %3550 = vpow2.f32 %v1423_v46  ;;  %v5541_v14 = vld [vmem:[%s4056_s10 + $0x408] sm:$0xff]  ;;  %v729_v50 = vld [vmem:[%s6338_s1 + $0x440] sm:$0xff] }
 0x150   : > { %v3537_v32 = vpop.eup %3536  ;;  %2818 = vst [vmem:[%s4303_s28 + $0x388] sm:$0xff] %v2626_v45  ;;  %v2628_v8 = vadd.f32 %v2436_v25, %v5369_v0  ;;  %v2246_v13 = vsub.f32 %v3535_v41, %v5376_v26  ;;  %3552 = vrcp.f32 %v1671_v17  ;;  %v1105_v39 = vmul.f32 %v913_v7, %v5523_v9  ;;  %v5570_v38 = vld [vmem:[%s4056_s10 + $0x428] sm:$0xff]  ;;  %v5586_v17 = vld [vmem:[%s4056_s10 + $0x430] sm:$0xff]  ;;  %v5590_v41 = vld [vmem:[%s4056_s10 + $0x438] sm:$0xff] }
 0x151   : > { %v3539_v18 = vpop.eup %3538  ;;  %2819 = vst [vmem:[%s4303_s28 + $0x390] sm:$0xff] %v2627_v30  ;;  %v2629_v53 = vadd.f32 %v2437_v12, %v5372_v4  ;;  %3554 = vrcp.f32 %v1672_v42  ;;  %v1673_v55 = vadd.f32 1.0, %v3537_v32  ;;  %v914_v0 = vsub.f32 0.0, %v722_v2  ;;  %v730_v46 = vld [vmem:[%s6338_s1 + $0x448] sm:$0xff]  ;;  %v5594_v42 = vld [vmem:[%s4056_s10 + $0x440] sm:$0xff] }
 0x152   : > { %v3541_v44 = vpop.eup %3540  ;;  %2820 = vst [vmem:[%s4303_s28 + $0x398] sm:$0xff] %v2628_v8  ;;  %v2438_v40 = vmul.f32 %v2246_v13, %v518_v15  ;;  %v1674_v48 = vadd.f32 1.0, %v3539_v18  ;;  %v1425_v33 = vmul.f32 1.442695, %v1105_v39  ;;  %v915_v6 = vsub.f32 0.0, %v723_v51  ;;  %v519_v13 = vld [vmem:[%s4251_s25 + $0x3b0] sm:$0xff] }
 0x153   : > { %v3543_v1 = vpop.eup %3542  ;;  %2821 = vst [vmem:[%s4303_s28 + $0x3a0] sm:$0xff] %v2629_v53  ;;  %3556 = vrcp.f32 %v1673_v55  ;;  %v1675_v35 = vadd.f32 1.0, %v3541_v44  ;;  %v1106_v4 = vmul.f32 %v914_v0, %v5541_v14  ;;  %v916_v47 = vsub.f32 0.0, %v724_v3  ;;  %v5599_v53 = vld [vmem:[%s4056_s10 + $0x448] sm:$0xff]  ;;  %v520_v44 = vld [vmem:[%s4251_s25 + $0x3b8] sm:$0xff] }
 0x154   : > { %v3545_v62 = vpop.eup %3544  ;;  %v2630_v16 = vadd.f32 %v2438_v40, %v5376_v26  ;;  %3558 = vrcp.f32 %v1674_v48  ;;  %v1676_v37 = vadd.f32 1.0, %v3543_v1  ;;  %v1107_v24 = vmul.f32 %v915_v6, %v5549_v36  ;;  %v727_v26 = vld [vmem:[%s6338_s1 + $0x430] sm:$0xff] }
 0x155   : > { %v3547_v63 = vpop.eup %3546  ;;  %3560 = vrcp.f32 %v1675_v35  ;;  %v1677_v56 = vadd.f32 1.0, %v3545_v62  ;;  %v1427_v10 = vmul.f32 1.442695, %v1106_v4  ;;  %v1108_v52 = vmul.f32 %v916_v47, %v5553_v49  ;;  %v521_v47 = vld [vmem:[%s4251_s25 + $0x3c0] sm:$0xff] }
 0x156   : > { %v3549_v11 = vpop.eup %3548  ;;  %2822 = vst [vmem:[%s4303_s28 + $0x3a8] sm:$0xff] %v2630_v16  ;;  %3562 = vrcp.f32 %v1676_v37  ;;  %v1678_v22 = vadd.f32 1.0, %v3547_v63  ;;  %v1429_v5 = vmul.f32 1.442695, %v1107_v24  ;;  %v917_v60 = vsub.f32 0.0, %v725_v29 }
 0x157   : > { %3564 = vrcp.f32 %v1677_v56  ;;  %v1679_v54 = vadd.f32 1.0, %v3549_v11  ;;  %v1431_v45 = vmul.f32 1.442695, %v1108_v52  ;;  %v918_v25 = vsub.f32 0.0, %v726_v34  ;;  %v522_v34 = vld [vmem:[%s4251_s25 + $0x3c8] sm:$0xff]  ;;  %v731_v56 = vld [vmem:[%s6338_s1 + $0x450] sm:$0xff] }
 0x158   : > { %3566 = vrcp.f32 %v1678_v22  ;;  %v1109_v7 = vmul.f32 %v917_v60, %v5563_v21  ;;  %v919_v2 = vsub.f32 0.0, %v727_v26  ;;  %v920_v30 = vsub.f32 0.0, %v728_v23  ;;  %v523_v23 = vld [vmem:[%s4251_s25 + $0x3d0] sm:$0xff] }
 0x159   : > { %v3551_v12 = vpop.eup %3550  ;;  %3568 = vrcp.f32 %v1679_v54  ;;  %v1110_v15 = vmul.f32 %v918_v25, %v5570_v38  ;;  %v921_v51 = vsub.f32 0.0, %v729_v50  ;;  %v922_v32 = vsub.f32 0.0, %v730_v46  ;;  %v524_v46 = vld [vmem:[%s4251_s25 + $0x3d8] sm:$0xff]  ;;  %v525_v25 = vld [vmem:[%s4251_s25 + $0x3e0] sm:$0xff] }
 0x15a   : > { %v3553_v8 = vpop.eup %3552  ;;  %v1680_v39 = vadd.f32 1.0, %v3551_v12  ;;  %3570 = vpow2.f32 %v1425_v33  ;;  %v1433_v3 = vmul.f32 1.442695, %v1109_v7  ;;  %v1111_v18 = vmul.f32 %v919_v2, %v5586_v17 }
 0x15b   : > { %v3555_v55 = vpop.eup %3554  ;;  %v2247_v0 = vsub.f32 %v3553_v8, %v5412_v20  ;;  %3572 = vpow2.f32 %v1427_v10  ;;  %v1435_v40 = vmul.f32 1.442695, %v1110_v15  ;;  %v1112_v48 = vmul.f32 %v920_v30, %v5590_v41  ;;  %v526_v15 = vld [vmem:[%s4251_s25 + $0x3e8] sm:$0xff] }
 0x15c   : > { %v2248_v6 = vsub.f32 %v3555_v55, %v5428_v57  ;;  %3574 = vrcp.f32 %v1680_v39  ;;  %v1437_v1 = vmul.f32 1.442695, %v1111_v18  ;;  %v1113_v33 = vmul.f32 %v921_v51, %v5594_v42  ;;  %v5627_v51 = vld [vmem:[%s4056_s10 + $0x450] sm:$0xff] }
 0x15d   : > { %v3557_v35 = vpop.eup %3556  ;;  %v2439_v4 = vmul.f32 %v2247_v0, %v519_v13  ;;  %3576 = vpow2.f32 %v1429_v5  ;;  %v1439_v29 = vmul.f32 1.442695, %v1112_v48  ;;  %v1114_v62 = vmul.f32 %v922_v32, %v5599_v53 }
 0x15e   : > { %v3559_v16 = vpop.eup %3558  ;;  %v2440_v37 = vmul.f32 %v2248_v6, %v520_v44  ;;  %v2249_v24 = vsub.f32 %v3557_v35, %v5431_v31  ;;  %3578 = vpow2.f32 %v1431_v45  ;;  %v1441_v63 = vmul.f32 1.442695, %v1113_v33  ;;  %v5642_v33 = vld [vmem:[%s4056_s10 + $0x458] sm:$0xff] }
 0x15f   : > { %v3561_v10 = vpop.eup %3560  ;;  %v2631_v52 = vadd.f32 %v2439_v4, %v5412_v20  ;;  %v2250_v26 = vsub.f32 %v3559_v16, %v5446_v43  ;;  %3580 = vpow2.f32 %v1433_v3  ;;  %v1443_v11 = vmul.f32 1.442695, %v1114_v62  ;;  %v527_v3 = vld [vmem:[%s4251_s25 + $0x3f0] sm:$0xff] }
 0x160   : > { %v3563_v22 = vpop.eup %3562  ;;  %v2632_v5 = vadd.f32 %v2440_v37, %v5428_v57  ;;  %v2441_v60 = vmul.f32 %v2249_v24, %v521_v47  ;;  %v2251_v50 = vsub.f32 %v3561_v10, %v5449_v58  ;;  %3582 = vpow2.f32 %v1435_v40  ;;  %v528_v47 = vld [vmem:[%s4251_s25 + $0x3f8] sm:$0xff] }
 0x161   : > { %v3565_v54 = vpop.eup %3564  ;;  %2823 = vst [vmem:[%s4303_s28 + $0x3b0] sm:$0xff] %v2631_v52  ;;  %v2442_v45 = vmul.f32 %v2250_v26, %v522_v34  ;;  %v2252_v20 = vsub.f32 %v3563_v22, %v5464_v59  ;;  %3584 = vpow2.f32 %v1437_v1  ;;  %v923_v7 = vsub.f32 0.0, %v731_v56  ;;  %v5660_v26 = vld [vmem:[%s4056_s10 + $0x460] sm:$0xff] }
 0x162   : > { %v3567_v2 = vpop.eup %3566  ;;  %2824 = vst [vmem:[%s4303_s28 + $0x3b8] sm:$0xff] %v2632_v5  ;;  %v2633_v57 = vadd.f32 %v2441_v60, %v5431_v31  ;;  %v2443_v30 = vmul.f32 %v2251_v50, %v523_v23  ;;  %v2253_v12 = vsub.f32 %v3565_v54, %v5467_v27  ;;  %3586 = vpow2.f32 %v1439_v29  ;;  %v732_v31 = vld [vmem:[%s6338_s1 + $0x458] sm:$0xff]  ;;  %v5664_v5 = vld [vmem:[%s4056_s10 + $0x468] sm:$0xff]  ;;  %v735_v60 = vld [vmem:[%s6338_s1 + $0x470] sm:$0xff] }
 0x163   : > { %v3569_v32 = vpop.eup %3568  ;;  %v2634_v8 = vadd.f32 %v2442_v45, %v5446_v43  ;;  %v2444_v13 = vmul.f32 %v2252_v20, %v524_v46  ;;  %v2254_v39 = vsub.f32 %v3567_v2, %v5470_v61  ;;  %3588 = vpow2.f32 %v1441_v63  ;;  %v736_v45 = vld [vmem:[%s6338_s1 + $0x478] sm:$0xff] }
 0x164   : > { %v3571_v18 = vpop.eup %3570  ;;  %2825 = vst [vmem:[%s4303_s28 + $0x3c0] sm:$0xff] %v2633_v57  ;;  %v2635_v55 = vadd.f32 %v2443_v30, %v5449_v58  ;;  %v2445_v0 = vmul.f32 %v2253_v12, %v525_v25  ;;  %v2255_v44 = vsub.f32 %v3569_v32, %v5480_v19  ;;  %3590 = vpow2.f32 %v1443_v11  ;;  %v5676_v57 = vld [vmem:[%s4056_s10 + $0x470] sm:$0xff] }
 0x165   : > { %v3573_v43 = vpop.eup %3572  ;;  %2826 = vst [vmem:[%s4303_s28 + $0x3c8] sm:$0xff] %v2634_v8  ;;  %v2636_v40 = vadd.f32 %v2444_v13, %v5464_v59  ;;  %v2446_v48 = vmul.f32 %v2254_v39, %v526_v15  ;;  %v1681_v6 = vadd.f32 1.0, %v3571_v18  ;;  %v1115_v1 = vmul.f32 %v923_v7, %v5627_v51  ;;  %v733_v59 = vld [vmem:[%s6338_s1 + $0x460] sm:$0xff]  ;;  %v5680_v8 = vld [vmem:[%s4056_s10 + $0x478] sm:$0xff]  ;;  %v738_v18 = vld [vmem:[%s6338_s1 + $0x488] sm:$0xff] }
 0x166   : > { %v3575_v35 = vpop.eup %3574  ;;  %2827 = vst [vmem:[%s4303_s28 + $0x3d0] sm:$0xff] %v2635_v55  ;;  %v2637_v58 = vadd.f32 %v2445_v0, %v5467_v27  ;;  %v2447_v4 = vmul.f32 %v2255_v44, %v527_v3  ;;  %v1682_v29 = vadd.f32 1.0, %v3573_v43  ;;  %v924_v62 = vsub.f32 0.0, %v732_v31  ;;  %v734_v27 = vld [vmem:[%s6338_s1 + $0x468] sm:$0xff]  ;;  %v737_v13 = vld [vmem:[%s6338_s1 + $0x480] sm:$0xff]  ;;  %v739_v55 = vld [vmem:[%s6338_s1 + $0x490] sm:$0xff] }
 0x167   : > { %v3577_v16 = vpop.eup %3576  ;;  %2828 = vst [vmem:[%s4303_s28 + $0x3d8] sm:$0xff] %v2636_v40  ;;  %v2638_v37 = vadd.f32 %v2446_v48, %v5470_v61  ;;  %v2256_v24 = vsub.f32 %v3575_v35, %v5491_v28  ;;  %3592 = vrcp.f32 %v1681_v6  ;;  %v1445_v34 = vmul.f32 1.442695, %v1115_v1  ;;  %v5694_v48 = vld [vmem:[%s4056_s10 + $0x480] sm:$0xff]  ;;  %v740_v6 = vld [vmem:[%s6338_s1 + $0x498] sm:$0xff] }
 0x168   : > { %v3579_v63 = vpop.eup %3578  ;;  %2829 = vst [vmem:[%s4303_s28 + $0x3e0] sm:$0xff] %v2637_v58  ;;  %v2639_v56 = vadd.f32 %v2447_v4, %v5480_v19  ;;  %3594 = vrcp.f32 %v1682_v29  ;;  %v1683_v10 = vadd.f32 1.0, %v3577_v16  ;;  %v1116_v52 = vmul.f32 %v924_v62, %v5642_v33  ;;  %v5701_v4 = vld [vmem:[%s4056_s10 + $0x488] sm:$0xff]  ;;  %v5707_v16 = vld [vmem:[%s4056_s10 + $0x498] sm:$0xff] }
 0x169   : > { %v3581_v61 = vpop.eup %3580  ;;  %2830 = vst [vmem:[%s4303_s28 + $0x3e8] sm:$0xff] %v2638_v37  ;;  %v2448_v23 = vmul.f32 %v2256_v24, %v528_v47  ;;  %v1684_v11 = vadd.f32 1.0, %v3579_v63  ;;  %3596 = vpow2.f32 %v1445_v34  ;;  %v925_v22 = vsub.f32 0.0, %v733_v59  ;;  %v5704_v47 = vld [vmem:[%s4056_s10 + $0x490] sm:$0xff]  ;;  %v529_v24 = vld [vmem:[%s4251_s25 + $0x400] sm:$0xff] }
 0x16a   : > { %v3583_v19 = vpop.eup %3582  ;;  %2831 = vst [vmem:[%s4303_s28 + $0x3f0] sm:$0xff] %v2639_v56  ;;  %3598 = vrcp.f32 %v1683_v10  ;;  %v1685_v50 = vadd.f32 1.0, %v3581_v61  ;;  %v1447_v46 = vmul.f32 1.442695, %v1116_v52  ;;  %v926_v54 = vsub.f32 0.0, %v734_v27  ;;  %v530_v52 = vld [vmem:[%s4251_s25 + $0x408] sm:$0xff] }
 0x16b   : > { %v3585_v20 = vpop.eup %3584  ;;  %v2640_v25 = vadd.f32 %v2448_v23, %v5491_v28  ;;  %3600 = vrcp.f32 %v1684_v11  ;;  %v1686_v7 = vadd.f32 1.0, %v3583_v19  ;;  %v1117_v2 = vmul.f32 %v925_v22, %v5660_v26 }
 0x16c   : > { %v3587_v30 = vpop.eup %3586  ;;  %3602 = vrcp.f32 %v1685_v50  ;;  %v1687_v12 = vadd.f32 1.0, %v3585_v20  ;;  %v1118_v15 = vmul.f32 %v926_v54, %v5664_v5  ;;  %v927_v32 = vsub.f32 0.0, %v735_v60 }
 0x16d   : > { %v3589_v28 = vpop.eup %3588  ;;  %2832 = vst [vmem:[%s4303_s28 + $0x3f8] sm:$0xff] %v2640_v25  ;;  %3604 = vrcp.f32 %v1686_v7  ;;  %v1688_v39 = vadd.f32 1.0, %v3587_v30  ;;  %v1449_v3 = vmul.f32 1.442695, %v1117_v2  ;;  %v928_v31 = vsub.f32 0.0, %v736_v45  ;;  %v531_v45 = vld [vmem:[%s4251_s25 + $0x410] sm:$0xff] }
 0x16e   : > { %v3591_v0 = vpop.eup %3590  ;;  %3606 = vrcp.f32 %v1687_v12  ;;  %v1689_v44 = vadd.f32 1.0, %v3589_v28  ;;  %v1451_v43 = vmul.f32 1.442695, %v1118_v15  ;;  %v1119_v40 = vmul.f32 %v927_v32, %v5676_v57  ;;  %v532_v30 = vld [vmem:[%s4251_s25 + $0x418] sm:$0xff]  ;;  %v741_v15 = vld [vmem:[%s6338_s1 + $0x4a0] sm:$0xff] }
 0x16f   : > { %3608 = vrcp.f32 %v1688_v39  ;;  %v1690_v1 = vadd.f32 1.0, %v3591_v0  ;;  %v1120_v35 = vmul.f32 %v928_v31, %v5680_v8  ;;  %v929_v58 = vsub.f32 0.0, %v737_v13  ;;  %v533_v39 = vld [vmem:[%s4251_s25 + $0x420] sm:$0xff] }
 0x170   : > { %3610 = vrcp.f32 %v1689_v44  ;;  %v1453_v29 = vmul.f32 1.442695, %v1119_v40  ;;  %v930_v62 = vsub.f32 0.0, %v738_v18  ;;  %v931_v59 = vsub.f32 0.0, %v739_v55  ;;  %v534_v44 = vld [vmem:[%s4251_s25 + $0x428] sm:$0xff] }
 0x171   : > { %v3593_v37 = vpop.eup %3592  ;;  %3612 = vrcp.f32 %v1690_v1  ;;  %v1455_v34 = vmul.f32 1.442695, %v1120_v35  ;;  %v1121_v27 = vmul.f32 %v929_v58, %v5694_v48  ;;  %v932_v63 = vsub.f32 0.0, %v740_v6  ;;  %v535_v6 = vld [vmem:[%s4251_s25 + $0x430] sm:$0xff] }
 0x172   : > { %v3595_v56 = vpop.eup %3594  ;;  %v2257_v10 = vsub.f32 %v3593_v37, %v5523_v9  ;;  %3614 = vpow2.f32 %v1447_v46  ;;  %v1122_v61 = vmul.f32 %v930_v62, %v5701_v4  ;;  %v1123_v23 = vmul.f32 %v931_v59, %v5704_v47  ;;  %v536_v62 = vld [vmem:[%s4251_s25 + $0x438] sm:$0xff]  ;;  %v5737_v59 = vld [vmem:[%s4056_s10 + $0x4a0] sm:$0xff] }
 0x173   : > { %v3597_v11 = vpop.eup %3596  ;;  %v2258_v22 = vsub.f32 %v3595_v56, %v5541_v14  ;;  %3616 = vpow2.f32 %v1449_v3  ;;  %v1457_v60 = vmul.f32 1.442695, %v1121_v27  ;;  %v1124_v19 = vmul.f32 %v932_v63, %v5707_v16  ;;  %v537_v63 = vld [vmem:[%s4251_s25 + $0x440] sm:$0xff] }
 0x174   : > { %v3599_v50 = vpop.eup %3598  ;;  %v2449_v54 = vmul.f32 %v2257_v10, %v529_v24  ;;  %v1691_v20 = vadd.f32 1.0, %v3597_v11  ;;  %3618 = vpow2.f32 %v1451_v43  ;;  %v1459_v25 = vmul.f32 1.442695, %v1122_v61 }
 0x175   : > { %v3601_v46 = vpop.eup %3600  ;;  %v2450_v7 = vmul.f32 %v2258_v22, %v530_v52  ;;  %v2259_v2 = vsub.f32 %v3599_v50, %v5549_v36  ;;  %3620 = vpow2.f32 %v1453_v29  ;;  %v1461_v12 = vmul.f32 1.442695, %v1123_v23  ;;  %v538_v23 = vld [vmem:[%s4251_s25 + $0x448] sm:$0xff] }
 0x176   : > { %v3603_v32 = vpop.eup %3602  ;;  %v2641_v13 = vadd.f32 %v2449_v54, %v5523_v9  ;;  %v2260_v28 = vsub.f32 %v3601_v46, %v5553_v49  ;;  %3622 = vrcp.f32 %v1691_v20  ;;  %v1463_v3 = vmul.f32 1.442695, %v1124_v19  ;;  %v5754_v50 = vld [vmem:[%s4056_s10 + $0x4a8] sm:$0xff] }
 0x177   : > { %v3605_v31 = vpop.eup %3604  ;;  %v2642_v18 = vadd.f32 %v2450_v7, %v5541_v14  ;;  %v2451_v55 = vmul.f32 %v2259_v2, %v531_v45  ;;  %v2261_v0 = vsub.f32 %v3603_v32, %v5563_v21  ;;  %3624 = vpow2.f32 %v1455_v34 }
 0x178   : > { %v3607_v43 = vpop.eup %3606  ;;  %2833 = vst [vmem:[%s4303_s28 + $0x400] sm:$0xff] %v2641_v13  ;;  %v2452_v40 = vmul.f32 %v2260_v28, %v532_v30  ;;  %v2262_v9 = vsub.f32 %v3605_v31, %v5570_v38  ;;  %3626 = vpow2.f32 %v1457_v60  ;;  %v933_v1 = vsub.f32 0.0, %v741_v15 }
 0x179   : > { %v3609_v35 = vpop.eup %3608  ;;  %2834 = vst [vmem:[%s4303_s28 + $0x408] sm:$0xff] %v2642_v18  ;;  %v2643_v14 = vadd.f32 %v2451_v55, %v5549_v36  ;;  %v2453_v58 = vmul.f32 %v2261_v0, %v533_v39  ;;  %v2263_v29 = vsub.f32 %v3607_v43, %v5586_v17  ;;  %3628 = vpow2.f32 %v1459_v25  ;;  %v742_v36 = vld [vmem:[%s6338_s1 + $0x4a8] sm:$0xff]  ;;  %v5770_v39 = vld [vmem:[%s4056_s10 + $0x4b0] sm:$0xff]  ;;  %v5779_v0 = vld [vmem:[%s4056_s10 + $0x4b8] sm:$0xff] }
 0x17a   : > { %v3611_v37 = vpop.eup %3610  ;;  %v2644_v24 = vadd.f32 %v2452_v40, %v5553_v49  ;;  %v2454_v34 = vmul.f32 %v2262_v9, %v534_v44  ;;  %v2264_v27 = vsub.f32 %v3609_v35, %v5590_v41  ;;  %3630 = vpow2.f32 %v1461_v12  ;;  %v539_v18 = vld [vmem:[%s4251_s25 + $0x450] sm:$0xff] }
 0x17b   : > { %v3613_v56 = vpop.eup %3612  ;;  %2835 = vst [vmem:[%s4303_s28 + $0x410] sm:$0xff] %v2643_v14  ;;  %v2645_v10 = vadd.f32 %v2453_v58, %v5563_v21  ;;  %v2455_v52 = vmul.f32 %v2263_v29, %v535_v6  ;;  %v2265_v61 = vsub.f32 %v3611_v37, %v5594_v42  ;;  %3632 = vpow2.f32 %v1463_v3  ;;  %v5784_v6 = vld [vmem:[%s4056_s10 + $0x4c0] sm:$0xff] }
 0x17c   : > { %v3615_v49 = vpop.eup %3614  ;;  %2836 = vst [vmem:[%s4303_s28 + $0x418] sm:$0xff] %v2644_v24  ;;  %v2646_v11 = vadd.f32 %v2454_v34, %v5570_v38  ;;  %v2456_v22 = vmul.f32 %v2264_v27, %v536_v62  ;;  %v2266_v60 = vsub.f32 %v3613_v56, %v5599_v53  ;;  %v1125_v19 = vmul.f32 %v933_v1, %v5737_v59  ;;  %v743_v38 = vld [vmem:[%s6338_s1 + $0x4b0] sm:$0xff]  ;;  %v746_v24 = vld [vmem:[%s6338_s1 + $0x4c8] sm:$0xff] }
 0x17d   : > { %v3617_v54 = vpop.eup %3616  ;;  %2837 = vst [vmem:[%s4303_s28 + $0x420] sm:$0xff] %v2645_v10  ;;  %v2647_v21 = vadd.f32 %v2455_v52, %v5586_v17  ;;  %v2457_v45 = vmul.f32 %v2265_v61, %v537_v63  ;;  %v1692_v20 = vadd.f32 1.0, %v3615_v49  ;;  %v934_v25 = vsub.f32 0.0, %v742_v36  ;;  %v744_v17 = vld [vmem:[%s6338_s1 + $0x4b8] sm:$0xff]  ;;  %v747_v34 = vld [vmem:[%s6338_s1 + $0x4d0] sm:$0xff]  ;;  %v5797_v10 = vld [vmem:[%s4056_s10 + $0x4c8] sm:$0xff] }
 0x17e   : > { %v3619_v46 = vpop.eup %3618  ;;  %2838 = vst [vmem:[%s4303_s28 + $0x428] sm:$0xff] %v2646_v11  ;;  %v2648_v7 = vadd.f32 %v2456_v22, %v5590_v41  ;;  %v2458_v2 = vmul.f32 %v2266_v60, %v538_v23  ;;  %v1693_v30 = vadd.f32 1.0, %v3617_v54  ;;  %v1465_v12 = vmul.f32 1.442695, %v1125_v19  ;;  %v745_v41 = vld [vmem:[%s6338_s1 + $0x4c0] sm:$0xff]  ;;  %v748_v52 = vld [vmem:[%s6338_s1 + $0x4d8] sm:$0xff] }
 0x17f   : > { %v3621_v15 = vpop.eup %3620  ;;  %2839 = vst [vmem:[%s4303_s28 + $0x430] sm:$0xff] %v2647_v21  ;;  %v2649_v32 = vadd.f32 %v2457_v45, %v5594_v42  ;;  %3634 = vrcp.f32 %v1692_v20  ;;  %v1694_v13 = vadd.f32 1.0, %v3619_v46  ;;  %v1126_v28 = vmul.f32 %v934_v25, %v5754_v50  ;;  %v749_v61 = vld [vmem:[%s6338_s1 + $0x4e0] sm:$0xff]  ;;  %v5807_v60 = vld [vmem:[%s4056_s10 + $0x4d0] sm:$0xff]  ;;  %v750_v19 = vld [vmem:[%s6338_s1 + $0x4e8] sm:$0xff] }
 0x180   : > { %v3623_v3 = vpop.eup %3622  ;;  %2840 = vst [vmem:[%s4303_s28 + $0x438] sm:$0xff] %v2648_v7  ;;  %v2650_v31 = vadd.f32 %v2458_v2, %v5599_v53  ;;  %3636 = vrcp.f32 %v1693_v30  ;;  %v1695_v55 = vadd.f32 1.0, %v3621_v15  ;;  %v935_v42 = vsub.f32 0.0, %v743_v38  ;;  %v5815_v54 = vld [vmem:[%s6338_s1 + $0x4f0] sm:$0xff]  ;;  %v5818_v20 = vld [vmem:[%s4056_s10 + $0x4d8] sm:$0xff]  ;;  %v5821_v25 = vld [vmem:[%s4056_s10 + $0x4e0] sm:$0xff] }
 0x181   : > { %v3625_v44 = vpop.eup %3624  ;;  %2841 = vst [vmem:[%s4303_s28 + $0x440] sm:$0xff] %v2649_v32  ;;  %v2267_v43 = vsub.f32 %v3623_v3, %v5627_v51  ;;  %3638 = vrcp.f32 %v1694_v13  ;;  %v1467_v40 = vmul.f32 1.442695, %v1126_v28  ;;  %v936_v9 = vsub.f32 0.0, %v744_v17  ;;  %v5825_v2 = vld [vmem:[%s4056_s10 + $0x4e8] sm:$0xff]  ;;  %v540_v32 = vld [vmem:[%s4251_s25 + $0x458] sm:$0xff] }
 0x182   : > { %v3627_v1 = vpop.eup %3626  ;;  %2842 = vst [vmem:[%s4303_s28 + $0x448] sm:$0xff] %v2650_v31  ;;  %3640 = vrcp.f32 %v1695_v55  ;;  %v1696_v53 = vadd.f32 1.0, %v3625_v44  ;;  %v1127_v35 = vmul.f32 %v935_v42, %v5770_v39  ;;  %v937_v14 = vsub.f32 0.0, %v745_v41 }
 0x183   : > { %v3629_v58 = vpop.eup %3628  ;;  %v2459_v29 = vmul.f32 %v2267_v43, %v539_v18  ;;  %v1697_v62 = vadd.f32 1.0, %v3627_v1  ;;  %3642 = vpow2.f32 %v1465_v12  ;;  %v1128_v37 = vmul.f32 %v936_v9, %v5779_v0  ;;  %v541_v18 = vld [vmem:[%s4251_s25 + $0x460] sm:$0xff] }
 0x184   : > { %v3631_v27 = vpop.eup %3630  ;;  %3644 = vrcp.f32 %v1696_v53  ;;  %v1698_v63 = vadd.f32 1.0, %v3629_v58  ;;  %v1469_v36 = vmul.f32 1.442695, %v1127_v35  ;;  %v1129_v56 = vmul.f32 %v937_v14, %v5784_v6  ;;  %v543_v58 = vld [vmem:[%s4251_s25 + $0x470] sm:$0xff] }
 0x185   : > { %v3633_v23 = vpop.eup %3632  ;;  %v2651_v49 = vadd.f32 %v2459_v29, %v5627_v51  ;;  %3646 = vrcp.f32 %v1697_v62  ;;  %v1699_v11 = vadd.f32 1.0, %v3631_v27  ;;  %v1471_v22 = vmul.f32 1.442695, %v1128_v37  ;;  %v5842_v27 = vld [vmem:[%s4056_s10 + $0x4f0] sm:$0xff] }
 0x186   : > { %3648 = vrcp.f32 %v1698_v63  ;;  %v1700_v21 = vadd.f32 1.0, %v3633_v23  ;;  %v1473_v45 = vmul.f32 1.442695, %v1129_v56  ;;  %v938_v51 = vsub.f32 0.0, %v746_v24 }
 0x187   : > { %2843 = vst [vmem:[%s4303_s28 + $0x450] sm:$0xff] %v2651_v49  ;;  %3650 = vrcp.f32 %v1699_v11  ;;  %v939_v38 = vsub.f32 0.0, %v747_v34  ;;  %v940_v46 = vsub.f32 0.0, %v748_v52  ;;  %v941_v7 = vsub.f32 0.0, %v749_v61  ;;  %v544_v52 = vld [vmem:[%s4251_s25 + $0x478] sm:$0xff] }
 0x188   : > { %3652 = vrcp.f32 %v1700_v21  ;;  %v1130_v30 = vmul.f32 %v938_v51, %v5797_v10  ;;  %v942_v12 = vsub.f32 0.0, %v750_v19  ;;  %v943_v17 = vsub.f32 0.0, %v5815_v54  ;;  %v545_v19 = vld [vmem:[%s4251_s25 + $0x480] sm:$0xff] }
 0x189   : > { %v3635_v15 = vpop.eup %3634  ;;  %3654 = vpow2.f32 %v1467_v40  ;;  %v1131_v13 = vmul.f32 %v939_v38, %v5807_v60  ;;  %v1132_v28 = vmul.f32 %v940_v46, %v5818_v20  ;;  %v1133_v41 = vmul.f32 %v941_v7, %v5821_v25  ;;  %v542_v40 = vld [vmem:[%s4251_s25 + $0x468] sm:$0xff] }
 0x18a   : > { %v3637_v3 = vpop.eup %3636  ;;  %v2268_v31 = vsub.f32 %v3635_v15, %v5642_v33  ;;  %3656 = vpow2.f32 %v1469_v36  ;;  %v1475_v55 = vmul.f32 1.442695, %v1130_v30  ;;  %v1134_v42 = vmul.f32 %v942_v12, %v5825_v2  ;;  %v547_v30 = vld [vmem:[%s4251_s25 + $0x490] sm:$0xff] }
 0x18b   : > { %v3639_v44 = vpop.eup %3638  ;;  %v2269_v43 = vsub.f32 %v3637_v3, %v5660_v26  ;;  %3658 = vpow2.f32 %v1471_v22  ;;  %v1477_v9 = vmul.f32 1.442695, %v1131_v13  ;;  %v1479_v1 = vmul.f32 1.442695, %v1132_v28  ;;  %v5865_v28 = vld [vmem:[%s4056_s10 + $0x4f8] sm:$0xff] }
 0x18c   : > { %v3641_v53 = vpop.eup %3640  ;;  %v2460_v35 = vmul.f32 %v2268_v31, %v540_v32  ;;  %v2270_v14 = vsub.f32 %v3639_v44, %v5664_v5  ;;  %3660 = vpow2.f32 %v1473_v45  ;;  %v1481_v29 = vmul.f32 1.442695, %v1133_v41  ;;  %v546_v45 = vld [vmem:[%s4251_s25 + $0x488] sm:$0xff]  ;;  %v548_v32 = vld [vmem:[%s4251_s25 + $0x498] sm:$0xff] }
 0x18d   : > { %v3643_v62 = vpop.eup %3642  ;;  %v2461_v37 = vmul.f32 %v2269_v43, %v541_v18  ;;  %v2271_v24 = vsub.f32 %v3641_v53, %v5676_v57  ;;  %3662 = vpow2.f32 %v1475_v55  ;;  %v1483_v34 = vmul.f32 1.442695, %v1134_v42  ;;  %v753_v55 = vld [vmem:[%s6338_s1 + $0x500] sm:$0xff] }
 0x18e   : > { %v3645_v63 = vpop.eup %3644  ;;  %v2652_v36 = vadd.f32 %v2460_v35, %v5642_v33  ;;  %v2462_v56 = vmul.f32 %v2270_v14, %v542_v40  ;;  %v1701_v61 = vadd.f32 1.0, %v3643_v62  ;;  %3664 = vpow2.f32 %v1477_v9  ;;  %v5878_v14 = vld [vmem:[%s4056_s10 + $0x500] sm:$0xff] }
 0x18f   : > { %v3647_v23 = vpop.eup %3646  ;;  %v2653_v49 = vadd.f32 %v2461_v37, %v5660_v26  ;;  %v2463_v11 = vmul.f32 %v2271_v24, %v543_v58  ;;  %v2272_v22 = vsub.f32 %v3645_v63, %v5680_v8  ;;  %3666 = vpow2.f32 %v1479_v1  ;;  %v752_v26 = vld [vmem:[%s6338_s1 + $0x4f8] sm:$0xff]  ;;  %v754_v58 = vld [vmem:[%s6338_s1 + $0x508] sm:$0xff] }
 0x190   : > { %v3649_v54 = vpop.eup %3648  ;;  %2844 = vst [vmem:[%s4303_s28 + $0x458] sm:$0xff] %v2652_v36  ;;  %v2654_v21 = vadd.f32 %v2462_v56, %v5664_v5  ;;  %v2273_v33 = vsub.f32 %v3647_v23, %v5694_v48  ;;  %3668 = vrcp.f32 %v1701_v61  ;;  %v1135_v51 = vmul.f32 %v943_v17, %v5842_v27  ;;  %v756_v24 = vld [vmem:[%s6338_s1 + $0x518] sm:$0xff]  ;;  %v5894_v56 = vld [vmem:[%s4056_s10 + $0x508] sm:$0xff] }
 0x191   : > { %v3651_v38 = vpop.eup %3650  ;;  %2845 = vst [vmem:[%s4303_s28 + $0x460] sm:$0xff] %v2653_v49  ;;  %v2655_v46 = vadd.f32 %v2463_v11, %v5676_v57  ;;  %v2464_v7 = vmul.f32 %v2272_v22, %v544_v52  ;;  %v2274_v5 = vsub.f32 %v3649_v54, %v5701_v4  ;;  %3670 = vpow2.f32 %v1481_v29  ;;  %v5899_v11 = vld [vmem:[%s4056_s10 + $0x510] sm:$0xff]  ;;  %v5902_v22 = vld [vmem:[%s4056_s10 + $0x518] sm:$0xff] }
 0x192   : > { %v3653_v12 = vpop.eup %3652  ;;  %2846 = vst [vmem:[%s4303_s28 + $0x468] sm:$0xff] %v2654_v21  ;;  %v2465_v15 = vmul.f32 %v2273_v33, %v545_v19  ;;  %v2275_v17 = vsub.f32 %v3651_v38, %v5704_v47  ;;  %3672 = vpow2.f32 %v1483_v34  ;;  %v1485_v13 = vmul.f32 1.442695, %v1135_v51  ;;  %v757_v33 = vld [vmem:[%s6338_s1 + $0x520] sm:$0xff] }
 0x193   : > { %v3655_v41 = vpop.eup %3654  ;;  %2847 = vst [vmem:[%s4303_s28 + $0x470] sm:$0xff] %v2655_v46  ;;  %v2656_v57 = vadd.f32 %v2464_v7, %v5680_v8  ;;  %v2466_v3 = vmul.f32 %v2274_v5, %v546_v45  ;;  %v2276_v31 = vsub.f32 %v3653_v12, %v5707_v16  ;;  %v944_v18 = vsub.f32 0.0, %v752_v26  ;;  %v549_v51 = vld [vmem:[%s4251_s25 + $0x4a0] sm:$0xff] }
 0x194   : > { %v3657_v42 = vpop.eup %3656  ;;  %v2657_v44 = vadd.f32 %v2465_v15, %v5694_v48  ;;  %v2467_v43 = vmul.f32 %v2275_v17, %v547_v30  ;;  %v1702_v40 = vadd.f32 1.0, %v3655_v41  ;;  %3674 = vpow2.f32 %v1485_v13  ;;  %v5914_v15 = vld [vmem:[%s4056_s10 + $0x520] sm:$0xff]  ;;  %v758_v17 = vld [vmem:[%s6338_s1 + $0x528] sm:$0xff] }
 0x195   : > { %v3659_v9 = vpop.eup %3658  ;;  %2848 = vst [vmem:[%s4303_s28 + $0x478] sm:$0xff] %v2656_v57  ;;  %v2658_v8 = vadd.f32 %v2466_v3, %v5701_v4  ;;  %v2468_v1 = vmul.f32 %v2276_v31, %v548_v32  ;;  %v1703_v53 = vadd.f32 1.0, %v3657_v42  ;;  %v1136_v35 = vmul.f32 %v944_v18, %v5865_v28  ;;  %v755_v4 = vld [vmem:[%s6338_s1 + $0x510] sm:$0xff]  ;;  %v5923_v42 = vld [vmem:[%s4056_s10 + $0x528] sm:$0xff] }
 0x196   : > { %v3661_v48 = vpop.eup %3660  ;;  %2849 = vst [vmem:[%s4303_s28 + $0x480] sm:$0xff] %v2657_v44  ;;  %v2659_v29 = vadd.f32 %v2467_v43, %v5704_v47  ;;  %3676 = vrcp.f32 %v1702_v40  ;;  %v1704_v62 = vadd.f32 1.0, %v3659_v9  ;;  %v945_v37 = vsub.f32 0.0, %v753_v55  ;;  %v759_v3 = vld [vmem:[%s6338_s1 + $0x530] sm:$0xff]  ;;  %v760_v44 = vld [vmem:[%s6338_s1 + $0x538] sm:$0xff] }
 0x197   : > { %v3663_v34 = vpop.eup %3662  ;;  %2850 = vst [vmem:[%s4303_s28 + $0x488] sm:$0xff] %v2658_v8  ;;  %v2660_v63 = vadd.f32 %v2468_v1, %v5707_v16  ;;  %3678 = vrcp.f32 %v1703_v53  ;;  %v1705_v47 = vadd.f32 1.0, %v3661_v48  ;;  %v1487_v36 = vmul.f32 1.442695, %v1136_v35  ;;  %v5930_v1 = vld [vmem:[%s4056_s10 + $0x530] sm:$0xff]  ;;  %v5935_v53 = vld [vmem:[%s6338_s1 + $0x540] sm:$0xff] }
 0x198   : > { %v3665_v52 = vpop.eup %3664  ;;  %2851 = vst [vmem:[%s4303_s28 + $0x490] sm:$0xff] %v2659_v29  ;;  %3680 = vrcp.f32 %v1704_v62  ;;  %v1706_v61 = vadd.f32 1.0, %v3663_v34  ;;  %v1137_v23 = vmul.f32 %v945_v37, %v5878_v14  ;;  %v946_v49 = vsub.f32 0.0, %v754_v58  ;;  %v5939_v29 = vld [vmem:[%s4056_s10 + $0x538] sm:$0xff]  ;;  %v550_v37 = vld [vmem:[%s4251_s25 + $0x4a8] sm:$0xff] }
 0x199   : > { %v3667_v19 = vpop.eup %3666  ;;  %2852 = vst [vmem:[%s4303_s28 + $0x498] sm:$0xff] %v2660_v63  ;;  %3682 = vrcp.f32 %v1705_v47  ;;  %v1707_v16 = vadd.f32 1.0, %v3665_v52  ;;  %v947_v54 = vsub.f32 0.0, %v755_v4  ;;  %v948_v21 = vsub.f32 0.0, %v756_v24 }
 0x19a   : > { %v3669_v45 = vpop.eup %3668  ;;  %3684 = vrcp.f32 %v1706_v61  ;;  %v1708_v26 = vadd.f32 1.0, %v3667_v19  ;;  %v1489_v38 = vmul.f32 1.442695, %v1137_v23  ;;  %v1138_v46 = vmul.f32 %v946_v49, %v5894_v56  ;;  %v552_v49 = vld [vmem:[%s4251_s25 + $0x4b8] sm:$0xff] }
 0x19b   : > { %v3671_v7 = vpop.eup %3670  ;;  %v2277_v5 = vsub.f32 %v3669_v45, %v5737_v59  ;;  %3686 = vrcp.f32 %v1707_v16  ;;  %v1139_v30 = vmul.f32 %v947_v54, %v5899_v11  ;;  %v1140_v12 = vmul.f32 %v948_v21, %v5902_v22  ;;  %v553_v45 = vld [vmem:[%s4251_s25 + $0x4c0] sm:$0xff] }
 0x19c   : > { %v3673_v32 = vpop.eup %3672  ;;  %3688 = vrcp.f32 %v1708_v26  ;;  %v1709_v13 = vadd.f32 1.0, %v3671_v7  ;;  %v1491_v41 = vmul.f32 1.442695, %v1138_v46  ;;  %v949_v57 = vsub.f32 0.0, %v757_v33  ;;  %v554_v7 = vld [vmem:[%s4251_s25 + $0x4c8] sm:$0xff] }
 0x19d   : > { %v2469_v31 = vmul.f32 %v2277_v5, %v549_v51  ;;  %v1710_v18 = vadd.f32 1.0, %v3673_v32  ;;  %3690 = vpow2.f32 %v1487_v36  ;;  %v1493_v55 = vmul.f32 1.442695, %v1139_v30  ;;  %v551_v36 = vld [vmem:[%s4251_s25 + $0x4b0] sm:$0xff] }
 0x19e   : > { %v3675_v43 = vpop.eup %3674  ;;  %3692 = vrcp.f32 %v1709_v13  ;;  %v1495_v40 = vmul.f32 1.442695, %v1140_v12  ;;  %v1141_v9 = vmul.f32 %v949_v57, %v5914_v15  ;;  %v950_v8 = vsub.f32 0.0, %v758_v17  ;;  %v555_v13 = vld [vmem:[%s4251_s25 + $0x4d0] sm:$0xff] }
 0x19f   : > { %v2661_v35 = vadd.f32 %v2469_v31, %v5737_v59  ;;  %3694 = vrcp.f32 %v1710_v18  ;;  %v1711_v58 = vadd.f32 1.0, %v3675_v43  ;;  %v951_v48 = vsub.f32 0.0, %v759_v3  ;;  %v556_v18 = vld [vmem:[%s4251_s25 + $0x4d8] sm:$0xff] }
 0x1a0   : > { %v3677_v62 = vpop.eup %3676  ;;  %3696 = vpow2.f32 %v1489_v38  ;;  %v1497_v4 = vmul.f32 1.442695, %v1141_v9  ;;  %v1142_v24 = vmul.f32 %v950_v8, %v5923_v42  ;;  %v952_v34 = vsub.f32 0.0, %v760_v44 }
 0x1a1   : > { %v3679_v63 = vpop.eup %3678  ;;  %2853 = vst [vmem:[%s4303_s28 + $0x4a0] sm:$0xff] %v2661_v35  ;;  %v2278_v47 = vsub.f32 %v3677_v62, %v5754_v50  ;;  %3698 = vrcp.f32 %v1711_v58  ;;  %v1143_v59 = vmul.f32 %v951_v48, %v5930_v1  ;;  %v953_v52 = vsub.f32 0.0, %v5935_v53  ;;  %v557_v35 = vld [vmem:[%s4251_s25 + $0x4e0] sm:$0xff] }
 0x1a2   : > { %v3681_v61 = vpop.eup %3680  ;;  %v2279_v23 = vsub.f32 %v3679_v63, %v5770_v39  ;;  %3700 = vpow2.f32 %v1491_v41  ;;  %v1499_v19 = vmul.f32 1.442695, %v1142_v24  ;;  %v1144_v16 = vmul.f32 %v952_v34, %v5939_v29  ;;  %v5979_v34 = vld [vmem:[%s4056_s10 + $0x548] sm:$0xff] }
 0x1a3   : > { %v3683_v54 = vpop.eup %3682  ;;  %v2470_v21 = vmul.f32 %v2278_v47, %v550_v37  ;;  %v2280_v33 = vsub.f32 %v3681_v61, %v5779_v0  ;;  %3702 = vpow2.f32 %v1493_v55  ;;  %v1501_v51 = vmul.f32 1.442695, %v1143_v59  ;;  %v5962_v55 = vld [vmem:[%s4056_s10 + $0x540] sm:$0xff]  ;;  %v764_v59 = vld [vmem:[%s6338_s1 + $0x558] sm:$0xff] }
 0x1a4   : > { %v3685_v26 = vpop.eup %3684  ;;  %v2471_v38 = vmul.f32 %v2279_v23, %v551_v36  ;;  %v2281_v46 = vsub.f32 %v3683_v54, %v5784_v6  ;;  %3704 = vpow2.f32 %v1495_v40  ;;  %v1503_v5 = vmul.f32 1.442695, %v1144_v16 }
 0x1a5   : > { %v3687_v30 = vpop.eup %3686  ;;  %v2662_v12 = vadd.f32 %v2470_v21, %v5754_v50  ;;  %v2472_v17 = vmul.f32 %v2280_v33, %v552_v49  ;;  %v2282_v32 = vsub.f32 %v3685_v26, %v5797_v10  ;;  %3706 = vpow2.f32 %v1497_v4  ;;  %v558_v4 = vld [vmem:[%s4251_s25 + $0x4e8] sm:$0xff]  ;;  %v559_v49 = vld [vmem:[%s4251_s25 + $0x4f0] sm:$0xff] }
 0x1a6   : > { %v3689_v41 = vpop.eup %3688  ;;  %v2663_v57 = vadd.f32 %v2471_v38, %v5770_v39  ;;  %v2473_v3 = vmul.f32 %v2281_v46, %v553_v45  ;;  %v2283_v31 = vsub.f32 %v3687_v30, %v5807_v60  ;;  %3708 = vpow2.f32 %v1499_v19  ;;  %v762_v39 = vld [vmem:[%s6338_s1 + $0x548] sm:$0xff]  ;;  %v5997_v45 = vld [vmem:[%s4056_s10 + $0x550] sm:$0xff]  ;;  %v6002_v46 = vld [vmem:[%s4056_s10 + $0x558] sm:$0xff] }
 0x1a7   : > { %v3691_v44 = vpop.eup %3690  ;;  %2854 = vst [vmem:[%s4303_s28 + $0x4a8] sm:$0xff] %v2662_v12  ;;  %v2664_v50 = vadd.f32 %v2472_v17, %v5779_v0  ;;  %v2474_v43 = vmul.f32 %v2282_v32, %v554_v7  ;;  %v2284_v40 = vsub.f32 %v3689_v41, %v5818_v20  ;;  %3710 = vpow2.f32 %v1501_v51  ;;  %v765_v32 = vld [vmem:[%s6338_s1 + $0x560] sm:$0xff] }
 0x1a8   : > { %v3693_v9 = vpop.eup %3692  ;;  %2855 = vst [vmem:[%s4303_s28 + $0x4b0] sm:$0xff] %v2663_v57  ;;  %v2665_v8 = vadd.f32 %v2473_v3, %v5784_v6  ;;  %v2475_v53 = vmul.f32 %v2283_v31, %v555_v13  ;;  %v1712_v58 = vadd.f32 1.0, %v3691_v44  ;;  %3712 = vpow2.f32 %v1503_v5  ;;  %v763_v6 = vld [vmem:[%s6338_s1 + $0x550] sm:$0xff] }
 0x1a9   : > { %v3695_v0 = vpop.eup %3694  ;;  %2856 = vst [vmem:[%s4303_s28 + $0x4b8] sm:$0xff] %v2664_v50  ;;  %v2666_v48 = vadd.f32 %v2474_v43, %v5797_v10  ;;  %v2476_v62 = vmul.f32 %v2284_v40, %v556_v18  ;;  %v2285_v37 = vsub.f32 %v3693_v9, %v5821_v25  ;;  %v1145_v24 = vmul.f32 %v953_v52, %v5962_v55  ;;  %v6017_v50 = vld [vmem:[%s4056_s10 + $0x560] sm:$0xff]  ;;  %v6020_v43 = vld [vmem:[%s4056_s10 + $0x568] sm:$0xff]  ;;  %v767_v40 = vld [vmem:[%s6338_s1 + $0x570] sm:$0xff] }
 0x1aa   : > { %v3697_v63 = vpop.eup %3696  ;;  %2857 = vst [vmem:[%s4303_s28 + $0x4c0] sm:$0xff] %v2665_v8  ;;  %v2667_v47 = vadd.f32 %v2475_v53, %v5807_v60  ;;  %v2286_v10 = vsub.f32 %v3695_v0, %v5825_v2  ;;  %3714 = vrcp.f32 %v1712_v58  ;;  %v954_v36 = vsub.f32 0.0, %v762_v39  ;;  %v768_v53 = vld [vmem:[%s6338_s1 + $0x578] sm:$0xff] }
 0x1ab   : > { %v3699_v52 = vpop.eup %3698  ;;  %2858 = vst [vmem:[%s4303_s28 + $0x4c8] sm:$0xff] %v2666_v48  ;;  %v2668_v61 = vadd.f32 %v2476_v62, %v5818_v20  ;;  %v2477_v23 = vmul.f32 %v2285_v37, %v557_v35  ;;  %v1713_v19 = vadd.f32 1.0, %v3697_v63  ;;  %v1505_v16 = vmul.f32 1.442695, %v1145_v24  ;;  %v769_v35 = vld [vmem:[%s6338_s1 + $0x580] sm:$0xff]  ;;  %v6033_v37 = vld [vmem:[%s4056_s10 + $0x570] sm:$0xff] }
 0x1ac   : > { %v3701_v60 = vpop.eup %3700  ;;  %2859 = vst [vmem:[%s4303_s28 + $0x4d0] sm:$0xff] %v2667_v47  ;;  %v2478_v54 = vmul.f32 %v2286_v10, %v558_v4  ;;  %v2287_v21 = vsub.f32 %v3699_v52, %v5842_v27  ;;  %v1146_v33 = vmul.f32 %v954_v36, %v5979_v34  ;;  %v955_v51 = vsub.f32 0.0, %v763_v6  ;;  %v6037_v63 = vld [vmem:[%s4056_s10 + $0x578] sm:$0xff]  ;;  %v6040_v47 = vld [vmem:[%s4056_s10 + $0x580] sm:$0xff] }
 0x1ad   : > { %v3703_v26 = vpop.eup %3702  ;;  %2860 = vst [vmem:[%s4303_s28 + $0x4d8] sm:$0xff] %v2668_v61  ;;  %v2669_v20 = vadd.f32 %v2477_v23, %v5821_v25  ;;  %3716 = vrcp.f32 %v1713_v19  ;;  %v1714_v38 = vadd.f32 1.0, %v3701_v60  ;;  %v956_v7 = vsub.f32 0.0, %v764_v59  ;;  %v560_v36 = vld [vmem:[%s4251_s25 + $0x4f8] sm:$0xff]  ;;  %v770_v23 = vld [vmem:[%s6338_s1 + $0x588] sm:$0xff] }
 0x1ae   : > { %v3705_v5 = vpop.eup %3704  ;;  %v2670_v30 = vadd.f32 %v2478_v54, %v5825_v2  ;;  %v2479_v12 = vmul.f32 %v2287_v21, %v559_v49  ;;  %v1715_v17 = vadd.f32 1.0, %v3703_v26  ;;  %3718 = vpow2.f32 %v1505_v16  ;;  %v766_v2 = vld [vmem:[%s6338_s1 + $0x568] sm:$0xff] }
 0x1af   : > { %v3707_v13 = vpop.eup %3706  ;;  %2861 = vst [vmem:[%s4303_s28 + $0x4e0] sm:$0xff] %v2669_v20  ;;  %3720 = vrcp.f32 %v1714_v38  ;;  %v1716_v25 = vadd.f32 1.0, %v3705_v5  ;;  %v1507_v41 = vmul.f32 1.442695, %v1146_v33  ;;  %v1147_v57 = vmul.f32 %v955_v51, %v5997_v45  ;;  %v6052_v33 = vld [vmem:[%s4056_s10 + $0x588] sm:$0xff]  ;;  %v561_v20 = vld [vmem:[%s4251_s25 + $0x500] sm:$0xff] }
 0x1b0   : > { %v3709_v3 = vpop.eup %3708  ;;  %2862 = vst [vmem:[%s4303_s28 + $0x4e8] sm:$0xff] %v2670_v30  ;;  %v2671_v31 = vadd.f32 %v2479_v12, %v5842_v27  ;;  %3722 = vrcp.f32 %v1715_v17  ;;  %v1717_v18 = vadd.f32 1.0, %v3707_v13  ;;  %v1148_v44 = vmul.f32 %v956_v7, %v6002_v46  ;;  %v771_v5 = vld [vmem:[%s6338_s1 + $0x590] sm:$0xff]  ;;  %v772_v13 = vld [vmem:[%s6338_s1 + $0x598] sm:$0xff] }
 0x1b1   : > { %v3711_v39 = vpop.eup %3710  ;;  %3724 = vrcp.f32 %v1716_v25  ;;  %v1718_v9 = vadd.f32 1.0, %v3709_v3  ;;  %v1509_v8 = vmul.f32 1.442695, %v1147_v57  ;;  %v957_v27 = vsub.f32 0.0, %v765_v32  ;;  %v562_v57 = vld [vmem:[%s4251_s25 + $0x508] sm:$0xff] }
 0x1b2   : > { %v3713_v58 = vpop.eup %3712  ;;  %2863 = vst [vmem:[%s4303_s28 + $0x4f0] sm:$0xff] %v2671_v31  ;;  %3726 = vrcp.f32 %v1717_v18  ;;  %v1719_v0 = vadd.f32 1.0, %v3711_v39  ;;  %v1511_v48 = vmul.f32 1.442695, %v1148_v44  ;;  %v958_v62 = vsub.f32 0.0, %v766_v2  ;;  %v6068_v39 = vld [vmem:[%s4056_s10 + $0x590] sm:$0xff] }
 0x1b3   : > { %3728 = vrcp.f32 %v1718_v9  ;;  %v1720_v4 = vadd.f32 1.0, %v3713_v58  ;;  %v1149_v24 = vmul.f32 %v957_v27, %v6017_v50  ;;  %v959_v6 = vsub.f32 0.0, %v767_v40  ;;  %v563_v40 = vld [vmem:[%s4251_s25 + $0x510] sm:$0xff]  ;;  %v564_v27 = vld [vmem:[%s4251_s25 + $0x518] sm:$0xff] }
 0x1b4   : > { %v3715_v10 = vpop.eup %3714  ;;  %3730 = vrcp.f32 %v1719_v0  ;;  %v1150_v59 = vmul.f32 %v958_v62, %v6020_v43  ;;  %v960_v52 = vsub.f32 0.0, %v768_v53  ;;  %v961_v61 = vsub.f32 0.0, %v769_v35 }
 0x1b5   : > { %v2288_v49 = vsub.f32 %v3715_v10, %v5865_v28  ;;  %3732 = vrcp.f32 %v1720_v4  ;;  %v1513_v19 = vmul.f32 1.442695, %v1149_v24  ;;  %v1151_v16 = vmul.f32 %v959_v6, %v6033_v37  ;;  %v565_v4 = vld [vmem:[%s4251_s25 + $0x520] sm:$0xff] }
 0x1b6   : > { %3734 = vpow2.f32 %v1507_v41  ;;  %v1515_v60 = vmul.f32 1.442695, %v1150_v59  ;;  %v1152_v54 = vmul.f32 %v960_v52, %v6037_v63  ;;  %v1153_v21 = vmul.f32 %v961_v61, %v6040_v47 }
 0x1b7   : > { %v3717_v51 = vpop.eup %3716  ;;  %v2480_v26 = vmul.f32 %v2288_v49, %v560_v36  ;;  %3736 = vpow2.f32 %v1509_v8  ;;  %v1517_v38 = vmul.f32 1.442695, %v1151_v16  ;;  %v962_v7 = vsub.f32 0.0, %v770_v23  ;;  %v566_v36 = vld [vmem:[%s4251_s25 + $0x528] sm:$0xff]  ;;  %v567_v49 = vld [vmem:[%s4251_s25 + $0x530] sm:$0xff] }
 0x1b8   : > { %v3719_v30 = vpop.eup %3718  ;;  %v2289_v12 = vsub.f32 %v3717_v51, %v5878_v14  ;;  %3738 = vpow2.f32 %v1511_v48  ;;  %v1519_v17 = vmul.f32 1.442695, %v1152_v54  ;;  %v1521_v32 = vmul.f32 1.442695, %v1153_v21  ;;  %v568_v51 = vld [vmem:[%s4251_s25 + $0x538] sm:$0xff] }
 0x1b9   : > { %v3721_v25 = vpop.eup %3720  ;;  %v2672_v41 = vadd.f32 %v2480_v26, %v5865_v28  ;;  %v1721_v2 = vadd.f32 1.0, %v3719_v30  ;;  %3740 = vpow2.f32 %v1513_v19  ;;  %v1154_v3 = vmul.f32 %v962_v7, %v6052_v33  ;;  %v6084_v19 = vld [vmem:[%s4056_s10 + $0x598] sm:$0xff] }
 0x1ba   : > { %v3723_v31 = vpop.eup %3722  ;;  %v2481_v18 = vmul.f32 %v2289_v12, %v561_v20  ;;  %v2290_v44 = vsub.f32 %v3721_v25, %v5894_v56  ;;  %3742 = vpow2.f32 %v1515_v60  ;;  %v963_v9 = vsub.f32 0.0, %v771_v5 }
 0x1bb   : > { %v3725_v8 = vpop.eup %3724  ;;  %2864 = vst [vmem:[%s4303_s28 + $0x4f8] sm:$0xff] %v2672_v41  ;;  %v2291_v28 = vsub.f32 %v3723_v31, %v5899_v11  ;;  %3744 = vrcp.f32 %v1721_v2  ;;  %v1523_v53 = vmul.f32 1.442695, %v1154_v3  ;;  %v964_v35 = vsub.f32 0.0, %v772_v13 }
 0x1bc   : > { %v3727_v58 = vpop.eup %3726  ;;  %v2673_v0 = vadd.f32 %v2481_v18, %v5878_v14  ;;  %v2482_v48 = vmul.f32 %v2290_v44, %v562_v57  ;;  %v2292_v62 = vsub.f32 %v3725_v8, %v5902_v22  ;;  %3746 = vpow2.f32 %v1517_v38  ;;  %v775_v57 = vld [vmem:[%s6338_s1 + $0x5b0] sm:$0xff]  ;;  %v6109_v18 = vld [vmem:[%s4056_s10 + $0x5a0] sm:$0xff]  ;;  %v776_v44 = vld [vmem:[%s6338_s1 + $0x5b8] sm:$0xff] }
 0x1bd   : > { %v3729_v24 = vpop.eup %3728  ;;  %v2483_v6 = vmul.f32 %v2291_v28, %v563_v40  ;;  %v2293_v10 = vsub.f32 %v3727_v58, %v5914_v15  ;;  %3748 = vpow2.f32 %v1519_v17  ;;  %v1155_v59 = vmul.f32 %v963_v9, %v6068_v39 }
 0x1be   : > { %v3731_v52 = vpop.eup %3730  ;;  %2865 = vst [vmem:[%s4303_s28 + $0x500] sm:$0xff] %v2673_v0  ;;  %v2674_v14 = vadd.f32 %v2482_v48, %v5894_v56  ;;  %v2484_v61 = vmul.f32 %v2292_v62, %v564_v27  ;;  %v2294_v23 = vsub.f32 %v3729_v24, %v5923_v42  ;;  %3750 = vpow2.f32 %v1521_v32  ;;  %v773_v32 = vld [vmem:[%s6338_s1 + $0x5a0] sm:$0xff]  ;;  %v6117_v27 = vld [vmem:[%s4056_s10 + $0x5a8] sm:$0xff] }
 0x1bf   : > { %v3733_v16 = vpop.eup %3732  ;;  %v2675_v60 = vadd.f32 %v2483_v6, %v5899_v11  ;;  %v2485_v54 = vmul.f32 %v2293_v10, %v565_v4  ;;  %v2295_v21 = vsub.f32 %v3731_v52, %v5930_v1  ;;  %3752 = vpow2.f32 %v1523_v53  ;;  %v6130_v52 = vld [vmem:[%s4056_s10 + $0x5b8] sm:$0xff] }
 0x1c0   : > { %v3735_v26 = vpop.eup %3734  ;;  %2866 = vst [vmem:[%s4303_s28 + $0x508] sm:$0xff] %v2674_v14  ;;  %v2676_v56 = vadd.f32 %v2484_v61, %v5902_v22  ;;  %v2486_v20 = vmul.f32 %v2294_v23, %v566_v36  ;;  %v2296_v38 = vsub.f32 %v3733_v16, %v5939_v29  ;;  %v1525_v7 = vmul.f32 1.442695, %v1155_v59  ;;  %v777_v14 = vld [vmem:[%s6338_s1 + $0x5c0] sm:$0xff] }
 0x1c1   : > { %v3737_v5 = vpop.eup %3736  ;;  %2867 = vst [vmem:[%s4303_s28 + $0x510] sm:$0xff] %v2675_v60  ;;  %v2677_v30 = vadd.f32 %v2485_v54, %v5914_v15  ;;  %v2487_v11 = vmul.f32 %v2295_v21, %v567_v49  ;;  %v1722_v12 = vadd.f32 1.0, %v3735_v26  ;;  %v1156_v17 = vmul.f32 %v964_v35, %v6084_v19  ;;  %v774_v15 = vld [vmem:[%s6338_s1 + $0x5a8] sm:$0xff]  ;;  %v569_v35 = vld [vmem:[%s4251_s25 + $0x540] sm:$0xff]  ;;  %v779_v54 = vld [vmem:[%s6338_s1 + $0x5d0] sm:$0xff] }
 0x1c2   : > { %v3739_v13 = vpop.eup %3738  ;;  %2868 = vst [vmem:[%s4303_s28 + $0x518] sm:$0xff] %v2676_v56  ;;  %v2678_v22 = vadd.f32 %v2486_v20, %v5923_v42  ;;  %v2488_v25 = vmul.f32 %v2296_v38, %v568_v51  ;;  %v1723_v41 = vadd.f32 1.0, %v3737_v5  ;;  %3754 = vpow2.f32 %v1525_v7  ;;  %v778_v60 = vld [vmem:[%s6338_s1 + $0x5c8] sm:$0xff]  ;;  %v780_v21 = vld [vmem:[%s6338_s1 + $0x5d8] sm:$0xff]  ;;  %v6147_v38 = vld [vmem:[%s6338_s1 + $0x5e0] sm:$0xff] }
 0x1c3   : > { %v3741_v2 = vpop.eup %3740  ;;  %2869 = vst [vmem:[%s4303_s28 + $0x520] sm:$0xff] %v2677_v30  ;;  %v2679_v3 = vadd.f32 %v2487_v11, %v5930_v1  ;;  %3756 = vrcp.f32 %v1722_v12  ;;  %v1724_v42 = vadd.f32 1.0, %v3739_v13  ;;  %v1527_v31 = vmul.f32 1.442695, %v1156_v17  ;;  %v6120_v1 = vld [vmem:[%s4056_s10 + $0x5b0] sm:$0xff]  ;;  %v6152_v11 = vld [vmem:[%s4056_s10 + $0x5c0] sm:$0xff] }
 0x1c4   : > { %v3743_v40 = vpop.eup %3742  ;;  %2870 = vst [vmem:[%s4303_s28 + $0x528] sm:$0xff] %v2678_v22  ;;  %v2680_v9 = vadd.f32 %v2488_v25, %v5939_v29  ;;  %3758 = vrcp.f32 %v1723_v41  ;;  %v1725_v8 = vadd.f32 1.0, %v3741_v2  ;;  %v965_v28 = vsub.f32 0.0, %v773_v32  ;;  %v6155_v12 = vld [vmem:[%s4056_s10 + $0x5c8] sm:$0xff]  ;;  %v6158_v13 = vld [vmem:[%s4056_s10 + $0x5d0] sm:$0xff]  ;;  %v6161_v25 = vld [vmem:[%s4056_s10 + $0x5d8] sm:$0xff] }
 0x1c5   : > { %v3745_v53 = vpop.eup %3744  ;;  %2871 = vst [vmem:[%s4303_s28 + $0x530] sm:$0xff] %v2679_v3  ;;  %3760 = vrcp.f32 %v1724_v42  ;;  %v1726_v58 = vadd.f32 1.0, %v3743_v40  ;;  %v966_v0 = vsub.f32 0.0, %v774_v15  ;;  %v967_v48 = vsub.f32 0.0, %v775_v57  ;;  %v570_v3 = vld [vmem:[%s4251_s25 + $0x548] sm:$0xff] }
 0x1c6   : > { %v3747_v62 = vpop.eup %3746  ;;  %2872 = vst [vmem:[%s4303_s28 + $0x538] sm:$0xff] %v2680_v9  ;;  %v2297_v4 = vsub.f32 %v3745_v53, %v5962_v55  ;;  %3762 = vrcp.f32 %v1725_v8  ;;  %v1157_v29 = vmul.f32 %v965_v28, %v6109_v18  ;;  %v968_v24 = vsub.f32 0.0, %v776_v44  ;;  %v571_v8 = vld [vmem:[%s4251_s25 + $0x550] sm:$0xff] }
 0x1c7   : > { %v3749_v6 = vpop.eup %3748  ;;  %3764 = vrcp.f32 %v1726_v58  ;;  %v1727_v10 = vadd.f32 1.0, %v3747_v62  ;;  %v1158_v36 = vmul.f32 %v966_v0, %v6117_v27  ;;  %v1159_v59 = vmul.f32 %v967_v48, %v6120_v1  ;;  %v572_v0 = vld [vmem:[%s4251_s25 + $0x558] sm:$0xff] }
 0x1c8   : > { %v3751_v61 = vpop.eup %3750  ;;  %v2489_v23 = vmul.f32 %v2297_v4, %v569_v35  ;;  %v1728_v49 = vadd.f32 1.0, %v3749_v6  ;;  %3766 = vpow2.f32 %v1527_v31  ;;  %v1529_v16 = vmul.f32 1.442695, %v1157_v29  ;;  %v573_v6 = vld [vmem:[%s4251_s25 + $0x560] sm:$0xff] }
 0x1c9   : > { %v3753_v51 = vpop.eup %3752  ;;  %3768 = vrcp.f32 %v1727_v10  ;;  %v1729_v26 = vadd.f32 1.0, %v3751_v61  ;;  %v1531_v56 = vmul.f32 1.442695, %v1158_v36  ;;  %v1533_v20 = vmul.f32 1.442695, %v1159_v59  ;;  %v574_v61 = vld [vmem:[%s4251_s25 + $0x568] sm:$0xff] }
 0x1ca   : > { %v2681_v7 = vadd.f32 %v2489_v23, %v5962_v55  ;;  %3770 = vrcp.f32 %v1728_v49  ;;  %v1730_v5 = vadd.f32 1.0, %v3753_v51  ;;  %v1160_v30 = vmul.f32 %v968_v24, %v6130_v52 }
 0x1cb   : > { %3772 = vrcp.f32 %v1729_v26  ;;  %v969_v17 = vsub.f32 0.0, %v777_v14  ;;  %v970_v32 = vsub.f32 0.0, %v778_v60  ;;  %v971_v22 = vsub.f32 0.0, %v779_v54 }
 0x1cc   : > { %v3755_v41 = vpop.eup %3754  ;;  %2873 = vst [vmem:[%s4303_s28 + $0x540] sm:$0xff] %v2681_v7  ;;  %3774 = vrcp.f32 %v1730_v5  ;;  %v1535_v55 = vmul.f32 1.442695, %v1160_v30  ;;  %v972_v15 = vsub.f32 0.0, %v780_v21  ;;  %v973_v57 = vsub.f32 0.0, %v6147_v38  ;;  %v6181_v21 = vld [vmem:[%s4056_s10 + $0x5e0] sm:$0xff] }
 0x1cd   : > { %v3757_v2 = vpop.eup %3756  ;;  %v1731_v42 = vadd.f32 1.0, %v3755_v41  ;;  %3776 = vpow2.f32 %v1529_v16  ;;  %v1161_v31 = vmul.f32 %v969_v17, %v6152_v11  ;;  %v1162_v44 = vmul.f32 %v970_v32, %v6155_v12  ;;  %v576_v17 = vld [vmem:[%s4251_s25 + $0x578] sm:$0xff] }
 0x1ce   : > { %v3759_v40 = vpop.eup %3758  ;;  %v2298_v9 = vsub.f32 %v3757_v2, %v5979_v34  ;;  %3778 = vpow2.f32 %v1531_v56  ;;  %v1163_v28 = vmul.f32 %v971_v22, %v6158_v13  ;;  %v1164_v53 = vmul.f32 %v972_v15, %v6161_v25  ;;  %v783_v15 = vld [vmem:[%s6338_s1 + $0x5f0] sm:$0xff] }
 0x1cf   : > { %v3761_v35 = vpop.eup %3760  ;;  %v2299_v58 = vsub.f32 %v3759_v40, %v5997_v45  ;;  %3780 = vrcp.f32 %v1731_v42  ;;  %v1537_v48 = vmul.f32 1.442695, %v1161_v31  ;;  %v1539_v62 = vmul.f32 1.442695, %v1162_v44 }
 0x1d0   : > { %v3763_v4 = vpop.eup %3762  ;;  %v2490_v29 = vmul.f32 %v2298_v9, %v570_v3  ;;  %v2300_v24 = vsub.f32 %v3761_v35, %v6002_v46  ;;  %3782 = vpow2.f32 %v1533_v20  ;;  %v1541_v10 = vmul.f32 1.442695, %v1163_v28  ;;  %v575_v20 = vld [vmem:[%s4251_s25 + $0x570] sm:$0xff] }
 0x1d1   : > { %v3765_v36 = vpop.eup %3764  ;;  %v2491_v59 = vmul.f32 %v2299_v58, %v571_v8  ;;  %v2301_v14 = vsub.f32 %v3763_v4, %v6017_v50  ;;  %3784 = vpow2.f32 %v1535_v55  ;;  %v1543_v23 = vmul.f32 1.442695, %v1164_v53  ;;  %v577_v55 = vld [vmem:[%s4251_s25 + $0x580] sm:$0xff]  ;;  %v6207_v8 = vld [vmem:[%s4056_s10 + $0x5e8] sm:$0xff] }
 0x1d2   : > { %v3767_v49 = vpop.eup %3766  ;;  %v2682_v16 = vadd.f32 %v2490_v29, %v5979_v34  ;;  %v2492_v60 = vmul.f32 %v2300_v24, %v572_v0  ;;  %v2302_v54 = vsub.f32 %v3765_v36, %v6020_v43  ;;  %3786 = vpow2.f32 %v1537_v48  ;;  %v579_v29 = vld [vmem:[%s4251_s25 + $0x590] sm:$0xff] }
 0x1d3   : > { %v3769_v51 = vpop.eup %3768  ;;  %v2683_v26 = vadd.f32 %v2491_v59, %v5997_v45  ;;  %v2493_v56 = vmul.f32 %v2301_v14, %v573_v6  ;;  %v1732_v38 = vadd.f32 1.0, %v3767_v49  ;;  %3788 = vpow2.f32 %v1539_v62  ;;  %v782_v45 = vld [vmem:[%s6338_s1 + $0x5e8] sm:$0xff]  ;;  %v6214_v6 = vld [vmem:[%s4056_s10 + $0x5f0] sm:$0xff]  ;;  %v6226_v49 = vld [vmem:[%s4056_s10 + $0x5f8] sm:$0xff]  ;;  %s3009_s10 = smul.u32 24576, %s3973_s16  ;;  %s2898_s16 = scalar_lea.sflag [#allocation4], %s4050_s5 }
 0x1d4   : > { %v3771_v7 = vpop.eup %3770  ;;  %2874 = vst [vmem:[%s4303_s28 + $0x548] sm:$0xff] %v2682_v16  ;;  %v2684_v34 = vadd.f32 %v2492_v60, %v6002_v46  ;;  %v2494_v5 = vmul.f32 %v2302_v54, %v574_v61  ;;  %v2303_v30 = vsub.f32 %v3769_v51, %v6033_v37  ;;  %3790 = vpow2.f32 %v1541_v10  ;;  %v784_v10 = vld [vmem:[%s6338_s1 + $0x5f8] sm:$0xff] }
 0x1d5   : > { %v3773_v32 = vpop.eup %3772  ;;  %2875 = vst [vmem:[%s4303_s28 + $0x550] sm:$0xff] %v2683_v26  ;;  %v2685_v22 = vadd.f32 %v2493_v56, %v6017_v50  ;;  %v2304_v41 = vsub.f32 %v3771_v7, %v6037_v63  ;;  %3792 = vrcp.f32 %v1732_v38  ;;  %v1165_v46 = vmul.f32 %v973_v57, %v6181_v21  ;;  %v578_v50 = vld [vmem:[%s4251_s25 + $0x588] sm:$0xff]  ;;  %s6288_s27 = scalar_lea.hbm %s6340_s3, %s3009_s10 }
 0x1d6   : > { %v3775_v2 = vpop.eup %3774  ;;  %2876 = vst [vmem:[%s4303_s28 + $0x558] sm:$0xff] %v2684_v34  ;;  %v2686_v3 = vadd.f32 %v2494_v5, %v6020_v43  ;;  %v2495_v42 = vmul.f32 %v2303_v30, %v575_v20  ;;  %v2305_v31 = vsub.f32 %v3773_v32, %v6040_v47  ;;  %3794 = vpow2.f32 %v1543_v23  ;;  %v580_v30 = vld [vmem:[%s4251_s25 + $0x598] sm:$0xff] }
 0x1d7   : > { %v3777_v44 = vpop.eup %3776  ;;  %2877 = vst [vmem:[%s4303_s28 + $0x560] sm:$0xff] %v2685_v22  ;;  %v2496_v40 = vmul.f32 %v2304_v41, %v576_v17  ;;  %v2306_v57 = vsub.f32 %v3775_v2, %v6052_v33  ;;  %v1545_v9 = vmul.f32 1.442695, %v1165_v46  ;;  %v974_v28 = vsub.f32 0.0, %v782_v45 }
 0x1d8   : > { %v3779_v53 = vpop.eup %3778  ;;  %2878 = vst [vmem:[%s4303_s28 + $0x568] sm:$0xff] %v2686_v3  ;;  %v2687_v43 = vadd.f32 %v2495_v42, %v6033_v37  ;;  %v2497_v35 = vmul.f32 %v2305_v31, %v577_v55  ;;  %v1733_v58 = vadd.f32 1.0, %v3777_v44  ;;  %v975_v0 = vsub.f32 0.0, %v783_v15  ;;  %v581_v3 = vld [vmem:[%s4251_s25 + $0x5a0] sm:$0xff]  ;;  %v582_v44 = vld [vmem:[%s4251_s25 + $0x5a8] sm:$0xff] }
 0x1d9   : > { %v3781_v48 = vpop.eup %3780  ;;  %v2688_v62 = vadd.f32 %v2496_v40, %v6037_v63  ;;  %v2498_v4 = vmul.f32 %v2306_v57, %v578_v50  ;;  %v1734_v24 = vadd.f32 1.0, %v3779_v53  ;;  %3796 = vpow2.f32 %v1545_v9 }
 0x1da   : > { %v3783_v37 = vpop.eup %3782  ;;  %2879 = vst [vmem:[%s4303_s28 + $0x570] sm:$0xff] %v2687_v43  ;;  %v2689_v36 = vadd.f32 %v2497_v35, %v6040_v47  ;;  %v2307_v59 = vsub.f32 %v3781_v48, %v6068_v39  ;;  %3798 = vrcp.f32 %v1733_v58  ;;  %v1166_v63 = vmul.f32 %v974_v28, %v6207_v8  ;;  %v583_v28 = vld [vmem:[%s4251_s25 + $0x5b0] sm:$0xff]  ;;  %v584_v35 = vld [vmem:[%s4251_s25 + $0x5b8] sm:$0xff] }
 0x1db   : > { %v3785_v14 = vpop.eup %3784  ;;  %2880 = vst [vmem:[%s4303_s28 + $0x578] sm:$0xff] %v2688_v62  ;;  %v2690_v61 = vadd.f32 %v2498_v4, %v6052_v33  ;;  %3800 = vrcp.f32 %v1734_v24  ;;  %v1735_v23 = vadd.f32 1.0, %v3783_v37  ;;  %v1167_v47 = vmul.f32 %v975_v0, %v6214_v6  ;;  %v585_v62 = vld [vmem:[%s4251_s25 + $0x5c0] sm:$0xff]  ;;  %v586_v37 = vld [vmem:[%s4251_s25 + $0x5c8] sm:$0xff] }
 0x1dc   : > { %v3787_v16 = vpop.eup %3786  ;;  %2881 = vst [vmem:[%s4303_s28 + $0x580] sm:$0xff] %v2689_v36  ;;  %v2499_v60 = vmul.f32 %v2307_v59, %v579_v29  ;;  %v1736_v54 = vadd.f32 1.0, %v3785_v14  ;;  %v976_v51 = vsub.f32 0.0, %v784_v10  ;;  %v1547_v20 = vmul.f32 1.442695, %v1166_v63  ;;  %v587_v14 = vld [vmem:[%s4251_s25 + $0x5d0] sm:$0xff] }
 0x1dd   : > { %v3789_v26 = vpop.eup %3788  ;;  %2882 = vst [vmem:[%s4303_s28 + $0x588] sm:$0xff] %v2690_v61  ;;  %3802 = vrcp.f32 %v1735_v23  ;;  %v1737_v56 = vadd.f32 1.0, %v3787_v16  ;;  %v1549_v22 = vmul.f32 1.442695, %v1167_v47  ;;  %v588_v47 = vld [vmem:[%s4251_s25 + $0x5d8] sm:$0xff] }
 0x1de   : > { %v3791_v38 = vpop.eup %3790  ;;  %v2691_v33 = vadd.f32 %v2499_v60, %v6068_v39  ;;  %3804 = vrcp.f32 %v1736_v54  ;;  %v1738_v7 = vadd.f32 1.0, %v3789_v26  ;;  %v1168_v34 = vmul.f32 %v976_v51, %v6226_v49 }
 0x1df   : > { %v3793_v5 = vpop.eup %3792  ;;  %3806 = vrcp.f32 %v1737_v56  ;;  %v1739_v17 = vadd.f32 1.0, %v3791_v38 }
 0x1e0   : > { %v3795_v45 = vpop.eup %3794  ;;  %2883 = vst [vmem:[%s4303_s28 + $0x590] sm:$0xff] %v2691_v33  ;;  %v2308_v32 = vsub.f32 %v3793_v5, %v6084_v19  ;;  %3808 = vrcp.f32 %v1738_v7  ;;  %v1551_v39 = vmul.f32 1.442695, %v1168_v34 }
 0x1e1   : > { %3810 = vrcp.f32 %v1739_v17  ;;  %v1740_v41 = vadd.f32 1.0, %v3795_v45 }
 0x1e2   : > { %v2500_v55 = vmul.f32 %v2308_v32, %v580_v30  ;;  %3812 = vpow2.f32 %v1547_v20  ;;  %v589_v30 = vld [vmem:[%s4251_s25 + $0x5e0] sm:$0xff] }
 0x1e3   : > { %v3797_v46 = vpop.eup %3796  ;;  %3814 = vrcp.f32 %v1740_v41 }
 0x1e4   : > { %v3799_v15 = vpop.eup %3798  ;;  %v2692_v2 = vadd.f32 %v2500_v55, %v6084_v19  ;;  %v1741_v42 = vadd.f32 1.0, %v3797_v46  ;;  %3816 = vpow2.f32 %v1549_v22  ;;  %v590_v22 = vld [vmem:[%s4251_s25 + $0x5e8] sm:$0xff]  ;;  %v591_v55 = vld [vmem:[%s4251_s25 + $0x5f0] sm:$0xff] }
 0x1e5   : > { %v3801_v31 = vpop.eup %3800  ;;  %v2309_v50 = vsub.f32 %v3799_v15, %v6109_v18  ;;  %3818 = vpow2.f32 %v1551_v39 }
 0x1e6   : > { %2884 = vst [vmem:[%s4303_s28 + $0x598] sm:$0xff] %v2692_v2  ;;  %v2310_v40 = vsub.f32 %v3801_v31, %v6117_v27  ;;  %3820 = vrcp.f32 %v1741_v42  ;;  %v592_v2 = vld [vmem:[%s4251_s25 + $0x5f8] sm:$0xff]  ;;  %s3858_s25 = scalar_lea.vmem %s6290_s19, 24576 }
 0x1e7   : > { %v3803_v57 = vpop.eup %3802  ;;  %v2501_v9 = vmul.f32 %v2309_v50, %v581_v3  ;;  %p3859_p11 = scmp.ne.s32.totalorder %s6290_s19, %s3858_s25  ;;  %p3866_p0 = scmp.lt.s32.totalorder %s3864_s9, %s3858_s25 }
 0x1e8   : > { %v3805_v19 = vpop.eup %3804  ;;  %v2502_v53 = vmul.f32 %v2310_v40, %v582_v44  ;;  %v2311_v43 = vsub.f32 %v3803_v57, %v6120_v1 }
 0x1e9   : > { %v3807_v58 = vpop.eup %3806  ;;  %v2693_v0 = vadd.f32 %v2501_v9, %v6109_v18  ;;  %v2312_v48 = vsub.f32 %v3805_v19, %v6130_v52  ;;  %p3860_p13 = pnand %p3859_p11, %p6346_p12  ;;  %p3867_p2 = por %p3866_p0, %p3865_p10 }
 0x1ea   : > { %v3809_v4 = vpop.eup %3808  ;;  %v2694_v29 = vadd.f32 %v2502_v53, %v6117_v27  ;;  %v2503_v24 = vmul.f32 %v2311_v43, %v583_v28  ;;  %v2313_v10 = vsub.f32 %v3807_v58, %v6152_v11 }
 0x1eb   : > { %v3811_v36 = vpop.eup %3810  ;;  %2885 = vst [vmem:[%s4303_s28 + $0x5a0] sm:$0xff] %v2693_v0  ;;  %v2504_v59 = vmul.f32 %v2312_v48, %v584_v35  ;;  %v2314_v63 = vsub.f32 %v3809_v4, %v6155_v12  ;;  %p3861_p8 = pneg %p3860_p13 }
 0x1ec   : > { %v3813_v61 = vpop.eup %3812  ;;  %2886 = vst [vmem:[%s4303_s28 + $0x5a8] sm:$0xff] %v2694_v29  ;;  %v2695_v18 = vadd.f32 %v2503_v24, %v6120_v1  ;;  %v2505_v23 = vmul.f32 %v2313_v10, %v585_v62  ;;  %v2315_v27 = vsub.f32 %v3811_v36, %v6158_v13 }
 0x1ed   : > { %v3815_v16 = vpop.eup %3814  ;;  %v2696_v60 = vadd.f32 %v2504_v59, %v6130_v52  ;;  %v2506_v54 = vmul.f32 %v2314_v63, %v586_v37  ;;  %v1742_v51 = vadd.f32 1.0, %v3813_v61  ;;  %p3868_p4 = pnand %p3867_p2, %p3861_p8 }
 0x1ee   : > { %v3817_v26 = vpop.eup %3816  ;;  %2887 = vst [vmem:[%s4303_s28 + $0x5b0] sm:$0xff] %v2695_v18  ;;  %v2697_v56 = vadd.f32 %v2505_v23, %v6152_v11  ;;  %v2507_v20 = vmul.f32 %v2315_v27, %v587_v14  ;;  %v2316_v1 = vsub.f32 %v3815_v16, %v6161_v25 }
 0x1ef   : > { %v3819_v38 = vpop.eup %3818  ;;  %2888 = vst [vmem:[%s4303_s28 + $0x5b8] sm:$0xff] %v2696_v60  ;;  %v2698_v33 = vadd.f32 %v2506_v54, %v6155_v12  ;;  %3822 = vrcp.f32 %v1742_v51  ;;  %v1743_v52 = vadd.f32 1.0, %v3817_v26 }
 0x1f0   : > { %v3821_v7 = vpop.eup %3820  ;;  %2889 = vst [vmem:[%s4303_s28 + $0x5c0] sm:$0xff] %v2697_v56  ;;  %v2699_v34 = vadd.f32 %v2507_v20, %v6158_v13  ;;  %v2508_v5 = vmul.f32 %v2316_v1, %v588_v47  ;;  %v1744_v11 = vadd.f32 1.0, %v3819_v38 }
 0x1f1   : > { %2890 = vst [vmem:[%s4303_s28 + $0x5c8] sm:$0xff] %v2698_v33  ;;  %v2317_v17 = vsub.f32 %v3821_v7, %v6181_v21  ;;  %3824 = vrcp.f32 %v1743_v52 }
 0x1f2   : > { %2891 = vst [vmem:[%s4303_s28 + $0x5d0] sm:$0xff] %v2699_v34  ;;  %v2700_v12 = vadd.f32 %v2508_v5, %v6161_v25  ;;  %3826 = vrcp.f32 %v1744_v11 }
 0x1f3   : > { %v2509_v45 = vmul.f32 %v2317_v17, %v589_v30 }
 0x1f4   : > { %2892 = vst [vmem:[%s4303_s28 + $0x5d8] sm:$0xff] %v2700_v12 }
 0x1f5   : > { %v2701_v32 = vadd.f32 %v2509_v45, %v6181_v21 }
 0x1f7   : > { %2893 = vst [vmem:[%s4303_s28 + $0x5e0] sm:$0xff] %v2701_v32 }
 0x1f9   : > { %v3823_v13 = vpop.eup %3822 }
 0x1fa   : > { %v2318_v41 = vsub.f32 %v3823_v13, %v6207_v8 }
 0x1fb   : > { %v3825_v39 = vpop.eup %3824 }
 0x1fc   : > { %v3827_v46 = vpop.eup %3826  ;;  %v2510_v15 = vmul.f32 %v2318_v41, %v590_v22  ;;  %v2319_v25 = vsub.f32 %v3825_v39, %v6214_v6 }
 0x1fd   : > { %v2320_v21 = vsub.f32 %v3827_v46, %v6226_v49 }
 0x1fe   : > { %v2702_v3 = vadd.f32 %v2510_v15, %v6207_v8  ;;  %v2511_v42 = vmul.f32 %v2319_v25, %v591_v55 }
 0x1ff   : > { %v2512_v31 = vmul.f32 %v2320_v21, %v592_v2 }
 0x200   : > { %2894 = vst [vmem:[%s4303_s28 + $0x5e8] sm:$0xff] %v2702_v3  ;;  %v2703_v50 = vadd.f32 %v2511_v42, %v6214_v6 }
 0x201   : > { %v2704_v44 = vadd.f32 %v2512_v31, %v6226_v49 }
 0x202   : > { %2895 = vst [vmem:[%s4303_s28 + $0x5f0] sm:$0xff] %v2703_v50 }
 0x203   : > { %2896 = vst [vmem:[%s4303_s28 + $0x5f8] sm:$0xff] %v2704_v44 }
 0x204   : > { %3871 = shalt.err (!%p3868_p4)
}
 0x205   : > { %s3872_s28 = scalar_lea.hbm %s6288_s27, 24576  ;;  %s3876_s6 = scalar_lea.hbm %s6340_s3, 49152 }
 0x206   : > { %p3873_p5 = scmp.ne.s32.totalorder %s6288_s27, %s3872_s28  ;;  %p3877_p1 = scmp.lt.u32.totalorder %s6288_s27, %s6340_s3 }
 0x207   : > { %p3878_p3 = scmp.lt.u32.totalorder %s3876_s6, %s3872_s28  ;;  %p3880_p11 = scmp.lt.u32.totalorder %s3872_s28, %s6288_s27 }
 0x208   : > { %p3874_p7 = pnand %p3873_p5, %p6346_p12 }
 0x209   : > { %p3879_p6 = por %p3878_p3, %p3877_p1 }
 0x20a   : > { %p3875_p9 = pneg %p3874_p7 }
 0x20b   : > { %p3881_p13 = por %p3880_p11, %p3879_p6 }
 0x20d   : > { %p3882_p8 = pnand %p3881_p13, %p3875_p9 }
 0x20f   : > { %3885 = shalt.err (!%p3882_p8)
}
 0x210   : > { %s3930_s11 = smov 256   ;;  %s3931_s17 = smov 16  }
 0x211   : > { %3012 = dma.vmem_to_hbm [thread:$0]  (%p6346_p12), %s6290_s19, 24576, %s6288_s27, %s2898_s16, %s3930_s11, %s3930_s11, %s3931_s17  }
 0x212 PF: > { %s2926_s10 = sand.u32 1, %s3912_s12   ;;  %p6347_p10 = scmp.ne.s32.totalorder %s6344_s24, 0 }
 0x213   : > { %p6348_p0 = scmp.ge.s32.totalorder %s3924_s15, 2  ;;  %s2927_s20 = scalar_lea.sflag [#allocation4], %s2926_s10 }
 0x215   : > { %p3019_p2 = pnand %p6348_p0, %p6347_p10 }
 0x217   : > { %3907 = dma.done.wait (!%p3019_p2), %s2927_s20, 24576  }
 0x218   : > { %3909 = vsyncadd (!%p3019_p2), %s2927_s20, 4294942720  ;;  %p16_p4 = scmp.ge.s32.totalorder %s3977_s18, 4   ;;  %s6349_s12 = smov %s3916_s13 }
 0x219   : > { %s6350_s13 = smov %s3920_s14  ;;  %s6351_s14 = smov %s3989_s21 }
 0x21a   : > { %s6352_s15 = smov %s3977_s18  ;;  %18 = sbr.rel (!%p16_p4) target bundleno = 5 (0x5), region = 80 }
 0x221   :  { %2932 = vsyncpa [#allocation3], 1 }
 0x222   :  { %2934 = vsyncpa [#allocation3 + $0x1], 1 }
 0x223   :  { %2935 = vsyncpa [#allocation4], 1 }
 0x224   :  { %2937 = vsyncpa [#allocation4 + $0x1], 1 }

</bundles_post_ra>
